<compile_context>
chip_gen: v5e
topology: v5e:2x2
jax: 0.10.0
libtpu: 0.0.40
codegen_flags: <defaults>
</compile_context>

<pallas_src>
import functools

import jax
import jax.numpy as jnp
import numpy as np
from jax.experimental import pallas as pl
from jax.experimental.pallas import tpu as pltpu

EPS = 1e-5


def _bn_train(y, gamma, beta, inv_m):
    """Train-mode BatchNorm over rows (per channel); centred variance; rsqrt on the EUP."""
    mean = jnp.sum(y, axis=0, keepdims=True) * inv_m
    d = y - mean
    var = jnp.sum(d * d, axis=0, keepdims=True) * inv_m
    return d * (gamma * jax.lax.rsqrt(var + EPS)) + beta


def resblock_down_kernel(*refs, fuse_shortcut):
    if fuse_shortcut:
        xpar_ref, w1c_ref, w2c_ref, bnp_ref, o_ref = refs
    else:
        xpar_ref, w1c_ref, wsc_ref, w2c_ref, bnp_ref, o_ref = refs

    N4, Hp1, Wp1, Cin = xpar_ref.shape
    N = N4 // 4
    Ho, Wo = Hp1 - 1, Wp1 - 1
    Cout = bnp_ref.shape[-1]
    M = N * Ho * Wo
    inv_m = 1.0 / M

    g1, be1 = bnp_ref[0:1, :], bnp_ref[1:2, :]
    g2, be2 = bnp_ref[2:3, :], bnp_ref[3:4, :]
    gsc, besc = bnp_ref[4:5, :], bnp_ref[5:6, :]

    # ---- conv1 (3x3 s2 p1) [+ fused 1x1 s2 shortcut]: taps stay bf16 end-to-end ----
    # parity planes: xpar[p, n, r, c, :] with p = 2*ph+pw equals xpad[n, 2r+ph, 2c+pw, :]
    xpv = xpar_ref[...]                                      # bf16 (4N, Ho+1, Wo+1, Cin)

    def tap1(kh, kw):
        p = 2 * (kh % 2) + (kw % 2)
        return xpv[p * N:(p + 1) * N,
                   kh // 2: kh // 2 + Ho,
                   kw // 2: kw // 2 + Wo, :]                 # = xpad[:, 2oh+kh, 2ow+kw, :]

    cat1 = jnp.concatenate([tap1(kh, kw) for kh in range(3) for kw in range(3)],
                           axis=-1).reshape(M, 9 * Cin)      # bf16 (M, 9*Cin)
    a1 = jnp.dot(cat1, w1c_ref[...], preferred_element_type=jnp.float32)
    if fuse_shortcut:
        y1, ysc = a1[:, :Cout], a1[:, Cout:]                 # conv1 / shortcut pre-BN
    else:
        y1 = a1
        ysc = jnp.dot(tap1(1, 1).reshape(M, Cin), wsc_ref[...],
                      preferred_element_type=jnp.float32)

    h = jnp.maximum(_bn_train(y1, g1, be1, inv_m), 0.0)      # f32 (M, Cout)
    sc = _bn_train(ysc, gsc, besc, inv_m)

    # ---- conv2 (3x3 s1 p1): bf16 value-level halo, no scratch-ref stores ----
    hb = h.astype(jnp.bfloat16).reshape(N, Ho, Wo, Cout)
    zr = jnp.zeros((N, 1, Wo, Cout), jnp.bfloat16)
    zc = jnp.zeros((N, Ho + 2, 1, Cout), jnp.bfloat16)
    hp = jnp.concatenate([zc, jnp.concatenate([zr, hb, zr], axis=1), zc], axis=2)
    cat2 = jnp.concatenate(
        [hp[:, kh:kh + Ho, kw:kw + Wo, :] for kh in range(3) for kw in range(3)],
        axis=-1).reshape(M, 9 * Cout)                        # bf16 (M, 9*Cout)
    y2 = jnp.dot(cat2, w2c_ref[...], preferred_element_type=jnp.float32)

    # fused: BN2 scale/shift + residual add + ReLU in one element-wise pass
    out = jnp.maximum(_bn_train(y2, g2, be2, inv_m) + sc, 0.0)   # f32 (M, Cout)

    # ---- lane-dense store: (M, Cout) -> (M//k, k*Cout) via minor-dim concatenate ----
    rows, cols = o_ref.shape
    k = cols // Cout
    out_r = out.reshape(rows, k, Cout)                       # minor dim unchanged (safe)
    o_ref[...] = jnp.concatenate([out_r[:, j, :] for j in range(k)], axis=-1)


def resblock_down(x_nchw, params):
    (w1, b1, g1, be1, w2, b2, g2, be2, wsc, bsc, gsc, besc) = params
    N, Cin, H, W = x_nchw.shape
    Cout = w1.shape[0]
    assert H % 2 == 0 and W % 2 == 0, "parity-plane layout assumes even H and W"
    Ho, Wo = H // 2, W // 2
    M = N * Ho * Wo

    # ---- glue: layout transforms only (no compute, no byte inflation) ----
    x = jnp.transpose(x_nchw, (0, 2, 3, 1))                          # NHWC
    xp = jnp.pad(x, ((0, 0), (1, 1), (1, 1), (0, 0)))                # (N, H+2, W+2, Cin)
    # 4 (row,col)-parity planes: same total bytes as the input; the 9 stride-2 conv1 taps
    # become plain static slices inside the kernel.
    xpar = jnp.concatenate(
        [xp[:, ph::2, pw::2, :] for ph in range(2) for pw in range(2)],
        axis=0).astype(jnp.bfloat16)                                 # (4N, Ho+1, Wo+1, Cin)

    # conv weights per tap, rows ordered (kh, kw, cin)
    w1_t = jnp.transpose(w1, (2, 3, 1, 0)).reshape(9 * Cin, Cout)
    wsc_mat = jnp.transpose(wsc[:, :, 0, 0], (1, 0))                 # (Cin, Cout)
    w2c = jnp.transpose(w2, (2, 3, 1, 0)).reshape(9 * Cout, Cout).astype(jnp.bfloat16)
    # conv biases b1/b2/bsc intentionally unused: exactly cancelled by train-mode BN.
    bnp = jnp.stack([g1, be1, g2, be2, gsc, besc]).astype(jnp.float32)   # (6, Cout)

    # Fuse the 1x1 shortcut into conv1's matmul only while its extra Cout columns ride in
    # an otherwise-underfilled MXU N tile; at large Cout run it as its own small-K matmul.
    fuse_sc = (2 * Cout) <= 128
    if fuse_sc:
        wsc_block = jnp.zeros((9 * Cin, Cout), w1.dtype).at[4 * Cin:5 * Cin, :].set(wsc_mat)
        w1c = jnp.concatenate([w1_t, wsc_block], axis=1).astype(jnp.bfloat16)  # (9Cin, 2Cout)
        inputs = (xpar, w1c, w2c, bnp)
    else:
        w1c = w1_t.astype(jnp.bfloat16)
        inputs = (xpar, w1c, wsc_mat.astype(jnp.bfloat16), w2c, bnp)

    # Lane-dense output shape: last dim a multiple of 128 -> unmasked vst + dense
    # writeback DMA; identical row-major flat order to (M, Cout), so undoing it is free.
    k = int(np.lcm(Cout, 128) // Cout)
    if M % k == 0 and k <= 64:
        out_shape = (M // k, k * Cout)
    else:
        out_shape = (M, Cout)   # fallback: narrow (masked) stores

    # VMEM budget from the buffers the kernel actually materialises, plus headroom for
    # tile padding / relayout temporaries; clamped to 48 MiB so we never request all of
    # v7x's 64 MiB (raise towards ~100 MiB on 128-MiB v5e/v6e for bigger resident tiles).
    est = (xpar.size * xpar.dtype.itemsize          # parity planes (bf16)
           + M * 9 * Cin * 2                        # cat1 (bf16)
           + M * 9 * Cout * 2                       # cat2 (bf16)
           + N * (Ho + 2) * (Wo + 2) * Cout * 2     # padded h (bf16)
           + 8 * M * Cout * 4                       # a1/y1/ysc/h/sc/y2/out/output (f32)
           + sum(int(np.prod(a.shape)) * a.dtype.itemsize for a in inputs[1:]))
    vmem_bytes = int(min(2 * est + (16 << 20), 48 << 20))

    out_flat = pl.pallas_call(
        functools.partial(resblock_down_kernel, fuse_shortcut=fuse_sc),
        out_shape=jax.ShapeDtypeStruct(out_shape, jnp.float32),
        in_specs=[pl.BlockSpec(memory_space=pltpu.MemorySpace.VMEM)] * len(inputs),
        out_specs=pl.BlockSpec(memory_space=pltpu.MemorySpace.VMEM),
        compiler_params=pltpu.CompilerParams(vmem_limit_bytes=vmem_bytes),
    )(*inputs)

    return jnp.transpose(out_flat.reshape(N, Ho, Wo, Cout), (0, 3, 1, 2))   # NCHW


# ---------------- pure-JAX f32 reference (for correctness check only) ----------------
def ref_forward(x_nchw, params):
    (w1, b1, g1, be1, w2, b2, g2, be2, wsc, bsc, gsc, besc) = params
    x = jnp.transpose(x_nchw, (0, 2, 3, 1)).astype(jnp.float32)

    def conv(inp, w, b, stride, pad):
        w_hwio = jnp.transpose(w, (2, 3, 1, 0))
        y = jax.lax.conv_general_dilated(
            inp, w_hwio, (stride, stride), [(pad, pad), (pad, pad)],
            dimension_numbers=("NHWC", "HWIO", "NHWC"),
            precision=jax.lax.Precision.HIGHEST)
        return y + b

    def bn(y, g, be):
        mean = jnp.mean(y, axis=(0, 1, 2), keepdims=True)
        var = jnp.mean((y - mean) ** 2, axis=(0, 1, 2), keepdims=True)
        return (y - mean) * (g * jax.lax.rsqrt(var + EPS)) + be

    h = jax.nn.relu(bn(conv(x, w1, b1, 2, 1), g1, be1))
    main = bn(conv(h, w2, b2, 1, 1), g2, be2)
    sc = bn(conv(x, wsc, bsc, 2, 0), gsc, besc)
    return jnp.transpose(jax.nn.relu(main + sc), (0, 3, 1, 2))


if __name__ == "__main__":
    N, Cin, Cout, H, W = 2, 4, 8, 16, 16

    key = jax.random.PRNGKey(0)
    ks = jax.random.split(key, 7)
    w1 = 0.1 * jax.random.normal(ks[0], (Cout, Cin, 3, 3), jnp.float32)
    b1 = 0.1 * jax.random.normal(ks[1], (Cout,), jnp.float32)
    w2 = 0.1 * jax.random.normal(ks[2], (Cout, Cout, 3, 3), jnp.float32)
    b2 = 0.1 * jax.random.normal(ks[3], (Cout,), jnp.float32)
    wsc = 0.1 * jax.random.normal(ks[4], (Cout, Cin, 1, 1), jnp.float32)
    bsc = 0.1 * jax.random.normal(ks[5], (Cout,), jnp.float32)

    idx = jnp.arange(Cout, dtype=jnp.float32)
    g1, be1 = 1.0 + 0.05 * idx, 0.02 * idx
    g2, be2 = 1.0 - 0.03 * idx, -0.01 * idx
    gsc, besc = 1.0 + 0.02 * idx, 0.03 * idx - 0.1

    params = (w1, b1, g1, be1, w2, b2, g2, be2, wsc, bsc, gsc, besc)
    x = jax.random.normal(ks[6], (N, Cin, H, W), jnp.float32)

    out = jax.block_until_ready(jax.jit(resblock_down)(x, params))
    ref = ref_forward(x, params)

    assert out.shape == (N, Cout, H // 2, W // 2), out.shape
    # bf16 MXU operands (f32 accumulation) vs. an f32 HIGHEST-precision reference.
    err = float(np.max(np.abs(np.asarray(out) - np.asarray(ref))))
    if not np.allclose(np.asarray(out), np.asarray(ref), rtol=5e-2, atol=5e-2):
        raise AssertionError(f"kernel/reference mismatch, max abs err = {err}")
    print("KERNEL_OK")
</pallas_src>

<mosaic_0001>
module attributes {stable_mosaic.version = 11 : i64} {
  func.func @resblock_down_kernel(%arg0: memref<8x9x9x4xbf16, #tpu.memory_space<vmem>>, %arg1: memref<36x16xbf16, #tpu.memory_space<vmem>>, %arg2: memref<72x8xbf16, #tpu.memory_space<vmem>>, %arg3: memref<6x8xf32, #tpu.memory_space<vmem>>, %arg4: memref<8x128xf32, #tpu.memory_space<vmem>>) attributes {dimension_semantics = [], scalar_prefetch = 0 : i64, scratch_operands = 0 : i64, tpu.core_type = #tpu.core_type<tc>} {
    %c0 = arith.constant 0 : index
    %c0_0 = arith.constant 0 : index
    %0 = vector.load %arg3[%c0, %c0_0] : memref<6x8xf32, #tpu.memory_space<vmem>>, vector<1x8xf32>
    %c1 = arith.constant 1 : index
    %c0_1 = arith.constant 0 : index
    %1 = vector.load %arg3[%c1, %c0_1] : memref<6x8xf32, #tpu.memory_space<vmem>>, vector<1x8xf32>
    %c2 = arith.constant 2 : index
    %c0_2 = arith.constant 0 : index
    %2 = vector.load %arg3[%c2, %c0_2] : memref<6x8xf32, #tpu.memory_space<vmem>>, vector<1x8xf32>
    %c3 = arith.constant 3 : index
    %c0_3 = arith.constant 0 : index
    %3 = vector.load %arg3[%c3, %c0_3] : memref<6x8xf32, #tpu.memory_space<vmem>>, vector<1x8xf32>
    %c4 = arith.constant 4 : index
    %c0_4 = arith.constant 0 : index
    %4 = vector.load %arg3[%c4, %c0_4] : memref<6x8xf32, #tpu.memory_space<vmem>>, vector<1x8xf32>
    %c5 = arith.constant 5 : index
    %c0_5 = arith.constant 0 : index
    %5 = vector.load %arg3[%c5, %c0_5] : memref<6x8xf32, #tpu.memory_space<vmem>>, vector<1x8xf32>
    %c0_6 = arith.constant 0 : index
    %c0_7 = arith.constant 0 : index
    %c0_8 = arith.constant 0 : index
    %c0_9 = arith.constant 0 : index
    %6 = vector.load %arg0[%c0_6, %c0_7, %c0_8, %c0_9] : memref<8x9x9x4xbf16, #tpu.memory_space<vmem>>, vector<8x9x9x4xbf16>
    %7 = vector.extract_strided_slice %6 {offsets = [0, 0, 0, 0], sizes = [2, 8, 8, 4], strides = [1, 1, 1, 1]} : vector<8x9x9x4xbf16> to vector<2x8x8x4xbf16>
    %8 = vector.extract_strided_slice %6 {offsets = [2, 0, 0, 0], sizes = [2, 8, 8, 4], strides = [1, 1, 1, 1]} : vector<8x9x9x4xbf16> to vector<2x8x8x4xbf16>
    %9 = vector.extract_strided_slice %6 {offsets = [0, 0, 1, 0], sizes = [2, 8, 8, 4], strides = [1, 1, 1, 1]} : vector<8x9x9x4xbf16> to vector<2x8x8x4xbf16>
    %10 = vector.extract_strided_slice %6 {offsets = [4, 0, 0, 0], sizes = [2, 8, 8, 4], strides = [1, 1, 1, 1]} : vector<8x9x9x4xbf16> to vector<2x8x8x4xbf16>
    %11 = vector.extract_strided_slice %6 {offsets = [6, 0, 0, 0], sizes = [2, 8, 8, 4], strides = [1, 1, 1, 1]} : vector<8x9x9x4xbf16> to vector<2x8x8x4xbf16>
    %12 = vector.extract_strided_slice %6 {offsets = [4, 0, 1, 0], sizes = [2, 8, 8, 4], strides = [1, 1, 1, 1]} : vector<8x9x9x4xbf16> to vector<2x8x8x4xbf16>
    %13 = vector.extract_strided_slice %6 {offsets = [0, 1, 0, 0], sizes = [2, 8, 8, 4], strides = [1, 1, 1, 1]} : vector<8x9x9x4xbf16> to vector<2x8x8x4xbf16>
    %14 = vector.extract_strided_slice %6 {offsets = [2, 1, 0, 0], sizes = [2, 8, 8, 4], strides = [1, 1, 1, 1]} : vector<8x9x9x4xbf16> to vector<2x8x8x4xbf16>
    %15 = vector.extract_strided_slice %6 {offsets = [0, 1, 1, 0], sizes = [2, 8, 8, 4], strides = [1, 1, 1, 1]} : vector<8x9x9x4xbf16> to vector<2x8x8x4xbf16>
    %16 = tpu.concatenate %7, %8, %9, %10, %11, %12, %13, %14, %15 in 3 : vector<2x8x8x4xbf16>, vector<2x8x8x4xbf16>, vector<2x8x8x4xbf16>, vector<2x8x8x4xbf16>, vector<2x8x8x4xbf16>, vector<2x8x8x4xbf16>, vector<2x8x8x4xbf16>, vector<2x8x8x4xbf16>, vector<2x8x8x4xbf16> -> vector<2x8x8x36xbf16>
    %17 = vector.shape_cast %16 : vector<2x8x8x36xbf16> to vector<128x36xbf16>
    %c0_10 = arith.constant 0 : index
    %c0_11 = arith.constant 0 : index
    %18 = vector.load %arg1[%c0_10, %c0_11] : memref<36x16xbf16, #tpu.memory_space<vmem>>, vector<36x16xbf16>
    %cst = arith.constant dense<0.000000e+00> : vector<128x16xf32>
    %19 = tpu.matmul %17, %18, %cst {dimension_numbers = #tpu.dot_dimension_numbers<[1], [0], [0], [1], [0, 0, 1, 1], [], []>} : vector<128x36xbf16>, vector<36x16xbf16>, vector<128x16xf32> -> vector<128x16xf32>
    %20 = vector.extract_strided_slice %19 {offsets = [0, 0], sizes = [128, 8], strides = [1, 1]} : vector<128x16xf32> to vector<128x8xf32>
    %21 = vector.extract_strided_slice %19 {offsets = [0, 8], sizes = [128, 8], strides = [1, 1]} : vector<128x16xf32> to vector<128x8xf32>
    %cst_12 = arith.constant dense<0.000000e+00> : vector<8xf32>
    %22 = vector.multi_reduction <add>, %20, %cst_12 [0] : vector<128x8xf32> to vector<8xf32>
    %23 = vector.shape_cast %22 : vector<8xf32> to vector<1x8xf32>
    %cst_13 = arith.constant 7.812500e-03 : f32
    %24 = vector.broadcast %cst_13 : f32 to vector<1x8xf32>
    %25 = arith.mulf %23, %24 : vector<1x8xf32>
    %26 = vector.broadcast %25 : vector<1x8xf32> to vector<128x8xf32>
    %27 = arith.subf %20, %26 : vector<128x8xf32>
    %28 = arith.mulf %27, %27 : vector<128x8xf32>
    %cst_14 = arith.constant dense<0.000000e+00> : vector<8xf32>
    %29 = vector.multi_reduction <add>, %28, %cst_14 [0] : vector<128x8xf32> to vector<8xf32>
    %30 = vector.shape_cast %29 : vector<8xf32> to vector<1x8xf32>
    %cst_15 = arith.constant 7.812500e-03 : f32
    %31 = vector.broadcast %cst_15 : f32 to vector<1x8xf32>
    %32 = arith.mulf %30, %31 : vector<1x8xf32>
    %cst_16 = arith.constant 9.99999974E-6 : f32
    %33 = vector.broadcast %cst_16 : f32 to vector<1x8xf32>
    %34 = arith.addf %32, %33 : vector<1x8xf32>
    %35 = math.rsqrt %34 : vector<1x8xf32>
    %36 = arith.mulf %0, %35 : vector<1x8xf32>
    %37 = vector.broadcast %36 : vector<1x8xf32> to vector<128x8xf32>
    %38 = arith.mulf %27, %37 : vector<128x8xf32>
    %39 = vector.broadcast %1 : vector<1x8xf32> to vector<128x8xf32>
    %40 = arith.addf %38, %39 : vector<128x8xf32>
    %cst_17 = arith.constant 0.000000e+00 : f32
    %41 = vector.broadcast %cst_17 : f32 to vector<128x8xf32>
    %42 = arith.maximumf %40, %41 : vector<128x8xf32>
    %cst_18 = arith.constant dense<0.000000e+00> : vector<8xf32>
    %43 = vector.multi_reduction <add>, %21, %cst_18 [0] : vector<128x8xf32> to vector<8xf32>
    %44 = vector.shape_cast %43 : vector<8xf32> to vector<1x8xf32>
    %cst_19 = arith.constant 7.812500e-03 : f32
    %45 = vector.broadcast %cst_19 : f32 to vector<1x8xf32>
    %46 = arith.mulf %44, %45 : vector<1x8xf32>
    %47 = vector.broadcast %46 : vector<1x8xf32> to vector<128x8xf32>
    %48 = arith.subf %21, %47 : vector<128x8xf32>
    %49 = arith.mulf %48, %48 : vector<128x8xf32>
    %cst_20 = arith.constant dense<0.000000e+00> : vector<8xf32>
    %50 = vector.multi_reduction <add>, %49, %cst_20 [0] : vector<128x8xf32> to vector<8xf32>
    %51 = vector.shape_cast %50 : vector<8xf32> to vector<1x8xf32>
    %cst_21 = arith.constant 7.812500e-03 : f32
    %52 = vector.broadcast %cst_21 : f32 to vector<1x8xf32>
    %53 = arith.mulf %51, %52 : vector<1x8xf32>
    %cst_22 = arith.constant 9.99999974E-6 : f32
    %54 = vector.broadcast %cst_22 : f32 to vector<1x8xf32>
    %55 = arith.addf %53, %54 : vector<1x8xf32>
    %56 = math.rsqrt %55 : vector<1x8xf32>
    %57 = arith.mulf %4, %56 : vector<1x8xf32>
    %58 = vector.broadcast %57 : vector<1x8xf32> to vector<128x8xf32>
    %59 = arith.mulf %48, %58 : vector<128x8xf32>
    %60 = vector.broadcast %5 : vector<1x8xf32> to vector<128x8xf32>
    %61 = arith.addf %59, %60 : vector<128x8xf32>
    %62 = arith.truncf %42 : vector<128x8xf32> to vector<128x8xbf16>
    %63 = vector.shape_cast %62 : vector<128x8xbf16> to vector<2x8x8x8xbf16>
    %cst_23 = arith.constant 0.000000e+00 : bf16
    %64 = vector.broadcast %cst_23 : bf16 to vector<2x1x8x8xbf16>
    %cst_24 = arith.constant 0.000000e+00 : bf16
    %65 = vector.broadcast %cst_24 : bf16 to vector<2x10x1x8xbf16>
    %66 = tpu.concatenate %64, %63, %64 in 1 : vector<2x1x8x8xbf16>, vector<2x8x8x8xbf16>, vector<2x1x8x8xbf16> -> vector<2x10x8x8xbf16>
    %67 = tpu.concatenate %65, %66, %65 in 2 : vector<2x10x1x8xbf16>, vector<2x10x8x8xbf16>, vector<2x10x1x8xbf16> -> vector<2x10x10x8xbf16>
    %68 = vector.extract_strided_slice %67 {offsets = [0, 0, 0, 0], sizes = [2, 8, 8, 8], strides = [1, 1, 1, 1]} : vector<2x10x10x8xbf16> to vector<2x8x8x8xbf16>
    %69 = vector.extract_strided_slice %67 {offsets = [0, 0, 1, 0], sizes = [2, 8, 8, 8], strides = [1, 1, 1, 1]} : vector<2x10x10x8xbf16> to vector<2x8x8x8xbf16>
    %70 = vector.extract_strided_slice %67 {offsets = [0, 0, 2, 0], sizes = [2, 8, 8, 8], strides = [1, 1, 1, 1]} : vector<2x10x10x8xbf16> to vector<2x8x8x8xbf16>
    %71 = vector.extract_strided_slice %67 {offsets = [0, 1, 0, 0], sizes = [2, 8, 8, 8], strides = [1, 1, 1, 1]} : vector<2x10x10x8xbf16> to vector<2x8x8x8xbf16>
    %72 = vector.extract_strided_slice %67 {offsets = [0, 1, 1, 0], sizes = [2, 8, 8, 8], strides = [1, 1, 1, 1]} : vector<2x10x10x8xbf16> to vector<2x8x8x8xbf16>
    %73 = vector.extract_strided_slice %67 {offsets = [0, 1, 2, 0], sizes = [2, 8, 8, 8], strides = [1, 1, 1, 1]} : vector<2x10x10x8xbf16> to vector<2x8x8x8xbf16>
    %74 = vector.extract_strided_slice %67 {offsets = [0, 2, 0, 0], sizes = [2, 8, 8, 8], strides = [1, 1, 1, 1]} : vector<2x10x10x8xbf16> to vector<2x8x8x8xbf16>
    %75 = vector.extract_strided_slice %67 {offsets = [0, 2, 1, 0], sizes = [2, 8, 8, 8], strides = [1, 1, 1, 1]} : vector<2x10x10x8xbf16> to vector<2x8x8x8xbf16>
    %76 = vector.extract_strided_slice %67 {offsets = [0, 2, 2, 0], sizes = [2, 8, 8, 8], strides = [1, 1, 1, 1]} : vector<2x10x10x8xbf16> to vector<2x8x8x8xbf16>
    %77 = tpu.concatenate %68, %69, %70, %71, %72, %73, %74, %75, %76 in 3 : vector<2x8x8x8xbf16>, vector<2x8x8x8xbf16>, vector<2x8x8x8xbf16>, vector<2x8x8x8xbf16>, vector<2x8x8x8xbf16>, vector<2x8x8x8xbf16>, vector<2x8x8x8xbf16>, vector<2x8x8x8xbf16>, vector<2x8x8x8xbf16> -> vector<2x8x8x72xbf16>
    %78 = vector.shape_cast %77 : vector<2x8x8x72xbf16> to vector<128x72xbf16>
    %c0_25 = arith.constant 0 : index
    %c0_26 = arith.constant 0 : index
    %79 = vector.load %arg2[%c0_25, %c0_26] : memref<72x8xbf16, #tpu.memory_space<vmem>>, vector<72x8xbf16>
    %cst_27 = arith.constant dense<0.000000e+00> : vector<128x8xf32>
    %80 = tpu.matmul %78, %79, %cst_27 {dimension_numbers = #tpu.dot_dimension_numbers<[1], [0], [0], [1], [0, 0, 1, 1], [], []>} : vector<128x72xbf16>, vector<72x8xbf16>, vector<128x8xf32> -> vector<128x8xf32>
    %cst_28 = arith.constant dense<0.000000e+00> : vector<8xf32>
    %81 = vector.multi_reduction <add>, %80, %cst_28 [0] : vector<128x8xf32> to vector<8xf32>
    %82 = vector.shape_cast %81 : vector<8xf32> to vector<1x8xf32>
    %cst_29 = arith.constant 7.812500e-03 : f32
    %83 = vector.broadcast %cst_29 : f32 to vector<1x8xf32>
    %84 = arith.mulf %82, %83 : vector<1x8xf32>
    %85 = vector.broadcast %84 : vector<1x8xf32> to vector<128x8xf32>
    %86 = arith.subf %80, %85 : vector<128x8xf32>
    %87 = arith.mulf %86, %86 : vector<128x8xf32>
    %cst_30 = arith.constant dense<0.000000e+00> : vector<8xf32>
    %88 = vector.multi_reduction <add>, %87, %cst_30 [0] : vector<128x8xf32> to vector<8xf32>
    %89 = vector.shape_cast %88 : vector<8xf32> to vector<1x8xf32>
    %cst_31 = arith.constant 7.812500e-03 : f32
    %90 = vector.broadcast %cst_31 : f32 to vector<1x8xf32>
    %91 = arith.mulf %89, %90 : vector<1x8xf32>
    %cst_32 = arith.constant 9.99999974E-6 : f32
    %92 = vector.broadcast %cst_32 : f32 to vector<1x8xf32>
    %93 = arith.addf %91, %92 : vector<1x8xf32>
    %94 = math.rsqrt %93 : vector<1x8xf32>
    %95 = arith.mulf %2, %94 : vector<1x8xf32>
    %96 = vector.broadcast %95 : vector<1x8xf32> to vector<128x8xf32>
    %97 = arith.mulf %86, %96 : vector<128x8xf32>
    %98 = vector.broadcast %3 : vector<1x8xf32> to vector<128x8xf32>
    %99 = arith.addf %97, %98 : vector<128x8xf32>
    %100 = arith.addf %99, %61 : vector<128x8xf32>
    %cst_33 = arith.constant 0.000000e+00 : f32
    %101 = vector.broadcast %cst_33 : f32 to vector<128x8xf32>
    %102 = arith.maximumf %100, %101 : vector<128x8xf32>
    %103 = vector.shape_cast %102 : vector<128x8xf32> to vector<8x16x8xf32>
    %104 = vector.extract_strided_slice %103 {offsets = [0, 0, 0], sizes = [8, 1, 8], strides = [1, 1, 1]} : vector<8x16x8xf32> to vector<8x1x8xf32>
    %105 = vector.shape_cast %104 : vector<8x1x8xf32> to vector<8x8xf32>
    %106 = vector.extract_strided_slice %103 {offsets = [0, 1, 0], sizes = [8, 1, 8], strides = [1, 1, 1]} : vector<8x16x8xf32> to vector<8x1x8xf32>
    %107 = vector.shape_cast %106 : vector<8x1x8xf32> to vector<8x8xf32>
    %108 = vector.extract_strided_slice %103 {offsets = [0, 2, 0], sizes = [8, 1, 8], strides = [1, 1, 1]} : vector<8x16x8xf32> to vector<8x1x8xf32>
    %109 = vector.shape_cast %108 : vector<8x1x8xf32> to vector<8x8xf32>
    %110 = vector.extract_strided_slice %103 {offsets = [0, 3, 0], sizes = [8, 1, 8], strides = [1, 1, 1]} : vector<8x16x8xf32> to vector<8x1x8xf32>
    %111 = vector.shape_cast %110 : vector<8x1x8xf32> to vector<8x8xf32>
    %112 = vector.extract_strided_slice %103 {offsets = [0, 4, 0], sizes = [8, 1, 8], strides = [1, 1, 1]} : vector<8x16x8xf32> to vector<8x1x8xf32>
    %113 = vector.shape_cast %112 : vector<8x1x8xf32> to vector<8x8xf32>
    %114 = vector.extract_strided_slice %103 {offsets = [0, 5, 0], sizes = [8, 1, 8], strides = [1, 1, 1]} : vector<8x16x8xf32> to vector<8x1x8xf32>
    %115 = vector.shape_cast %114 : vector<8x1x8xf32> to vector<8x8xf32>
    %116 = vector.extract_strided_slice %103 {offsets = [0, 6, 0], sizes = [8, 1, 8], strides = [1, 1, 1]} : vector<8x16x8xf32> to vector<8x1x8xf32>
    %117 = vector.shape_cast %116 : vector<8x1x8xf32> to vector<8x8xf32>
    %118 = vector.extract_strided_slice %103 {offsets = [0, 7, 0], sizes = [8, 1, 8], strides = [1, 1, 1]} : vector<8x16x8xf32> to vector<8x1x8xf32>
    %119 = vector.shape_cast %118 : vector<8x1x8xf32> to vector<8x8xf32>
    %120 = vector.extract_strided_slice %103 {offsets = [0, 8, 0], sizes = [8, 1, 8], strides = [1, 1, 1]} : vector<8x16x8xf32> to vector<8x1x8xf32>
    %121 = vector.shape_cast %120 : vector<8x1x8xf32> to vector<8x8xf32>
    %122 = vector.extract_strided_slice %103 {offsets = [0, 9, 0], sizes = [8, 1, 8], strides = [1, 1, 1]} : vector<8x16x8xf32> to vector<8x1x8xf32>
    %123 = vector.shape_cast %122 : vector<8x1x8xf32> to vector<8x8xf32>
    %124 = vector.extract_strided_slice %103 {offsets = [0, 10, 0], sizes = [8, 1, 8], strides = [1, 1, 1]} : vector<8x16x8xf32> to vector<8x1x8xf32>
    %125 = vector.shape_cast %124 : vector<8x1x8xf32> to vector<8x8xf32>
    %126 = vector.extract_strided_slice %103 {offsets = [0, 11, 0], sizes = [8, 1, 8], strides = [1, 1, 1]} : vector<8x16x8xf32> to vector<8x1x8xf32>
    %127 = vector.shape_cast %126 : vector<8x1x8xf32> to vector<8x8xf32>
    %128 = vector.extract_strided_slice %103 {offsets = [0, 12, 0], sizes = [8, 1, 8], strides = [1, 1, 1]} : vector<8x16x8xf32> to vector<8x1x8xf32>
    %129 = vector.shape_cast %128 : vector<8x1x8xf32> to vector<8x8xf32>
    %130 = vector.extract_strided_slice %103 {offsets = [0, 13, 0], sizes = [8, 1, 8], strides = [1, 1, 1]} : vector<8x16x8xf32> to vector<8x1x8xf32>
    %131 = vector.shape_cast %130 : vector<8x1x8xf32> to vector<8x8xf32>
    %132 = vector.extract_strided_slice %103 {offsets = [0, 14, 0], sizes = [8, 1, 8], strides = [1, 1, 1]} : vector<8x16x8xf32> to vector<8x1x8xf32>
    %133 = vector.shape_cast %132 : vector<8x1x8xf32> to vector<8x8xf32>
    %134 = vector.extract_strided_slice %103 {offsets = [0, 15, 0], sizes = [8, 1, 8], strides = [1, 1, 1]} : vector<8x16x8xf32> to vector<8x1x8xf32>
    %135 = vector.shape_cast %134 : vector<8x1x8xf32> to vector<8x8xf32>
    %136 = tpu.concatenate %105, %107, %109, %111, %113, %115, %117, %119, %121, %123, %125, %127, %129, %131, %133, %135 in 1 : vector<8x8xf32>, vector<8x8xf32>, vector<8x8xf32>, vector<8x8xf32>, vector<8x8xf32>, vector<8x8xf32>, vector<8x8xf32>, vector<8x8xf32>, vector<8x8xf32>, vector<8x8xf32>, vector<8x8xf32>, vector<8x8xf32>, vector<8x8xf32>, vector<8x8xf32>, vector<8x8xf32>, vector<8x8xf32> -> vector<8x128xf32>
    %c0_34 = arith.constant 0 : index
    %c0_35 = arith.constant 0 : index
    %137 = vector.load %arg4[%c0_34, %c0_35] : memref<8x128xf32, #tpu.memory_space<vmem>>, vector<8x128xf32>
    tpu.vector_store %arg4[%c0_34, %c0_35], %136 {strides = array<i32>} : memref<8x128xf32, #tpu.memory_space<vmem>>, vector<8x128xf32>,
    return
  }
}

</mosaic_0001>

<bundles_post_ra>
// kernel: resblock_down.1
= control target key start
LH: loop header
LB: loop body
LE: loop exit
PB: predicated region body
PF: predicated region fallthrough
CT: control target
= control target key end

     0   :  { %s3342_s27 = smov 4   ;;  %s3343_s30 = smov 8   ;;  %vm1289_vm0 = vcmask 1041408   ;;  %vm924_vm1 = vcmask 31744   ;;  %vm973_vm2 = vcmask 64512   ;;  %vm1006_vm3 = vcmask 97280   ;;  %s5948_s0 = inlined_call_operand.vmem [shape: bf16[8,9,9,4], index: 0, kind: input, shape index: {}]   ;;  %s5949_s1 = inlined_call_operand.vmem [shape: bf16[36,16], index: 1, kind: input, shape index: {}]   ;;  %s5950_s3 = inlined_call_operand.vmem [shape: f32[6,8], index: 3, kind: input, shape index: {}]   ;;  %s5951_s2 = inlined_call_operand.vmem [shape: bf16[72,8], index: 2, kind: input, shape index: {}]   ;;  %s5952_s4 = inlined_call_operand.vmem [shape: f32[8,128], index: 4, kind: output, shape index: {}]  }
   0x1   :  { %v64_v0 = vld [vmem:[%s5948_s0 + $0xb0] sm:$0xf]  ;;  %v62_v1 = vld [vmem:[%s5948_s0 + $0xa0] sm:$0xf]  ;;  %v65_v6 = vld [vmem:[%s5948_s0 + $0xb8] sm:$0xf] }
   0x2   :  { %v60_v2 = vld [vmem:[%s5948_s0 + $0x90] sm:$0xf]  ;;  %v146_v3 = vunpack.c.l.b16 %v64_v0  ;;  %v144_v4 = vunpack.c.l.b16 %v62_v1  ;;  %v63_v7 = vld [vmem:[%s5948_s0 + $0xa8] sm:$0xf]  ;;  %v61_v11 = vld [vmem:[%s5948_s0 + $0x98] sm:$0xf]  ;;  %v147_v12 = vunpack.c.l.b16 %v65_v6 }
   0x3   :  { %v142_v5 = vunpack.c.l.b16 %v60_v2  ;;  %v145_v13 = vunpack.c.l.b16 %v63_v7  ;;  %v143_v14 = vunpack.c.l.b16 %v61_v11  ;;  %v69_v18 = vld [vmem:[%s5948_s0 + $0xd8] sm:$0xf]  ;;  %v67_v19 = vld [vmem:[%s5948_s0 + $0xc8] sm:$0xf]  ;;  %v66_v20 = vld [vmem:[%s5948_s0 + $0xc0] sm:$0xf] }
   0x4   :  { %v3402_v8 = vpack.c.b16 %v146_v3, %v146_v3  ;;  %v3404_v9 = vpack.c.b16 %v144_v4, %v144_v4  ;;  %v3414_v15 = vpack.c.b16 %v147_v12, %v147_v12  ;;  %v150_v21 = vunpack.c.l.b16 %v69_v18  ;;  %v72_v27 = vld [vmem:[%s5948_s0 + $0xf0] sm:$0xf]  ;;  %v71_v28 = vld [vmem:[%s5948_s0 + $0xe8] sm:$0xf]  ;;  %v70_v29 = vld [vmem:[%s5948_s0 + $0xe0] sm:$0xf] }
   0x5   :  { %v158_v10 = vpack.c.b16 %v142_v5, %v142_v5  ;;  %v3416_v16 = vpack.c.b16 %v145_v13, %v145_v13  ;;  %v3418_v17 = vpack.c.b16 %v143_v14, %v143_v14  ;;  %v149_v22 = vunpack.c.l.b16 %v67_v19  ;;  %v3451_v30 = vld [vmem:[%s5948_s0 + $0x8] sm:$0xf]  ;;  %v27_v31 = vld [vmem:[%s5948_s0 + $0xc] sm:$0x1]  ;;  %v3248_v37 = vld [vmem:[%s5948_s0] sm:$0xf] }
   0x6   :  { %182 = vrot.lane.b32.xlu2 %v3402_v8, %s3342_s27  ;;  %178 = vrot.lane.b32.xlu1 %v3404_v9, %s3342_s27  ;;  %v148_v23 = vunpack.c.l.b16 %v66_v20  ;;  %v166_v24 = vpack.c.b16 %v150_v21, %v150_v21  ;;  %v153_v32 = vunpack.c.l.b16 %v72_v27  ;;  %v152_v33 = vunpack.c.l.b16 %v71_v28  ;;  %v3294_v38 = vld [vmem:[%s5948_s0] sm:$0x10]  ;;  %v75_v42 = vld [vmem:[%s5948_s0 + $0x108] sm:$0xf]  ;;  %s3344_s20 = smov 12   ;;  %s3345_s21 = smov 20  }
   0x7   :  { %174 = vrot.lane.b32.xlu0 %v158_v10, %s3342_s27  ;;  %v3435_v25 = vpack.c.b16 %v149_v22, %v149_v22  ;;  %v151_v34 = vunpack.c.l.b16 %v70_v29  ;;  %v3462_v35 = vunpack.c.l.b16 %v3451_v30  ;;  %v241_v36 = vunpack.c.l.b16 %v27_v31  ;;  %v74_v43 = vld [vmem:[%s5948_s0 + $0x100] sm:$0xf]  ;;  %v73_v44 = vld [vmem:[%s5948_s0 + $0xf8] sm:$0xf]  ;;  %v33_v48 = vld [vmem:[%s5948_s0 + $0x24] sm:$0x1] }
   0x8   :  { %v3437_v26 = vpack.c.b16 %v148_v23, %v148_v23  ;;  %v3470_v39 = vpack.c.b16 %v153_v32, %v153_v32  ;;  %v3472_v40 = vpack.c.b16 %v152_v33, %v152_v33  ;;  %v3249_v46 = vor.u32 %v3294_v38, %v3248_v37  ;;  %v32_v47 = vld [vmem:[%s5948_s0 + $0x20] sm:$0xf]  ;;  %v3499_v51 = vld [vmem:[%s5948_s0 + $0x18] sm:$0xf]  ;;  %v31_v52 = vld [vmem:[%s5948_s0 + $0x1c] sm:$0x1] }
   0x9   :  { %v3474_v41 = vpack.c.b16 %v151_v34, %v151_v34  ;;  %v271_v45 = vpack.c.b16 %v241_v36, %v3462_v35  ;;  %v156_v49 = vunpack.c.l.b16 %v75_v42  ;;  %v155_v50 = vunpack.c.l.b16 %v74_v43  ;;  %v3509_v56 = vld [vmem:[%s5948_s0 + $0x10] sm:$0xf]  ;;  %v29_v57 = vld [vmem:[%s5948_s0 + $0x14] sm:$0x1]  ;;  %v38_v12 = vld [vmem:[%s5948_s0 + $0x38] sm:$0xf] }
   0xa   :  { %v154_v53 = vunpack.c.l.b16 %v73_v44  ;;  %v289_v55 = vshll.u32 %v3249_v46, 16  ;;  %v3514_v58 = vunpack.c.l.b16 %v32_v47  ;;  %v247_v59 = vunpack.c.l.b16 %v33_v48  ;;  %v76_v3 = vld [vmem:[%s5948_s0 + $0x110] sm:$0xf]  ;;  %v39_v18 = vld [vmem:[%s5948_s0 + $0x3c] sm:$0x1]  ;;  %s3346_s22 = smov 16  }
   0xb   :  { %v296_v54 = vshll.u32 %v271_v45, 16  ;;  %v3517_v60 = vunpack.c.l.b16 %v3499_v51  ;;  %v245_v61 = vunpack.c.l.b16 %v31_v52  ;;  %v3519_v62 = vpack.c.b16 %v156_v49, %v156_v49  ;;  %v36_v19 = vld [vmem:[%s5948_s0 + $0x30] sm:$0xf]  ;;  %v37_v20 = vld [vmem:[%s5948_s0 + $0x34] sm:$0x1]  ;;  %s3347_s23 = smov 24  }
   0xc   :  { %v3521_v63 = vpack.c.b16 %v155_v50, %v155_v50  ;;  %v3523_v0 = vpack.c.b16 %v154_v53, %v154_v53  ;;  %v3526_v1 = vunpack.c.l.b16 %v3509_v56  ;;  %v243_v2 = vunpack.c.l.b16 %v29_v57  ;;  %v3555_v21 = vld [vmem:[%s5948_s0 + $0x28] sm:$0xf]  ;;  %v35_v22 = vld [vmem:[%s5948_s0 + $0x2c] sm:$0x1]  ;;  %s3348_s6 = smov 32   ;;  %s3349_s7 = smov 28  }
   0xd   :  { %v294_v4 = vshrl.u32 %v271_v45, 16  ;;  %v287_v5 = vshrl.u32 %v3249_v46, 16  ;;  %v298_v6 = vrot.slane %v296_v54, 1  ;;  %v291_v7 = vrot.slane %v289_v55, 1  ;;  %s3351_s29 = smov 120   ;;  %s3352_s5 = smov 48  }
   0xe   :  { %184 = vrot.lane.b32.xlu2 %v3414_v15, %s3342_s27  ;;  %180 = vrot.lane.b32.xlu1 %v3416_v16, %s3342_s27  ;;  %v274_v10 = vpack.c.b16 %v247_v59, %v3514_v58  ;;  %v273_v11 = vpack.c.b16 %v245_v61, %v3517_v60  ;;  %v157_v13 = vunpack.c.l.b16 %v76_v3  ;;  %v272_v14 = vpack.c.b16 %v243_v2, %v3526_v1  ;;  %v3252_v61 = vld [vmem:[%s5948_s0 + $0x48] sm:$0xf]  ;;  %v3295_v2 = vld [vmem:[%s5948_s0 + $0x48] sm:$0x10]  ;;  %s3353_s8 = smov 40   ;;  %s3355_s9 = smov 56  }
   0xf   :  { %176 = vrot.lane.b32.xlu0 %v3418_v17, %s3342_s27  ;;  %v3560_v23 = vor.u32 %v298_v6, %v294_v4  ;;  %v3562_v29 = vunpack.c.l.b16 %v38_v12  ;;  %v253_v31 = vunpack.c.l.b16 %v39_v18  ;;  %v3564_v32 = vunpack.c.l.b16 %v36_v19  ;;  %v79_v12 = vld [vmem:[%s5948_s0 + $0x124] sm:$0x1]  ;;  %s3361_s24 = smov 112  }
  0x10   :  { %v317_v27 = vshll.u32 %v274_v10, 16  ;;  %v310_v28 = vshll.u32 %v273_v11, 16  ;;  %v251_v33 = vunpack.c.l.b16 %v37_v20  ;;  %v3566_v34 = vpack.c.b16 %v157_v13, %v157_v13  ;;  %v78_v13 = vld [vmem:[%s5948_s0 + $0x120] sm:$0xf] }
  0x11   :  { %v303_v36 = vshll.u32 %v272_v14, 16  ;;  %v3569_v37 = vunpack.c.l.b16 %v3555_v21  ;;  %v249_v38 = vunpack.c.l.b16 %v35_v22  ;;  %v315_v42 = vshrl.u32 %v274_v10, 16 }
  0x12   :  { %v308_v43 = vshrl.u32 %v273_v11, 16  ;;  %v319_v44 = vrot.slane %v317_v27, 1  ;;  %v312_v45 = vrot.slane %v310_v28, 1  ;;  %v277_v46 = vpack.c.b16 %v253_v31, %v3562_v29 }
  0x13   :  { %v276_v47 = vpack.c.b16 %v251_v33, %v3564_v32  ;;  %v301_v48 = vshrl.u32 %v272_v14, 16  ;;  %v305_v49 = vrot.slane %v303_v36, 1  ;;  %v275_v50 = vpack.c.b16 %v249_v38, %v3569_v37  ;;  %v81_v38 = vld [vmem:[%s5948_s0 + $0x12c] sm:$0x1] }
  0x14   :  { %v3579_v52 = vor.u32 %v319_v44, %v315_v42  ;;  %v3581_v53 = vor.u32 %v312_v45, %v308_v43  ;;  %v338_v54 = vshll.u32 %v277_v46, 16  ;;  %v336_v3 = vshrl.u32 %v277_v46, 16  ;;  %v111_v46 = vld [vmem:[%s5948_s0 + $0x1b8] sm:$0xf] }
  0x15   :  { %v331_v55 = vshll.u32 %v276_v47, 16  ;;  %v3583_v57 = vor.u32 %v305_v49, %v301_v48  ;;  %v324_v59 = vshll.u32 %v275_v50, 16  ;;  %v3253_v11 = vor.u32 %v3295_v2, %v3252_v61  ;;  %v110_v48 = vld [vmem:[%s5948_s0 + $0x1b0] sm:$0xf] }
  0x16   :  { %190 = vrot.lane.b32.xlu2 %v166_v24, %s3342_s27  ;;  %188 = vrot.lane.b32.xlu1 %v3435_v25, %s3342_s27  ;;  %v292_v24 = vor.u32 %v291_v7, %v287_v5  ;;  %v340_v4 = vrot.slane %v338_v54, 1  ;;  %v329_v5 = vshrl.u32 %v276_v47, 16  ;;  %v322_v7 = vshrl.u32 %v275_v50, 16 }
  0x17   :  { %186 = vrot.lane.b32.xlu0 %v3437_v26, %s3342_s27  ;;  %v333_v6 = vrot.slane %v331_v55, 1  ;;  %v326_v10 = vrot.slane %v324_v59, 1  ;;  %v606_v19 = vunpack.c.l.b16 %v79_v12  ;;  %v345_v22 = vshll.u32 %v3253_v11, 16  ;;  %v83_v12 = vld [vmem:[%s5948_s0 + $0x134] sm:$0x1] }
  0x18   :  { %v3603_v14 = vor.u32 %v340_v4, %v336_v3  ;;  %v446_v27 = vunpack.c.l.b16 %v78_v13  ;;  %v343_v33 = vshrl.u32 %v3253_v11, 16  ;;  %v607_v47 = vunpack.c.l.b16 %v81_v38  ;;  %v82_v13 = vld [vmem:[%s5948_s0 + $0x130] sm:$0xf] }
  0x19   :  { %v3605_v18 = vor.u32 %v333_v6, %v329_v5  ;;  %v3607_v20 = vor.u32 %v326_v10, %v322_v7  ;;  %v347_v36 = vrot.slane %v345_v22, 1  ;;  %v527_v54 = vunpack.c.l.b16 %v111_v46 }
  0x1a   :  { %v622_v31 = vpack.c.b16 %v606_v19, %v446_v27  ;;  %v462_v43 = vpack.c.b16 %v446_v27, %v446_v27  ;;  %v526_v55 = vunpack.c.l.b16 %v110_v48  ;;  %v787_v7 = vpack.c.b16 %v3526_v1, %v3526_v1 }
  0x1b   :  { %v348_v45 = vor.u32 %v347_v36, %v343_v33  ;;  %v543_v2 = vpack.c.b16 %v527_v54, %v527_v54  ;;  %v786_v10 = vpack.c.b16 %v3462_v35, %v3462_v35  ;;  %v608_v1 = vunpack.c.l.b16 %v83_v12  ;;  %v84_v35 = vld [vmem:[%s5948_s0 + $0x138] sm:$0xf] }
  0x1c   :  { %v641_v44 = vshll.u32 %v622_v31, 16  ;;  %v639_v49 = vshrl.u32 %v622_v31, 16  ;;  %v542_v3 = vpack.c.b16 %v526_v55, %v526_v55  ;;  %v448_v19 = vunpack.c.l.b16 %v82_v13 }
  0x1d   :  { %v449_v22 = vunpack.c.l.b16 %v84_v35  ;;  %v89_v35 = vld [vmem:[%s5948_s0 + $0x14c] sm:$0x1]  ;;  %vm1039_vm4 = vcmask 130048   ;;  %vm1072_vm5 = vcmask 162816   ;;  %vm1105_vm6 = vcmask 195584  }
  0x1e   :  { %196 = vrot.lane.b32.xlu2 %v3470_v39, %s3342_s27  ;;  %194 = vrot.lane.b32.xlu1 %v3472_v40, %s3342_s27  ;;  %v643_v50 = vrot.slane %v641_v44, 1  ;;  %v464_v33 = vpack.c.b16 %v448_v19, %v448_v19  ;;  %vm1138_vm7 = vcmask 228352   ;;  %vm1171_vm8 = vcmask 261120  }
  0x1f   :  { %192 = vrot.lane.b32.xlu0 %v3474_v41, %s3342_s27  ;;  %v465_v31 = vpack.c.b16 %v449_v22, %v449_v22  ;;  %vm1264_vm9 = vcmask 293888   ;;  %vm1512_vm10 = vcmask 130112   ;;  %vm1831_vm11 = vcmask 1040384  }
  0x20   :  { %v644_v61 = vor.u32 %v643_v50, %v639_v49  ;;  %vm1832_vm12 = vsmask.f32 256  ;;  %vm1851_vm14 = vcmask 1044480   ;;  %vm1852_vm15 = vsmask.f32 4352 }
  0x21   :  { %vm4601_vm13 = vmand %vm1831_vm11, %vm1832_vm12  ;;  %vm2624_vm11 = vcmask 1043456   ;;  %vm2394_vm12 = vcmask 326656  }
  0x26   :  { %202 = vrot.lane.b32.xlu2 %v3519_v62, %s3342_s27  ;;  %200 = vrot.lane.b32.xlu1 %v3521_v63, %s3342_s27 }
  0x27   :  { %198 = vrot.lane.b32.xlu0 %v3523_v0, %s3342_s27 }
  0x2e   :  { %400 = vrot.lane.b32.xlu2 %v3560_v23, %s3343_s30  ;;  %398 = vrot.lane.b32.xlu1 %v292_v24, %s3343_s30  ;;  %v80_v24 = vld [vmem:[%s5948_s0 + $0x128] sm:$0xf] }
  0x2f   :  { %204 = vrot.lane.b32.xlu0 %v3566_v34, %s3342_s27  ;;  %v447_v28 = vunpack.c.l.b16 %v80_v24  ;;  %v624_v24 = vpack.c.b16 %v608_v1, %v448_v19  ;;  %s3354_s27 = smov 64  }
  0x31   :  { %v463_v42 = vpack.c.b16 %v447_v28, %v447_v28  ;;  %v623_v59 = vpack.c.b16 %v607_v47, %v447_v28  ;;  %v85_v28 = vld [vmem:[%s5948_s0 + $0x13c] sm:$0x1]  ;;  %v655_v36 = vshll.u32 %v624_v24, 16 }
  0x32   :  { %v609_v38 = vunpack.c.l.b16 %v85_v28  ;;  %v611_v28 = vunpack.c.l.b16 %v89_v35 }
  0x33   :  { %v648_v4 = vshll.u32 %v623_v59, 16  ;;  %v646_v5 = vshrl.u32 %v623_v59, 16 }
  0x35   :  { %v650_v6 = vrot.slane %v648_v4, 1 }
  0x36   :  { %406 = vrot.lane.b32.xlu2 %v3579_v52, %s3343_s30  ;;  %404 = vrot.lane.b32.xlu1 %v3581_v53, %s3343_s30 }
  0x37   :  { %402 = vrot.lane.b32.xlu0 %v3583_v57, %s3343_s30  ;;  %v651_v11 = vor.u32 %v650_v6, %v646_v5 }
  0x3e   :  { %412 = vrot.lane.b32.xlu2 %v3603_v14, %s3343_s30  ;;  %410 = vrot.lane.b32.xlu1 %v3605_v18, %s3343_s30 }
  0x3f   :  { %408 = vrot.lane.b32.xlu0 %v3607_v20, %s3343_s30 }
  0x46   :  { %480 = vrot.lane.b32.xlu2 %v463_v42, %s3344_s20  ;;  %478 = vrot.lane.b32.xlu1 %v462_v43, %s3344_s20  ;;  %v657_v42 = vrot.slane %v655_v36, 1 }
  0x47   :  { %414 = vrot.lane.b32.xlu0 %v348_v45, %s3343_s30  ;;  %v625_v45 = vpack.c.b16 %v609_v38, %v449_v22  ;;  %v47_v38 = vld [vmem:[%s5948_s0 + $0x5c] sm:$0x1] }
  0x49   :  { %v662_v50 = vshll.u32 %v625_v45, 16  ;;  %v660_v54 = vshrl.u32 %v625_v45, 16 }
  0x4b   :  { %v664_v55 = vrot.slane %v662_v50, 1 }
  0x4e   :  { %750 = vrot.lane.b32.xlu2 %v644_v61, %s3345_s21  ;;  %560 = vrot.lane.b32.xlu1 %v543_v2, %s3346_s22  ;;  %v788_v61 = vpack.c.b16 %v3517_v60, %v3517_v60  ;;  %v665_v2 = vor.u32 %v664_v55, %v660_v54 }
  0x4f   :  { %558 = vrot.lane.b32.xlu0 %v542_v3, %s3346_s22  ;;  %v87_v3 = vld [vmem:[%s5948_s0 + $0x144] sm:$0x1] }
  0x50   :  { %v610_v60 = vunpack.c.l.b16 %v87_v3 }
  0x56   :  { %804 = vrot.lane.b32.xlu2 %v787_v7, %s3347_s23  ;;  %802 = vrot.lane.b32.xlu1 %v786_v10, %s3347_s23  ;;  %v88_v7 = vld [vmem:[%s5948_s0 + $0x148] sm:$0xf] }
  0x57   :  { %752 = vrot.lane.b32.xlu0 %v651_v11, %s3345_s21  ;;  %v451_v11 = vunpack.c.l.b16 %v88_v7  ;;  %v791_v7 = vpack.c.b16 %v3564_v32, %v3564_v32 }
  0x59   :  { %v467_v22 = vpack.c.b16 %v451_v11, %v451_v11 }
  0x5e   :  { %892 = vrot.lane.b32.xlu2 %v3560_v23, %s3348_s6  ;;  %842 = vrot.lane.b32.xlu1 %v3404_v9, %s3349_s7  ;;  %v113_v23 = vld [vmem:[%s5948_s0 + $0x1c8] sm:$0xf]  ;;  %v112_v9 = vld [vmem:[%s5948_s0 + $0x1c0] sm:$0xf] }
  0x5f   :  { %840 = vrot.lane.b32.xlu0 %v3418_v17, %s3349_s7  ;;  %v653_v17 = vshrl.u32 %v624_v24, 16  ;;  %v529_v43 = vunpack.c.l.b16 %v113_v23  ;;  %v528_v44 = vunpack.c.l.b16 %v112_v9  ;;  %v627_v9 = vpack.c.b16 %v611_v28, %v451_v11 }
  0x60   :  { %v3655_v27 = vpop.permute.xlu2 %182 }
  0x61   :  { %v658_v47 = vor.u32 %v657_v42, %v653_v17  ;;  %v545_v48 = vpack.c.b16 %v529_v43, %v529_v43  ;;  %v544_v49 = vpack.c.b16 %v528_v44, %v528_v44  ;;  %v3736_v44 = vld [vmem:[%s5948_s0 + $0x58] sm:$0xf]  ;;  %v676_v50 = vshll.u32 %v627_v9, 16 }
  0x62   :  { %v674_v55 = vshrl.u32 %v627_v9, 16 }
  0x66   :  { %484 = vrot.lane.b32.xlu2 %v465_v31, %s3344_s20  ;;  %482 = vrot.lane.b32.xlu1 %v464_v33, %s3344_s20 }
  0x67   :  { %894 = vrot.lane.b32.xlu0 %v3583_v57, %s3348_s6  ;;  %v789_v57 = vpack.c.b16 %v3514_v58, %v3514_v58  ;;  %v86_v58 = vld [vmem:[%s5948_s0 + $0x140] sm:$0xf] }
  0x68   :  { %v3670_v46 = vpop.permute.xlu2 %184  ;;  %v450_v10 = vunpack.c.l.b16 %v86_v58 }
  0x6a   :  { %v626_v12 = vpack.c.b16 %v610_v60, %v450_v10  ;;  %v3757_v60 = vld [vmem:[%s5948_s0 + $0x60] sm:$0xf] }
  0x6c   :  { %v669_v24 = vshll.u32 %v626_v12, 16  ;;  %v667_v31 = vshrl.u32 %v626_v12, 16  ;;  %v3764_v12 = vunpack.c.l.b16 %v3757_v60 }
  0x6e   :  { %754 = vrot.lane.b32.xlu2 %v658_v47, %s3345_s21  ;;  %564 = vrot.lane.b32.xlu1 %v545_v48, %s3346_s22  ;;  %v671_v33 = vrot.slane %v669_v24, 1  ;;  %v259_v48 = vunpack.c.l.b16 %v47_v38  ;;  %v99_v38 = vld [vmem:[%s5948_s0 + $0x17c] sm:$0x1] }
  0x6f   :  { %562 = vrot.lane.b32.xlu0 %v544_v49, %s3346_s22 }
  0x70   :  { %v3675_v59 = vpop.permute.xlu2 %190  ;;  %v672_v45 = vor.u32 %v671_v33, %v667_v31 }
  0x71   :  { %5970 = vst [vmem:[#allocation2_spill] sm:$0xff] %v3675_v59 }
  0x76   :  { %808 = vrot.lane.b32.xlu2 %v789_v57, %s3347_s23  ;;  %806 = vrot.lane.b32.xlu1 %v788_v61, %s3347_s23  ;;  %v678_v57 = vrot.slane %v676_v50, 1  ;;  %v49_v61 = vld [vmem:[%s5948_s0 + $0x64] sm:$0x1] }
  0x77   :  { %756 = vrot.lane.b32.xlu0 %v665_v2, %s3345_s21  ;;  %v261_v35 = vunpack.c.l.b16 %v49_v61 }
  0x78   :  { %v3687_v4 = vpop.permute.xlu2 %196  ;;  %v3689_v5 = vpop.permute.xlu1 %178 }
  0x79   :  { %v3691_v6 = vpop.permute.xlu0 %174 }
  0x7e   :  { %896 = vrot.lane.b32.xlu2 %v3581_v53, %s3348_s6  ;;  %846 = vrot.lane.b32.xlu1 %v3402_v8, %s3349_s7  ;;  %v466_v53 = vpack.c.b16 %v450_v10, %v450_v10  ;;  %v115_v8 = vld [vmem:[%s5948_s0 + $0x1d8] sm:$0xf]  ;;  %v790_v10 = vpack.c.b16 %v3569_v37, %v3569_v37 }
  0x7f   :  { %844 = vrot.lane.b32.xlu0 %v3416_v16, %s3349_s7  ;;  %v114_v16 = vld [vmem:[%s5948_s0 + $0x1d0] sm:$0xf]  ;;  %v531_v36 = vunpack.c.l.b16 %v115_v8  ;;  %v281_v8 = vpack.c.b16 %v261_v35, %v3764_v12 }
  0x80   :  { %v3705_v13 = vpop.permute.xlu2 %202  ;;  %v3707_v1 = vpop.permute.xlu1 %180  ;;  %v530_v23 = vunpack.c.l.b16 %v114_v16 }
  0x81   :  { %5971 = vst [vmem:[#allocation3_spill] sm:$0xff] %v3705_v13  ;;  %v3712_v19 = vpop.permute.xlu0 %176  ;;  %v547_v47 = vpack.c.b16 %v531_v36, %v531_v36  ;;  %v366_v31 = vshll.u32 %v281_v8, 16  ;;  %v364_v33 = vshrl.u32 %v281_v8, 16 }
  0x82   :  { %v546_v49 = vpack.c.b16 %v530_v23, %v530_v23  ;;  %v101_v23 = vld [vmem:[%s5948_s0 + $0x184] sm:$0x1] }
  0x83   :  { %v368_v36 = vrot.slane %v366_v31, 1 }
  0x85   :  { %v3802_v50 = vor.u32 %v368_v36, %v364_v33 }
  0x86   :  { %488 = vrot.lane.b32.xlu2 %v467_v22, %s3344_s20  ;;  %486 = vrot.lane.b32.xlu1 %v466_v53, %s3344_s20  ;;  %v679_v22 = vor.u32 %v678_v57, %v674_v55 }
  0x87   :  { %898 = vrot.lane.b32.xlu0 %v3579_v52, %s3348_s6  ;;  %v3739_v52 = vunpack.c.l.b16 %v3736_v44 }
  0x88   :  { %v3727_v17 = vpop.permute.xlu1 %188  ;;  %v3729_v42 = vpop.permute.xlu2 %400 }
  0x89   :  { %v3731_v43 = vpop.permute.xlu0 %186  ;;  %v280_v54 = vpack.c.b16 %v259_v48, %v3739_v52  ;;  %v617_v48 = vunpack.c.l.b16 %v101_v23 }
  0x8b   :  { %v359_v11 = vshll.u32 %v280_v54, 16  ;;  %v357_v53 = vshrl.u32 %v280_v54, 16  ;;  %v120_v54 = vld [vmem:[%s5948_s0 + $0x208] sm:$0xf] }
  0x8c   :  { %v536_v61 = vunpack.c.l.b16 %v120_v54 }
  0x8d   :  { %v361_v24 = vrot.slane %v359_v11, 1 }
  0x8e   :  { %758 = vrot.lane.b32.xlu2 %v672_v45, %s3345_s21  ;;  %568 = vrot.lane.b32.xlu1 %v547_v47, %s3346_s22 }
  0x8f   :  { %566 = vrot.lane.b32.xlu0 %v546_v49, %s3346_s22  ;;  %v3776_v16 = vor.u32 %v361_v24, %v357_v53  ;;  %v616_v49 = vunpack.c.l.b16 %v99_v38  ;;  %v552_v53 = vpack.c.b16 %v536_v61, %v536_v61 }
  0x90   :  { %v3748_v2 = vpop.permute.xlu1 %194  ;;  %v3750_v3 = vpop.permute.xlu2 %406 }
  0x91   :  { %v3752_v58 = vpop.permute.xlu0 %192 }
  0x92   :  { %5972 = vst [vmem:[#allocation4_spill] sm:$0xff] %v3752_v58 }
  0x96   :  { %812 = vrot.lane.b32.xlu2 %v791_v7, %s3347_s23  ;;  %810 = vrot.lane.b32.xlu1 %v790_v10, %s3347_s23 }
  0x97   :  { %760 = vrot.lane.b32.xlu0 %v679_v22, %s3345_s21 }
  0x98   :  { %v3770_v32 = vpop.permute.xlu1 %200  ;;  %v3772_v28 = vpop.permute.xlu2 %412 }
  0x99   :  { %v3774_v37 = vpop.permute.xlu0 %198 }
  0x9e   :  { %418 = vrot.lane.b32.xlu2 %v3776_v16, %s3343_s30  ;;  %850 = vrot.lane.b32.xlu1 %v3437_v26, %s3349_s7  ;;  %v100_v26 = vld [vmem:[%s5948_s0 + $0x180] sm:$0xf] }
  0x9f   :  { %848 = vrot.lane.b32.xlu0 %v3414_v15, %s3349_s7  ;;  %v98_v15 = vld [vmem:[%s5948_s0 + $0x178] sm:$0xf]  ;;  %v457_v57 = vunpack.c.l.b16 %v100_v26  ;;  %v51_v26 = vld [vmem:[%s5948_s0 + $0x6c] sm:$0x1] }
  0xa0   :  { %v3790_v9 = vpop.permute.xlu2 %480  ;;  %v3792_v45 = vpop.permute.xlu1 %398  ;;  %v456_v55 = vunpack.c.l.b16 %v98_v15  ;;  %v1208_v15 = vld [vmem:[%s5949_s1 + $0x10] sm:$0x3] }
  0xa1   :  { %v3794_v47 = vpop.permute.xlu0 %204  ;;  %v633_v7 = vpack.c.b16 %v617_v48, %v457_v57  ;;  %v473_v24 = vpack.c.b16 %v457_v57, %v457_v57 }
  0xa2   :  { %5973 = vst [vmem:[#allocation5_spill] sm:$0xff] %v3794_v47  ;;  %v632_v10 = vpack.c.b16 %v616_v49, %v456_v55  ;;  %v1258_v49 = vunpack.c.l.b16 %v1208_v15 }
  0xa3   :  { %v718_v8 = vshll.u32 %v633_v7, 16  ;;  %v716_v33 = vshrl.u32 %v633_v7, 16  ;;  %v263_v7 = vunpack.c.l.b16 %v51_v26 }
  0xa4   :  { %v711_v31 = vshll.u32 %v632_v10, 16  ;;  %v709_v23 = vshrl.u32 %v632_v10, 16  ;;  %v1261_v61 = vpack.c.b16 %v1258_v49, %v1258_v49  ;;  %v796_v49 = vpack.c.b16 %v3764_v12, %v3764_v12 }
  0xa5   :  { %v720_v36 = vrot.slane %v718_v8, 1 }
  0xa6   :  { %902 = vrot.lane.b32.xlu2 %v3605_v18, %s3348_s6  ;;  %900 = vrot.lane.b32.xlu1 %v3607_v20, %s3348_s6  ;;  %v472_v18 = vpack.c.b16 %v456_v55, %v456_v55  ;;  %v121_v20 = vld [vmem:[%s5948_s0 + $0x210] sm:$0xf]  ;;  %v713_v38 = vrot.slane %v711_v31, 1  ;;  %v1291_v31 = vsel %vm1289_vm0, %v1261_v61, 0  ;;  %vm4606_vm0 = vmand %vm1851_vm14, %vm1852_vm15  ;;  %vm2427_vm14 = vcmask 392192  }
  0xa7   :  { %420 = vrot.lane.b32.xlu0 %v3802_v50, %s3343_s30  ;;  %v537_v48 = vunpack.c.l.b16 %v121_v20  ;;  %v721_v10 = vor.u32 %v720_v36, %v716_v33  ;;  %1298 = vmatpush.bf16.msra.mxu0 %v1291_v31  ;;  %v3297_v33 = vld [vmem:[%s5949_s1 + $0x8] sm:$0xff]  ;;  %vm2459_vm15 = vcmask 457728  }
  0xa8   :  { %v3813_v11 = vpop.permute.xlu2 %750  ;;  %v3815_v35 = vpop.permute.xlu1 %404  ;;  %3302 = vmatpush.bf16.msra.mxu3 %v1291_v31 }
  0xa9   :  { %v3817_v22 = vpop.permute.xlu0 %402  ;;  %v553_v8 = vpack.c.b16 %v537_v48, %v537_v48  ;;  %v3296_v48 = vld [vmem:[%s5949_s1] sm:$0xff] }
  0xab   :  { %1299 = vmatpush.bf16.msra.mxu0 %v3297_v33 }
  0xac   :  { %3303 = vmatpush.bf16.msra.mxu3 %v3297_v33 }
  0xae   :  { %578 = vrot.lane.b32.xlu2 %v552_v53, %s3346_s22  ;;  %500 = vrot.lane.b32.xlu1 %v473_v24, %s3344_s20  ;;  %v714_v53 = vor.u32 %v713_v38, %v709_v23  ;;  %v3840_v24 = vld [vmem:[%s5948_s0 + $0x68] sm:$0xf] }
  0xaf   :  { %498 = vrot.lane.b32.xlu0 %v472_v18, %s3344_s20  ;;  %5974 = vst [vmem:[#allocation6_spill] sm:$0xff] %v3840_v24  ;;  %v262_v18 = vunpack.c.l.b16 %v3840_v24  ;;  %1300 = vmatpush.bf16.msra.mxu0 %v3296_v48 }
  0xb0   :  { %v3831_v54 = vpop.permute.xlu2 %804  ;;  %v3833_v55 = vpop.permute.xlu1 %410  ;;  %3304 = vmatpush.bf16.msra.mxu3 %v3296_v48 }
  0xb1   :  { %v3835_v57 = vpop.permute.xlu0 %408  ;;  %v282_v20 = vpack.c.b16 %v263_v7, %v262_v18  ;;  %v797_v15 = vpack.c.b16 %v262_v18, %v262_v18  ;;  %v92_v18 = vld [vmem:[%s5948_s0 + $0x158] sm:$0xf] }
  0xb3   :  { %v373_v26 = vshll.u32 %v282_v20, 16  ;;  %v371_v61 = vshrl.u32 %v282_v20, 16 }
  0xb5   :  { %v375_v7 = vrot.slane %v373_v26, 1  ;;  %v116_v26 = vld [vmem:[%s5948_s0 + $0x1e0] sm:$0xf] }
  0xb6   :  { %772 = vrot.lane.b32.xlu2 %v721_v10, %s3345_s21  ;;  %770 = vrot.lane.b32.xlu1 %v714_v53, %s3345_s21  ;;  %v93_v10 = vld [vmem:[%s5948_s0 + $0x15c] sm:$0x1]  ;;  %v91_v53 = vld [vmem:[%s5948_s0 + $0x154] sm:$0x1]  ;;  %v532_v13 = vunpack.c.l.b16 %v116_v26 }
  0xb7   :  { %580 = vrot.lane.b32.xlu0 %v553_v8, %s3346_s22  ;;  %v3876_v20 = vor.u32 %v375_v7, %v371_v61  ;;  %v613_v33 = vunpack.c.l.b16 %v93_v10  ;;  %v24_v10 = vld [vmem:[%s5948_s0] sm:$0xf] }
  0xb8   :  { %v3849_v36 = vpop.permute.xlu2 %892  ;;  %v479_v23 = vpop.permute.xlu1 %478 }
  0xb9   :  { %v3851_v38 = vpop.permute.xlu0 %414 }
  0xba   :  { %5975 = vst [vmem:[#allocation7_spill] sm:$0xff] %v3851_v38 }
  0xbe   :  { %860 = vrot.lane.b32.xlu2 %v3470_v39, %s3349_s7  ;;  %824 = vrot.lane.b32.xlu1 %v797_v15, %s3347_s23  ;;  %v90_v39 = vld [vmem:[%s5948_s0 + $0x150] sm:$0xf]  ;;  %v612_v15 = vunpack.c.l.b16 %v91_v53 }
  0xbf   :  { %822 = vrot.lane.b32.xlu0 %v796_v49, %s3347_s23  ;;  %v452_v48 = vunpack.c.l.b16 %v90_v39  ;;  %v453_v49 = vunpack.c.l.b16 %v92_v18  ;;  %v548_v39 = vpack.c.b16 %v532_v13, %v532_v13  ;;  %v53_v13 = vld [vmem:[%s5948_s0 + $0x74] sm:$0x1] }
  0xc0   :  { %v3868_v12 = vpop.permute.xlu2 %484  ;;  %v561_v8 = vpop.permute.xlu1 %560 }
  0xc1   :  { %v559_v31 = vpop.permute.xlu0 %558  ;;  %v629_v47 = vpack.c.b16 %v613_v33, %v453_v49  ;;  %v628_v38 = vpack.c.b16 %v612_v15, %v452_v48  ;;  %v469_v18 = vpack.c.b16 %v453_v49, %v453_v49  ;;  %v927_v33 = vsel %vm924_vm1, %v24_v10, %v3691_v6 }
  0xc2   :  { %v975_v15 = vsel %vm973_vm2, %v927_v33, %v3792_v45  ;;  %v3909_v45 = vld [vmem:[%s5948_s0 + $0x70] sm:$0xf] }
  0xc3   :  { %v690_v58 = vshll.u32 %v629_v47, 16  ;;  %v683_v59 = vshll.u32 %v628_v38, 16  ;;  %v688_v26 = vshrl.u32 %v629_v47, 16  ;;  %v1008_v10 = vsel %vm1006_vm3, %v975_v15, %v479_v23 }
  0xc4   :  { %v1041_v33 = vsel %vm1039_vm4, %v1008_v10, %v559_v31  ;;  %v265_v47 = vunpack.c.l.b16 %v53_v13 }
  0xc5   :  { %v692_v6 = vrot.slane %v690_v58, 1  ;;  %v685_v49 = vrot.slane %v683_v59, 1  ;;  %v930_v59 = vsel %vm924_vm1, %v3451_v30, %v3712_v19  ;;  %v3918_v58 = vunpack.c.l.b16 %v3909_v45  ;;  %v40_v30 = vld [vmem:[%s5948_s0 + $0x40] sm:$0xf] }
  0xc6   :  { %914 = vrot.lane.b32.xlu2 %v3876_v20, %s3348_s6  ;;  %912 = vrot.lane.b32.xlu1 %v3802_v50, %s3348_s6  ;;  %v468_v50 = vpack.c.b16 %v452_v48, %v452_v48  ;;  %v681_v48 = vshrl.u32 %v628_v38, 16  ;;  %v977_v38 = vsel %vm973_vm2, %v930_v59, %v3729_v42  ;;  %v1074_v15 = vsel %vm1072_vm5, %v1041_v33, %v3813_v11  ;;  %v41_v11 = vld [vmem:[%s5948_s0 + $0x44] sm:$0x1] }
  0xc7   :  { %862 = vrot.lane.b32.xlu0 %v3523_v0, %s3349_s7  ;;  %v117_v0 = vld [vmem:[%s5948_s0 + $0x1e8] sm:$0xf] }
  0xc8   :  { %v3887_v61 = vpop.permute.xlu2 %754  ;;  %v803_v7 = vpop.permute.xlu1 %802  ;;  %v533_v24 = vunpack.c.l.b16 %v117_v0  ;;  %v686_v31 = vor.u32 %v685_v49, %v681_v48  ;;  %v1010_v0 = vsel %vm1006_vm3, %v977_v38, %v3790_v9  ;;  %v784_v9 = vunpack.c.l.b16 %v40_v30 }
  0xc9   :  { %v753_v53 = vpop.permute.xlu0 %752  ;;  %v1043_v19 = vsel %vm1039_vm4, %v1010_v0, %v561_v8  ;;  %v1107_v13 = vsel %vm1105_vm6, %v1074_v15, %v803_v7 }
  0xca   :  { %v549_v10 = vpack.c.b16 %v533_v24, %v533_v24  ;;  %v1076_v42 = vsel %vm1072_vm5, %v1043_v19, %v753_v53  ;;  %v793_v59 = vpack.c.b16 %v784_v9, %v784_v9 }
  0xcb   :  { %v1109_v8 = vsel %vm1105_vm6, %v1076_v42, %v3831_v54  ;;  %v68_v54 = vld [vmem:[%s5948_s0 + $0xd0] sm:$0xf] }
  0xce   :  { %570 = vrot.lane.b32.xlu2 %v548_v39, %s3346_s22  ;;  %492 = vrot.lane.b32.xlu1 %v469_v18, %s3344_s20 }
  0xcf   :  { %490 = vrot.lane.b32.xlu0 %v468_v50, %s3344_s20  ;;  %v693_v50 = vor.u32 %v692_v6, %v688_v26  ;;  %v283_v6 = vpack.c.b16 %v265_v47, %v3918_v58 }
  0xd0   :  { %v3912_v39 = vpop.permute.xlu2 %808  ;;  %v843_v18 = vpop.permute.xlu1 %842 }
  0xd1   :  { %v841_v23 = vpop.permute.xlu0 %840  ;;  %v1142_v48 = vsel %vm1138_vm7, %v1109_v8, %v843_v18  ;;  %v380_v47 = vshll.u32 %v283_v6, 16  ;;  %v378_v18 = vshrl.u32 %v283_v6, 16 }
  0xd2   :  { %v1140_v26 = vsel %vm1138_vm7, %v1107_v13, %v841_v23  ;;  %v874_v23 = vunpack.c.l.b16 %v41_v11 }
  0xd3   :  { %v1173_v24 = vsel %vm1171_vm8, %v1140_v26, %v3849_v36  ;;  %v382_v0 = vrot.slane %v380_v47, 1 }
  0xd4   :  { %v1225_v38 = vunpack.c.l.b16 %v1173_v24  ;;  %v876_v15 = vpack.c.b16 %v874_v23, %v784_v9  ;;  %v105_v24 = vld [vmem:[%s5948_s0 + $0x194] sm:$0x1] }
  0xd5   :  { %v3960_v13 = vor.u32 %v382_v0, %v378_v18  ;;  %v619_v23 = vunpack.c.l.b16 %v105_v24 }
  0xd6   :  { %764 = vrot.lane.b32.xlu2 %v693_v50, %s3345_s21  ;;  %762 = vrot.lane.b32.xlu1 %v686_v31, %s3345_s21  ;;  %v792_v31 = vpack.c.b16 %v3562_v29, %v3562_v29  ;;  %v881_v42 = vshll.u32 %v876_v15, 16  ;;  %v879_v9 = vshrl.u32 %v876_v15, 16 }
  0xd7   :  { %572 = vrot.lane.b32.xlu0 %v549_v10, %s3346_s22  ;;  %v836_v10 = vunpack.c.l.b16 %v68_v54 }
  0xd8   :  { %v3944_v7 = vpop.permute.xlu2 %896  ;;  %v483_v53 = vpop.permute.xlu1 %482  ;;  %v883_v11 = vrot.slane %v881_v42, 1 }
  0xd9   :  { %v895_v49 = vpop.permute.xlu0 %894  ;;  %v838_v26 = vpack.c.b16 %v836_v10, %v836_v10 }
  0xda   :  { %v1175_v33 = vsel %vm1171_vm8, %v1142_v48, %v895_v49  ;;  %v103_v49 = vld [vmem:[%s5948_s0 + $0x18c] sm:$0x1]  ;;  %v884_v47 = vor.u32 %v883_v11, %v879_v9 }
  0xdb   :  { %v1226_v50 = vunpack.c.l.b16 %v1175_v33 }
  0xdd   :  { %v1241_v36 = vpack.c.b16 %v1226_v50, %v1225_v38  ;;  %v123_v38 = vld [vmem:[%s5948_s0 + $0x220] sm:$0xf]  ;;  %v122_v50 = vld [vmem:[%s5948_s0 + $0x218] sm:$0xf] }
  0xde   :  { %852 = vrot.lane.b32.xlu2 %v3435_v25, %s3349_s7  ;;  %816 = vrot.lane.b32.xlu1 %v793_v59, %s3347_s23  ;;  %v102_v25 = vld [vmem:[%s5948_s0 + $0x188] sm:$0xf]  ;;  %v539_v0 = vunpack.c.l.b16 %v123_v38  ;;  %v538_v15 = vunpack.c.l.b16 %v122_v50 }
  0xdf   :  { %814 = vrot.lane.b32.xlu0 %v792_v31, %s3347_s23  ;;  %3262 = vmatmul.msk.bf16.vlgmr.msra.gmra.mxu0 %vm1264_vm9, %v1241_v36  ;;  %v458_v6 = vunpack.c.l.b16 %v102_v25  ;;  %v618_v31 = vunpack.c.l.b16 %v103_v49  ;;  %v933_v36 = vsel %vm924_vm1, %v3509_v56, %v3689_v5  ;;  %v936_v5 = vsel %vm924_vm1, %v3499_v51, %v3707_v1 }
  0xe0   :  { %v3958_v29 = vpop.permute.xlu2 %488  ;;  %v565_v30 = vpop.permute.xlu1 %564  ;;  %v979_v18 = vsel %vm973_vm2, %v933_v36, %v3817_v22  ;;  %v981_v11 = vsel %vm973_vm2, %v936_v5, %v3815_v35  ;;  %v555_v24 = vpack.c.b16 %v539_v0, %v539_v0  ;;  %v554_v49 = vpack.c.b16 %v538_v15, %v538_v15  ;;  %v55_v35 = vld [vmem:[%s5948_s0 + $0x7c] sm:$0x1] }
  0xe1   :  { %v563_v19 = vpop.permute.xlu0 %562  ;;  %v474_v59 = vpack.c.b16 %v458_v6, %v458_v6  ;;  %v1012_v42 = vsel %vm1006_vm3, %v979_v18, %v483_v53  ;;  %v267_v36 = vunpack.c.l.b16 %v55_v35  ;;  %v97_v35 = vld [vmem:[%s5948_s0 + $0x174] sm:$0x1] }
  0xe2   :  { %v1045_v25 = vsel %vm1039_vm4, %v1012_v42, %v563_v19 }
  0xe3   :  { %v1078_v19 = vsel %vm1072_vm5, %v1045_v25, %v3887_v61 }
  0xe6   :  { %424 = vrot.lane.b32.xlu2 %v3960_v13, %s3343_s30  ;;  %422 = vrot.lane.b32.xlu1 %v3876_v20, %s3343_s30  ;;  %v104_v20 = vld [vmem:[%s5948_s0 + $0x190] sm:$0xf] }
  0xe7   :  { %854 = vrot.lane.b32.xlu0 %v838_v26, %s3349_s7  ;;  %v459_v54 = vunpack.c.l.b16 %v104_v20  ;;  %v634_v26 = vpack.c.b16 %v618_v31, %v458_v6 }
  0xe8   :  { %v3973_v8 = vpop.permute.xlu2 %758  ;;  %v807_v48 = vpop.permute.xlu1 %806 }
  0xe9   :  { %v757_v33 = vpop.permute.xlu0 %756  ;;  %v635_v10 = vpack.c.b16 %v619_v23, %v459_v54  ;;  %v475_v6 = vpack.c.b16 %v459_v54, %v459_v54  ;;  %v725_v20 = vshll.u32 %v634_v26, 16  ;;  %v4025_v23 = vld [vmem:[%s5948_s0 + $0x50] sm:$0xf] }
  0xea   :  { %v4036_v18 = vunpack.c.l.b16 %v4025_v23 }
  0xeb   :  { %v732_v53 = vshll.u32 %v635_v10, 16 }
  0xed   :  { %v734_v61 = vrot.slane %v732_v53, 1 }
  0xee   :  { %502 = vrot.lane.b32.xlu2 %v474_v59, %s3344_s20  ;;  %906 = vrot.lane.b32.xlu1 %v884_v47, %s3348_s6  ;;  %v1111_v47 = vsel %vm1105_vm6, %v1078_v19, %v807_v48  ;;  %v723_v48 = vshrl.u32 %v634_v26, 16 }
  0xef   :  { %904 = vrot.lane.b32.xlu0 %v3603_v14, %s3348_s6  ;;  %v1014_v14 = vsel %vm1006_vm3, %v981_v11, %v3868_v12  ;;  %v730_v12 = vshrl.u32 %v635_v10, 16 }
  0xf0   :  { %v3998_v9 = vpop.permute.xlu2 %812  ;;  %v847_v56 = vpop.permute.xlu1 %846  ;;  %v1047_v59 = vsel %vm1039_vm4, %v1014_v14, %v565_v30  ;;  %v45_v30 = vld [vmem:[%s5948_s0 + $0x54] sm:$0x1] }
  0xf1   :  { %v845_v22 = vpop.permute.xlu0 %844  ;;  %v1080_v51 = vsel %vm1072_vm5, %v1047_v59, %v757_v33  ;;  %v727_v33 = vrot.slane %v725_v20, 1  ;;  %v257_v10 = vunpack.c.l.b16 %v45_v30  ;;  %v735_v26 = vor.u32 %v734_v61, %v730_v12  ;;  %v95_v12 = vld [vmem:[%s5948_s0 + $0x16c] sm:$0x1] }
  0xf2   :  { %v1144_v1 = vsel %vm1138_vm7, %v1111_v47, %v845_v22  ;;  %v1113_v50 = vsel %vm1105_vm6, %v1080_v51, %v3912_v39  ;;  %v4045_v39 = vld [vmem:[%s5948_s0 + $0x78] sm:$0xf] }
  0xf3   :  { %v1177_v38 = vsel %vm1171_vm8, %v1144_v1, %v3944_v7  ;;  %v1146_v0 = vsel %vm1138_vm7, %v1113_v50, %v847_v56  ;;  %v798_v7 = vpack.c.b16 %v3918_v58, %v3918_v58  ;;  %v728_v22 = vor.u32 %v727_v33, %v723_v48  ;;  %v96_v48 = vld [vmem:[%s5948_s0 + $0x170] sm:$0xf]  ;;  %v118_v50 = vld [vmem:[%s5948_s0 + $0x1f8] sm:$0xf] }
  0xf4   :  { %v1227_v25 = vunpack.c.l.b16 %v1177_v38  ;;  %v266_v11 = vunpack.c.l.b16 %v4045_v39 }
  0xf6   :  { %584 = vrot.lane.b32.xlu2 %v555_v24, %s3346_s22  ;;  %582 = vrot.lane.b32.xlu1 %v554_v49, %s3346_s22  ;;  %v284_v56 = vpack.c.b16 %v267_v36, %v266_v11  ;;  %v279_v49 = vpack.c.b16 %v257_v10, %v4036_v18  ;;  %v799_v20 = vpack.c.b16 %v266_v11, %v266_v11  ;;  %v615_v36 = vunpack.c.l.b16 %v97_v35 }
  0xf7   :  { %504 = vrot.lane.b32.xlu0 %v475_v6, %s3344_s20 }
  0xf8   :  { %v4031_v31 = vpop.permute.xlu2 %418  ;;  %v4033_v54 = vpop.permute.xlu1 %486  ;;  %v352_v19 = vshll.u32 %v279_v49, 16  ;;  %v387_v6 = vshll.u32 %v284_v56, 16  ;;  %v350_v59 = vshrl.u32 %v279_v49, 16  ;;  %v385_v51 = vshrl.u32 %v284_v56, 16 }
  0xf9   :  { %v899_v15 = vpop.permute.xlu0 %898 }
  0xfa   :  { %v1179_v42 = vsel %vm1171_vm8, %v1146_v0, %v899_v15  ;;  %v354_v47 = vrot.slane %v352_v19, 1  ;;  %v389_v1 = vrot.slane %v387_v6, 1  ;;  %v614_v0 = vunpack.c.l.b16 %v95_v12 }
  0xfb   :  { %v1228_v5 = vunpack.c.l.b16 %v1179_v42  ;;  %v942_v15 = vsel %vm924_vm1, %v3555_v21, %v3670_v46  ;;  %v455_v42 = vunpack.c.l.b16 %v96_v48  ;;  %v3339_v21 = vld [vmem:[%s5948_s0 + $0x20] sm:$0xf] }
  0xfc   :  { %v4074_v33 = vor.u32 %v354_v47, %v350_v59  ;;  %v4076_v38 = vor.u32 %v389_v1, %v385_v51  ;;  %v939_v46 = vsel %vm924_vm1, %v3339_v21, %v3655_v27 }
  0xfd   :  { %v1242_v24 = vpack.c.b16 %v1228_v5, %v1227_v25  ;;  %v631_v5 = vpack.c.b16 %v615_v36, %v455_v42  ;;  %v983_v56 = vsel %vm973_vm2, %v939_v46, %v3750_v3  ;;  %v471_v19 = vpack.c.b16 %v455_v42, %v455_v42  ;;  %v119_v3 = vld [vmem:[%s5948_s0 + $0x200] sm:$0xf] }
  0xfe   :  { %826 = vrot.lane.b32.xlu2 %v798_v7, %s3347_s23  ;;  %776 = vrot.lane.b32.xlu1 %v735_v26, %s3345_s21  ;;  %v985_v7 = vsel %vm973_vm2, %v942_v15, %v3835_v57  ;;  %v534_v26 = vunpack.c.l.b16 %v118_v50  ;;  %v535_v48 = vunpack.c.l.b16 %v119_v3  ;;  %v4128_v50 = vld [vmem:[%s5948_s0 + $0x80] sm:$0xf] }
  0xff   :  { %774 = vrot.lane.b32.xlu0 %v728_v22, %s3345_s21  ;;  %3263 = vmatmul.msk.bf16.gmra.mxu0 %vm1264_vm9, %v1242_v24  ;;  %v1018_v25 = vsel %vm1006_vm3, %v985_v7, %v3958_v29  ;;  %v704_v6 = vshll.u32 %v631_v5, 16  ;;  %v702_v1 = vshrl.u32 %v631_v5, 16  ;;  %v4134_v15 = vunpack.c.l.b16 %v4128_v50 }
 0x100   :  { %v4053_v58 = vpop.permute.xlu2 %902  ;;  %v569_v53 = vpop.permute.xlu1 %568  ;;  %v551_v5 = vpack.c.b16 %v535_v48, %v535_v48 }
 0x101   :  { %v567_v14 = vpop.permute.xlu0 %566  ;;  %v1051_v11 = vsel %vm1039_vm4, %v1018_v25, %v569_v53  ;;  %v550_v53 = vpack.c.b16 %v534_v26, %v534_v26 }
 0x106   :  { %866 = vrot.lane.b32.xlu2 %v3519_v62, %s3349_s7  ;;  %864 = vrot.lane.b32.xlu1 %v3521_v63, %s3349_s7  ;;  %v94_v63 = vld [vmem:[%s5948_s0 + $0x168] sm:$0xf] }
 0x107   :  { %828 = vrot.lane.b32.xlu0 %v799_v20, %s3347_s23  ;;  %v454_v10 = vunpack.c.l.b16 %v94_v63 }
 0x108   :  { %v4066_v61 = vpop.permute.xlu2 %578  ;;  %v811_v62 = vpop.permute.xlu1 %810 }
 0x109   :  { %v761_v30 = vpop.permute.xlu0 %760  ;;  %v630_v22 = vpack.c.b16 %v614_v0, %v454_v10  ;;  %v470_v47 = vpack.c.b16 %v454_v10, %v454_v10 }
 0x10a   :  { %v1084_v57 = vsel %vm1072_vm5, %v1051_v11, %v761_v30 }
 0x10b   :  { %v697_v20 = vshll.u32 %v630_v22, 16  ;;  %v1117_v27 = vsel %vm1105_vm6, %v1084_v57, %v3998_v9  ;;  %v706_v9 = vrot.slane %v704_v6, 1 }
 0x10d   :  { %v699_v12 = vrot.slane %v697_v20, 1  ;;  %v707_v26 = vor.u32 %v706_v9, %v702_v1 }
 0x10e   :  { %416 = vrot.lane.b32.xlu2 %v4074_v33, %s3343_s30  ;;  %918 = vrot.lane.b32.xlu1 %v4076_v38, %s3348_s6 }
 0x10f   :  { %916 = vrot.lane.b32.xlu0 %v3960_v13, %s3348_s6  ;;  %v1016_v13 = vsel %vm1006_vm3, %v983_v56, %v4033_v54  ;;  %v57_v54 = vld [vmem:[%s5948_s0 + $0x84] sm:$0x1] }
 0x110   :  { %v4101_v29 = vpop.permute.xlu2 %772  ;;  %v851_v24 = vpop.permute.xlu1 %850  ;;  %v1049_v59 = vsel %vm1039_vm4, %v1016_v13, %v567_v14  ;;  %v695_v14 = vshrl.u32 %v630_v22, 16 }
 0x111   :  { %v849_v49 = vpop.permute.xlu0 %848  ;;  %v1150_v51 = vsel %vm1138_vm7, %v1117_v27, %v851_v24  ;;  %v1082_v35 = vsel %vm1072_vm5, %v1049_v59, %v3973_v8  ;;  %v795_v24 = vpack.c.b16 %v3739_v52, %v3739_v52  ;;  %v106_v52 = vld [vmem:[%s5948_s0 + $0x198] sm:$0xf]  ;;  %v109_v27 = vld [vmem:[%s5948_s0 + $0x1a4] sm:$0x1] }
 0x112   :  { %v1115_v30 = vsel %vm1105_vm6, %v1082_v35, %v811_v62  ;;  %v1183_v63 = vsel %vm1171_vm8, %v1150_v51, %v4053_v58  ;;  %v269_v62 = vunpack.c.l.b16 %v57_v54  ;;  %v700_v25 = vor.u32 %v699_v12, %v695_v14 }
 0x113   :  { %v1148_v8 = vsel %vm1138_vm7, %v1115_v30, %v849_v49  ;;  %v1230_v42 = vunpack.c.l.b16 %v1183_v63  ;;  %v794_v49 = vpack.c.b16 %v4036_v18, %v4036_v18  ;;  %v621_v1 = vunpack.c.l.b16 %v109_v27  ;;  %v125_v30 = vld [vmem:[%s5948_s0 + $0x230] sm:$0xf] }
 0x114   :  { %v285_v11 = vpack.c.b16 %v269_v62, %v4134_v15  ;;  %v541_v62 = vunpack.c.l.b16 %v125_v30 }
 0x116   :  { %574 = vrot.lane.b32.xlu2 %v550_v53, %s3346_s22  ;;  %496 = vrot.lane.b32.xlu1 %v471_v19, %s3344_s20  ;;  %v394_v56 = vshll.u32 %v285_v11, 16  ;;  %v392_v53 = vshrl.u32 %v285_v11, 16 }
 0x117   :  { %494 = vrot.lane.b32.xlu0 %v470_v47, %s3344_s20 }
 0x118   :  { %v4131_v36 = vpop.permute.xlu2 %860  ;;  %v901_v0 = vpop.permute.xlu1 %900  ;;  %v396_v13 = vrot.slane %v394_v56, 1 }
 0x119   :  { %v421_v10 = vpop.permute.xlu0 %420  ;;  %v1181_v58 = vsel %vm1171_vm8, %v1148_v8, %v901_v0 }
 0x11a   :  { %v1229_v7 = vunpack.c.l.b16 %v1181_v58  ;;  %v4152_v59 = vor.u32 %v396_v13, %v392_v53 }
 0x11c   :  { %v1243_v22 = vpack.c.b16 %v1230_v42, %v1229_v7 }
 0x11e   :  { %768 = vrot.lane.b32.xlu2 %v707_v26, %s3345_s21  ;;  %766 = vrot.lane.b32.xlu1 %v700_v25, %s3345_s21 }
 0x11f   :  { %576 = vrot.lane.b32.xlu0 %v551_v5, %s3346_s22  ;;  %3264 = vmatmul.msk.bf16.gmra.mxu0 %vm1264_vm9, %v1243_v22 }
 0x120   :  { %v915_v21 = vpop.permute.xlu2 %914  ;;  %v501_v46 = vpop.permute.xlu1 %500 }
 0x121   :  { %v499_v57 = vpop.permute.xlu0 %498 }
 0x126   :  { %856 = vrot.lane.b32.xlu2 %v3474_v41, %s3349_s7  ;;  %820 = vrot.lane.b32.xlu1 %v795_v24, %s3347_s23  ;;  %v957_v41 = vsel %vm924_vm1, %v3736_v44, %v3748_v2  ;;  %v107_v44 = vld [vmem:[%s5948_s0 + $0x19c] sm:$0x1]  ;;  %v460_v2 = vunpack.c.l.b16 %v106_v52 }
 0x127   :  { %818 = vrot.lane.b32.xlu0 %v794_v49, %s3347_s23  ;;  %v995_v18 = vsel %vm973_vm2, %v957_v41, %v4031_v31  ;;  %v108_v31 = vld [vmem:[%s5948_s0 + $0x1a0] sm:$0xf]  ;;  %v620_v12 = vunpack.c.l.b16 %v107_v44 }
 0x128   :  { %v771_v19 = vpop.permute.xlu1 %770  ;;  %v4150_v20 = vpop.permute.xlu2 %570  ;;  %v1028_v47 = vsel %vm1006_vm3, %v995_v18, %v499_v57  ;;  %v476_v54 = vpack.c.b16 %v460_v2, %v460_v2  ;;  %v461_v63 = vunpack.c.l.b16 %v108_v31  ;;  %v557_v57 = vpack.c.b16 %v541_v62, %v541_v62  ;;  %v58_v18 = vld [vmem:[%s5948_s0 + $0x88] sm:$0xf] }
 0x129   :  { %v581_v6 = vpop.permute.xlu0 %580  ;;  %v1061_v9 = vsel %vm1039_vm4, %v1028_v47, %v4066_v61 }
 0x12a   :  { %v637_v61 = vpack.c.b16 %v621_v1, %v461_v63  ;;  %v477_v24 = vpack.c.b16 %v461_v63, %v461_v63 }
 0x12c   :  { %v744_v53 = vshrl.u32 %v637_v61, 16 }
 0x12e   :  { %428 = vrot.lane.b32.xlu2 %v4152_v59, %s3343_s30  ;;  %426 = vrot.lane.b32.xlu1 %v4076_v38, %s3343_s30  ;;  %v124_v38 = vld [vmem:[%s5948_s0 + $0x228] sm:$0xf] }
 0x12f   :  { %858 = vrot.lane.b32.xlu0 %v3472_v40, %s3349_s7  ;;  %v960_v40 = vsel %vm924_vm1, %v3757_v60, %v3687_v4  ;;  %v1094_v60 = vsel %vm1072_vm5, %v1061_v9, %v771_v19  ;;  %v540_v0 = vunpack.c.l.b16 %v124_v38 }
 0x130   :  { %v825_v51 = vpop.permute.xlu1 %824  ;;  %v997_v35 = vsel %vm973_vm2, %v960_v40, %v421_v10  ;;  %v4187_v14 = vpop.permute.xlu2 %764  ;;  %v636_v10 = vpack.c.b16 %v620_v12, %v460_v2  ;;  %v77_v2 = vld [vmem:[%s5948_s0 + $0x118] sm:$0xf] }
 0x131   :  { %v823_v3 = vpop.permute.xlu0 %822  ;;  %v1030_v4 = vsel %vm1006_vm3, %v997_v35, %v501_v46  ;;  %v556_v5 = vpack.c.b16 %v540_v0, %v540_v0  ;;  %v746_v46 = vshll.u32 %v637_v61, 16  ;;  %v837_v40 = vunpack.c.l.b16 %v77_v2 }
 0x132   :  { %v1063_v48 = vsel %vm1039_vm4, %v1030_v4, %v581_v6  ;;  %v1127_v8 = vsel %vm1105_vm6, %v1094_v60, %v823_v3  ;;  %v739_v56 = vshll.u32 %v636_v10, 16  ;;  %v737_v19 = vshrl.u32 %v636_v10, 16 }
 0x133   :  { %v1096_v58 = vsel %vm1072_vm5, %v1063_v48, %v4101_v29  ;;  %v1160_v42 = vsel %vm1138_vm7, %v1127_v8, %v4131_v36  ;;  %v748_v13 = vrot.slane %v746_v46, 1  ;;  %v785_v3 = vunpack.c.l.b16 %v58_v18  ;;  %v3340_v8 = vld [vmem:[%s5948_s0 + $0x30] sm:$0xf] }
 0x134   :  { %v1129_v26 = vsel %vm1105_vm6, %v1096_v58, %v825_v51  ;;  %v741_v6 = vrot.slane %v739_v56, 1  ;;  %v800_v51 = vpack.c.b16 %v4134_v15, %v4134_v15  ;;  %v839_v9 = vpack.c.b16 %v837_v40, %v837_v40 }
 0x135   :  { %v749_v27 = vor.u32 %v748_v13, %v744_v53  ;;  %v801_v15 = vpack.c.b16 %v785_v3, %v785_v3  ;;  %v945_v0 = vsel %vm924_vm1, %v3340_v8, %v3731_v43 }
 0x136   :  { %910 = vrot.lane.b32.xlu1 %v3776_v16, %s3348_s6  ;;  %506 = vrot.lane.b32.xlu2 %v476_v54, %s3344_s20  ;;  %v742_v44 = vor.u32 %v741_v6, %v737_v19  ;;  %v987_v62 = vsel %vm973_vm2, %v945_v0, %v3833_v55  ;;  %v966_v6 = vsel %vm924_vm1, %v3909_v45, %v3770_v32 }
 0x137   :  { %908 = vrot.lane.b32.xlu0 %v4074_v33, %s3348_s6 }
 0x138   :  { %v913_v7 = vpop.permute.xlu1 %912  ;;  %v4209_v49 = vpop.permute.xlu2 %852 }
 0x139   :  { %v863_v25 = vpop.permute.xlu0 %862  ;;  %v1193_v16 = vsel %vm1171_vm8, %v1160_v42, %v913_v7 }
 0x13a   :  { %v1162_v22 = vsel %vm1138_vm7, %v1129_v26, %v863_v25  ;;  %v1235_v11 = vunpack.c.l.b16 %v1193_v16 }
 0x13b   :  { %v1195_v33 = vsel %vm1171_vm8, %v1162_v22, %v915_v21  ;;  %v59_v21 = vld [vmem:[%s5948_s0 + $0x8c] sm:$0x1] }
 0x13c   :  { %v1236_v29 = vunpack.c.l.b16 %v1195_v33  ;;  %v875_v47 = vunpack.c.l.b16 %v59_v21 }
 0x13e   :  { %586 = vrot.lane.b32.xlu1 %v556_v5, %s3346_s22  ;;  %v1246_v36 = vpack.c.b16 %v1236_v29, %v1235_v11  ;;  %588 = vrot.lane.b32.xlu2 %v557_v57, %s3346_s22  ;;  %v877_v31 = vpack.c.b16 %v875_v47, %v785_v3 }
 0x13f   :  { %508 = vrot.lane.b32.xlu0 %v477_v24, %s3344_s20 }
 0x140   :  { %3267 = vmatmul.msk.bf16.vlgmr.msra.gmra.mxu3 %vm1264_vm9, %v1246_v36  ;;  %v493_v52 = vpop.permute.xlu1 %492  ;;  %v425_v38 = vpop.permute.xlu2 %424  ;;  %v888_v35 = vshll.u32 %v877_v31, 16  ;;  %v886_v12 = vshrl.u32 %v877_v31, 16 }
 0x141   :  { %v491_v41 = vpop.permute.xlu0 %490 }
 0x142   :  { %v890_v30 = vrot.slane %v888_v35, 1  ;;  %v1020_v42 = vsel %vm1006_vm3, %v987_v62, %v491_v41 }
 0x143   :  { %v1053_v25 = vsel %vm1039_vm4, %v1020_v42, %v4150_v20 }
 0x144   :  { %v891_v48 = vor.u32 %v890_v30, %v886_v12 }
 0x146   :  { %780 = vrot.lane.b32.xlu1 %v749_v27, %s3345_s21  ;;  %830 = vrot.lane.b32.xlu2 %v800_v51, %s3347_s23 }
 0x147   :  { %778 = vrot.lane.b32.xlu0 %v742_v44, %s3345_s21 }
 0x148   :  { %v763_v1 = vpop.permute.xlu1 %762  ;;  %v503_v60 = vpop.permute.xlu2 %502 }
 0x149   :  { %v573_v54 = vpop.permute.xlu0 %572 }
 0x14e   :  { %868 = vrot.lane.b32.xlu1 %v3566_v34, %s3349_s7  ;;  %870 = vrot.lane.b32.xlu2 %v839_v9, %s3349_s7  ;;  %v3341_v34 = vld [vmem:[%s5948_s0 + $0x38] sm:$0xf] }
 0x14f   :  { %832 = vrot.lane.b32.xlu0 %v801_v15, %s3347_s23  ;;  %v948_v61 = vsel %vm924_vm1, %v3341_v34, %v3727_v17  ;;  %v1086_v17 = vsel %vm1072_vm5, %v1053_v25, %v763_v1 }
 0x150   :  { %v817_v4 = vpop.permute.xlu1 %816  ;;  %v989_v58 = vsel %vm973_vm2, %v948_v61, %v3772_v28  ;;  %v585_v26 = vpop.permute.xlu2 %584 }
 0x151   :  { %v815_v63 = vpop.permute.xlu0 %814  ;;  %v1022_v7 = vsel %vm1006_vm3, %v989_v58, %v493_v52  ;;  %v1001_v52 = vsel %vm973_vm2, %v966_v6, %v425_v38  ;;  %v5977_v58 = vld [vmem:[#allocation2_spill] sm:$0xff] }
 0x152   :  { %v1119_v16 = vsel %vm1105_vm6, %v1086_v17, %v815_v63 }
 0x153   :  { %v1152_v46 = vsel %vm1138_vm7, %v1119_v16, %v4209_v49  ;;  %v5976_v49 = vld [vmem:[#allocation6_spill] sm:$0xff] }
 0x154   :  { %v963_v21 = vsel %vm924_vm1, %v5976_v49, %v3774_v37 }
 0x156   :  { %922 = vrot.lane.b32.xlu1 %v891_v48, %s3348_s6 }
 0x157   :  { %920 = vrot.lane.b32.xlu0 %v4152_v59, %s3348_s6  ;;  %v1055_v59 = vsel %vm1039_vm4, %v1022_v7, %v573_v54 }
 0x158   :  { %v423_v10 = vpop.permute.xlu1 %422  ;;  %v1088_v55 = vsel %vm1072_vm5, %v1055_v59, %v4187_v14  ;;  %v827_v56 = vpop.permute.xlu2 %826  ;;  %v5979_v59 = vld [vmem:[#allocation7_spill] sm:$0xff] }
 0x159   :  { %v855_v43 = vpop.permute.xlu0 %854  ;;  %v1121_v28 = vsel %vm1105_vm6, %v1088_v55, %v817_v4  ;;  %v999_v41 = vsel %vm973_vm2, %v963_v21, %v423_v10  ;;  %v42_v10 = vld [vmem:[%s5948_s0 + $0x48] sm:$0xf] }
 0x15a   :  { %v1154_v5 = vsel %vm1138_vm7, %v1121_v28, %v855_v43  ;;  %v1032_v44 = vsel %vm1006_vm3, %v999_v41, %v503_v60  ;;  %v951_v42 = vsel %vm924_vm1, %v42_v10, %v5977_v58  ;;  %v5978_v43 = vld [vmem:[#allocation4_spill] sm:$0xff] }
 0x15b   :  { %v954_v7 = vsel %vm924_vm1, %v4025_v23, %v5978_v43 }
 0x160   :  { %v907_v22 = vpop.permute.xlu1 %906  ;;  %v867_v53 = vpop.permute.xlu2 %866 }
 0x161   :  { %v905_v11 = vpop.permute.xlu0 %904  ;;  %v1187_v57 = vsel %vm1171_vm8, %v1154_v5, %v907_v22 }
 0x162   :  { %v1185_v20 = vsel %vm1171_vm8, %v1152_v46, %v905_v11  ;;  %v1232_v33 = vunpack.c.l.b16 %v1187_v57 }
 0x163   :  { %v1231_v24 = vunpack.c.l.b16 %v1185_v20 }
 0x165   :  { %v1244_v29 = vpack.c.b16 %v1232_v33, %v1231_v24 }
 0x167   :  { %3265 = vmatmul.msk.bf16.gmra.mxu0 %vm1264_vm9, %v1244_v29 }
 0x168   :  { %v583_v14 = vpop.permute.xlu1 %582  ;;  %v417_v47 = vpop.permute.xlu2 %416 }
 0x169   :  { %v505_v36 = vpop.permute.xlu0 %504  ;;  %v1065_v3 = vsel %vm1039_vm4, %v1032_v44, %v583_v14  ;;  %v993_v17 = vsel %vm973_vm2, %v954_v7, %v417_v47  ;;  %v5980_v47 = vld [vmem:[#allocation5_spill] sm:$0xff]  ;;  %v5981_v44 = vld [vmem:[#allocation3_spill] sm:$0xff] }
 0x16a   :  { %v1034_v18 = vsel %vm1006_vm3, %v1001_v52, %v505_v36 }
 0x16b   :  { %v1067_v2 = vsel %vm1039_vm4, %v1034_v18, %v585_v26  ;;  %v991_v26 = vsel %vm973_vm2, %v951_v42, %v5979_v59 }
 0x170   :  { %v777_v13 = vpop.permute.xlu1 %776  ;;  %v575_v12 = vpop.permute.xlu2 %574 }
 0x171   :  { %v775_v19 = vpop.permute.xlu0 %774  ;;  %v1100_v32 = vsel %vm1072_vm5, %v1067_v2, %v777_v13  ;;  %v969_v2 = vsel %vm924_vm1, %v4045_v39, %v5981_v44 }
 0x172   :  { %v1098_v45 = vsel %vm1072_vm5, %v1065_v3, %v775_v19 }
 0x173   :  { %v1131_v31 = vsel %vm1105_vm6, %v1098_v45, %v827_v56 }
 0x178   :  { %v865_v27 = vpop.permute.xlu1 %864  ;;  %v769_v48 = vpop.permute.xlu2 %768 }
 0x179   :  { %v829_v51 = vpop.permute.xlu0 %828  ;;  %v1164_v1 = vsel %vm1138_vm7, %v1131_v31, %v865_v27 }
 0x17a   :  { %v1133_v37 = vsel %vm1105_vm6, %v1100_v32, %v829_v51  ;;  %v972_v51 = vsel %vm924_vm1, %v4128_v50, %v5980_v47 }
 0x17b   :  { %v1166_v40 = vsel %vm1138_vm7, %v1133_v37, %v867_v53 }
 0x180   :  { %v919_v38 = vpop.permute.xlu1 %918  ;;  %v857_v34 = vpop.permute.xlu2 %856 }
 0x181   :  { %v917_v54 = vpop.permute.xlu0 %916  ;;  %v1199_v35 = vsel %vm1171_vm8, %v1166_v40, %v919_v38 }
 0x182   :  { %v1197_v9 = vsel %vm1171_vm8, %v1164_v1, %v917_v54  ;;  %v1238_v15 = vunpack.c.l.b16 %v1199_v35 }
 0x183   :  { %v1237_v30 = vunpack.c.l.b16 %v1197_v9 }
 0x185   :  { %v1247_v4 = vpack.c.b16 %v1238_v15, %v1237_v30 }
 0x187   :  { %3268 = vmatmul.msk.bf16.gmra.mxu3 %vm1264_vm9, %v1247_v4 }
 0x188   :  { %v497_v60 = vpop.permute.xlu1 %496  ;;  %v429_v55 = vpop.permute.xlu2 %428 }
 0x189   :  { %v495_v63 = vpop.permute.xlu0 %494  ;;  %v1026_v5 = vsel %vm1006_vm3, %v993_v17, %v497_v60  ;;  %v1005_v3 = vsel %vm973_vm2, %v972_v51, %v429_v55 }
 0x18a   :  { %v1024_v16 = vsel %vm1006_vm3, %v991_v26, %v495_v63 }
 0x18b   :  { %v1057_v11 = vsel %vm1039_vm4, %v1024_v16, %v575_v12 }
 0x190   :  { %v767_v8 = vpop.permute.xlu1 %766  ;;  %v507_v56 = vpop.permute.xlu2 %506 }
 0x191   :  { %v577_v0 = vpop.permute.xlu0 %576  ;;  %v1090_v46 = vsel %vm1072_vm5, %v1057_v11, %v767_v8 }
 0x192   :  { %v1059_v22 = vsel %vm1039_vm4, %v1026_v5, %v577_v0 }
 0x193   :  { %v1092_v57 = vsel %vm1072_vm5, %v1059_v22, %v769_v48 }
 0x198   :  { %v821_v61 = vpop.permute.xlu1 %820  ;;  %v589_v52 = vpop.permute.xlu2 %588 }
 0x199   :  { %v819_v62 = vpop.permute.xlu0 %818  ;;  %v1125_v20 = vsel %vm1105_vm6, %v1092_v57, %v821_v61 }
 0x19a   :  { %v1123_v23 = vsel %vm1105_vm6, %v1090_v46, %v819_v62 }
 0x19b   :  { %v1156_v14 = vsel %vm1138_vm7, %v1123_v23, %v857_v34  ;;  %v4332_v34 = vpop.f32.mrf.mxu0 }
 0x19c   :  { %v1342_v17 = vsel %vm973_vm2, %v4332_v34, 0.0  ;;  %v1513_v16 = vsel %vm1512_vm10, %v4332_v34, 0.0 }
 0x1a0   :  { %v427_v25 = vpop.permute.xlu1 %426  ;;  %v831_v27 = vpop.permute.xlu2 %830 }
 0x1a1   :  { %v859_v28 = vpop.permute.xlu0 %858  ;;  %v1003_v32 = vsel %vm973_vm2, %v969_v2, %v427_v25 }
 0x1a2   :  { %v1158_v33 = vsel %vm1138_vm7, %v1125_v20, %v859_v28  ;;  %v1036_v40 = vsel %vm1006_vm3, %v1003_v32, %v507_v56 }
 0x1a3   :  { %v4334_v61 = vpop.f32.mrf.mxu0 }
 0x1a4   :  { %v1343_v26 = vsel %vm973_vm2, %v4334_v61, 0.0  ;;  %v1514_v25 = vsel %vm1512_vm10, %v4334_v61, 0.0 }
 0x1a5   :  { %v1344_v5 = vadd.f32 %v1343_v26, %v1342_v17  ;;  %v1515_v22 = vadd.f32 %v1514_v25, %v1513_v16 }
 0x1a8   :  { %v911_v24 = vpop.permute.xlu1 %910  ;;  %v871_v35 = vpop.permute.xlu2 %870 }
 0x1a9   :  { %v909_v29 = vpop.permute.xlu0 %908  ;;  %v1191_v36 = vsel %vm1171_vm8, %v1158_v33, %v911_v24 }
 0x1aa   :  { %v1189_v53 = vsel %vm1171_vm8, %v1156_v14, %v909_v29  ;;  %v1234_v13 = vunpack.c.l.b16 %v1191_v36 }
 0x1ab   :  { %v1233_v19 = vunpack.c.l.b16 %v1189_v53  ;;  %v4336_v62 = vpop.f32.mrf.mxu0 }
 0x1ac   :  { %v1345_v55 = vsel %vm973_vm2, %v4336_v62, 0.0  ;;  %v1516_v28 = vsel %vm1512_vm10, %v4336_v62, 0.0 }
 0x1ad   :  { %v1245_v6 = vpack.c.b16 %v1234_v13, %v1233_v19  ;;  %v1346_v20 = vadd.f32 %v1345_v55, %v1344_v5  ;;  %v1517_v33 = vadd.f32 %v1516_v28, %v1515_v22 }
 0x1af   :  { %3266 = vmatmul.msk.bf16.gmra.mxu0 %vm1264_vm9, %v1245_v6 }
 0x1b0   :  { %v587_v49 = vpop.permute.xlu1 %586 }
 0x1b1   :  { %v509_v21 = vpop.permute.xlu0 %508  ;;  %v1069_v1 = vsel %vm1039_vm4, %v1036_v40, %v587_v49 }
 0x1b2   :  { %v1038_v45 = vsel %vm1006_vm3, %v1005_v3, %v509_v21 }
 0x1b3   :  { %v1071_v38 = vsel %vm1039_vm4, %v1038_v45, %v589_v52  ;;  %v4338_v10 = vpop.f32.mrf.mxu0 }
 0x1b4   :  { %v1347_v23 = vsel %vm973_vm2, %v4338_v10, 0.0  ;;  %v1518_v57 = vsel %vm1512_vm10, %v4338_v10, 0.0 }
 0x1b5   :  { %v1348_v29 = vadd.f32 %v1347_v23, %v1346_v20  ;;  %v1519_v14 = vadd.f32 %v1518_v57, %v1517_v33 }
 0x1b8   :  { %v781_v41 = vpop.permute.xlu1 %780 }
 0x1b9   :  { %v779_v18 = vpop.permute.xlu0 %778  ;;  %v1104_v50 = vsel %vm1072_vm5, %v1071_v38, %v781_v41 }
 0x1ba   :  { %v1102_v54 = vsel %vm1072_vm5, %v1069_v1, %v779_v18 }
 0x1bb   :  { %v1135_v9 = vsel %vm1105_vm6, %v1102_v54, %v831_v27  ;;  %v4340_v58 = vpop.f32.mrf.mxu0 }
 0x1bc   :  { %v1349_v24 = vsel %vm973_vm2, %v4340_v58, 0.0  ;;  %v1520_v56 = vsel %vm1512_vm10, %v4340_v58, 0.0 }
 0x1bd   :  { %v1350_v13 = vadd.f32 %v1349_v24, %v1348_v29  ;;  %v1521_v19 = vadd.f32 %v1520_v56, %v1519_v14 }
 0x1c0   :  { %v869_v37 = vpop.permute.xlu1 %868 }
 0x1c1   :  { %v833_v31 = vpop.permute.xlu0 %832  ;;  %v1168_v30 = vsel %vm1138_vm7, %v1135_v9, %v869_v37 }
 0x1c2   :  { %v1137_v39 = vsel %vm1105_vm6, %v1104_v50, %v833_v31 }
 0x1c3   :  { %v1170_v15 = vsel %vm1138_vm7, %v1137_v39, %v871_v35  ;;  %v4342_v42 = vpop.f32.mrf.mxu0  ;;  %v4346_v7 = vpop.f32.mrf.mxu3 }
 0x1c4   :  { %v1351_v36 = vsel %vm973_vm2, %v4342_v42, 0.0  ;;  %v1522_v53 = vsel %vm1512_vm10, %v4342_v42, 0.0  ;;  %v1361_v39 = vsel %vm973_vm2, %v4346_v7, 0.0  ;;  %v1532_v35 = vsel %vm1512_vm10, %v4346_v7, 0.0 }
 0x1c5   :  { %v1352_v21 = vadd.f32 %v1351_v36, %v1350_v13  ;;  %v1523_v52 = vadd.f32 %v1522_v53, %v1521_v19 }
 0x1c8   :  { %v923_v12 = vpop.permute.xlu1 %922 }
 0x1c9   :  { %v921_v4 = vpop.permute.xlu0 %920  ;;  %v1203_v60 = vsel %vm1171_vm8, %v1170_v15, %v923_v12 }
 0x1ca   :  { %v1201_v63 = vsel %vm1171_vm8, %v1168_v30, %v921_v4  ;;  %v1240_v48 = vunpack.c.l.b16 %v1203_v60 }
 0x1cb   :  { %v1239_v8 = vunpack.c.l.b16 %v1201_v63  ;;  %v4362_v11 = vpop.f32.mrf.mxu3 }
 0x1cc   :  { %v1363_v12 = vsel %vm973_vm2, %v4362_v11, 0.0  ;;  %v1534_v30 = vsel %vm1512_vm10, %v4362_v11, 0.0 }
 0x1cd   :  { %v1248_v0 = vpack.c.b16 %v1240_v48, %v1239_v8 }
 0x1cf   :  { %3269 = vmatmul.msk.bf16.gmra.mxu3 %vm1264_vm9, %v1248_v0 }
 0x1e4   :  { %v4344_v43 = vpop.f32.mrf.mxu0 }
 0x1e5   :  { %v1353_v6 = vsel %vm973_vm2, %v4344_v43, 0.0  ;;  %v1524_v49 = vsel %vm1512_vm10, %v4344_v43, 0.0 }
 0x1e6   :  { %v1354_v47 = vadd.f32 %v1353_v6, %v1352_v21  ;;  %v1525_v51 = vadd.f32 %v1524_v49, %v1523_v52 }
 0x1ec   :  { %v4348_v59 = vpop.f32.mrf.mxu0 }
 0x1ed   :  { %v1355_v18 = vsel %vm973_vm2, %v4348_v59, 0.0  ;;  %v1526_v27 = vsel %vm1512_vm10, %v4348_v59, 0.0 }
 0x1ee   :  { %v1356_v32 = vadd.f32 %v1355_v18, %v1354_v47  ;;  %v1527_v45 = vadd.f32 %v1526_v27, %v1525_v51 }
 0x20a   :  { %v4382_v41 = vpop.f32.mrf.mxu3 }
 0x20b   :  { %v1365_v48 = vsel %vm973_vm2, %v4382_v41, 0.0  ;;  %v1536_v8 = vsel %vm1512_vm10, %v4382_v41, 0.0 }
 0x212   :  { %v4398_v54 = vpop.f32.mrf.mxu3 }
 0x213   :  { %v1367_v25 = vsel %vm973_vm2, %v4398_v54, 0.0  ;;  %v1538_v17 = vsel %vm1512_vm10, %v4398_v54, 0.0 }
 0x22c   :  { %v4364_v46 = vpop.f32.mrf.mxu0 }
 0x22d   :  { %v1357_v2 = vsel %vm973_vm2, %v4364_v46, 0.0  ;;  %v1528_v3 = vsel %vm1512_vm10, %v4364_v46, 0.0 }
 0x22e   :  { %v1358_v40 = vadd.f32 %v1357_v2, %v1356_v32  ;;  %v1529_v38 = vadd.f32 %v1528_v3, %v1527_v45 }
 0x234   :  { %v4388_v44 = vpop.f32.mrf.mxu0 }
 0x235   :  { %v1359_v37 = vsel %vm973_vm2, %v4388_v44, 0.0  ;;  %v1530_v31 = vsel %vm1512_vm10, %v4388_v44, 0.0 }
 0x236   :  { %v1360_v1 = vadd.f32 %v1359_v37, %v1358_v40  ;;  %v1531_v50 = vadd.f32 %v1530_v31, %v1529_v38 }
 0x238   :  { %v1362_v9 = vadd.f32 %v1361_v39, %v1360_v1  ;;  %v1533_v15 = vadd.f32 %v1532_v35, %v1531_v50 }
 0x23a   :  { %v1364_v4 = vadd.f32 %v1363_v12, %v1362_v9  ;;  %v1535_v60 = vadd.f32 %v1534_v30, %v1533_v15 }
 0x23c   :  { %v1366_v0 = vadd.f32 %v1365_v48, %v1364_v4  ;;  %v1537_v26 = vadd.f32 %v1536_v8, %v1535_v60 }
 0x23e   :  { %v1368_v28 = vadd.f32 %v1367_v25, %v1366_v0  ;;  %v1539_v5 = vadd.f32 %v1538_v17, %v1537_v26 }
 0x252   :  { %v4408_v63 = vpop.f32.mrf.mxu3 }
 0x253   :  { %v1369_v16 = vsel %vm973_vm2, %v4408_v63, 0.0  ;;  %v1540_v55 = vsel %vm1512_vm10, %v4408_v63, 0.0 }
 0x254   :  { %v1370_v23 = vadd.f32 %v1369_v16, %v1368_v28  ;;  %v1541_v57 = vadd.f32 %v1540_v55, %v1539_v5 }
 0x25a   :  { %v4422_v22 = vpop.f32.mrf.mxu3 }
 0x25b   :  { %v1371_v20 = vsel %vm973_vm2, %v4422_v22, 0.0  ;;  %v1542_v33 = vsel %vm1512_vm10, %v4422_v22, 0.0 }
 0x25c   :  { %v1372_v24 = vadd.f32 %v1371_v20, %v1370_v23  ;;  %v1543_v56 = vadd.f32 %v1542_v33, %v1541_v57 }
 0x25e   :  { %v1373_v29 = vrot.slane %v1372_v24, 4  ;;  %v1544_v14 = vrot.slane %v1543_v56, 4 }
 0x260   :  { %v1374_v36 = vadd.f32 %v1373_v29, %v1372_v24  ;;  %v1545_v53 = vadd.f32 %v1544_v14, %v1543_v56 }
 0x262   :  { %v1375_v13 = vrot.slane %v1374_v36, 2  ;;  %v1546_v6 = vrot.slane %v1545_v53, 2 }
 0x264   :  { %v1376_v19 = vadd.f32 %v1375_v13, %v1374_v36  ;;  %v1547_v52 = vadd.f32 %v1546_v6, %v1545_v53 }
 0x266   :  { %v1377_v49 = vrot.slane %v1376_v19, 1  ;;  %v1548_v51 = vrot.slane %v1547_v52, 1 }
 0x268   :  { %v1378_v21 = vadd.f32 %v1377_v49, %v1376_v19  ;;  %v1549_v37 = vadd.f32 %v1548_v51, %v1547_v52 }
 0x26a   :  { %v1379_v18 = vmul.f32 0.0078125, %v1378_v21  ;;  %v4456_v9 = vmul.f32 0.0078125, %v1549_v37 }
 0x26c   :  { %v4429_v27 = vsub.f32 %v4332_v34, %v1379_v18  ;;  %v4432_v47 = vsub.f32 %v4334_v61, %v1379_v18  ;;  %v4435_v2 = vsub.f32 %v4336_v62, %v1379_v18  ;;  %v4438_v3 = vsub.f32 %v4338_v10, %v1379_v18 }
 0x26d   :  { %v4445_v31 = vsub.f32 %v4340_v58, %v1379_v18  ;;  %v4450_v38 = vsub.f32 %v4342_v42, %v1379_v18  ;;  %v4459_v15 = vsub.f32 %v4344_v43, %v1379_v18  ;;  %v4465_v60 = vsub.f32 %v4348_v59, %v1379_v18 }
 0x26e   :  { %v1396_v32 = vmul.f32 %v4429_v27, %v4429_v27  ;;  %v1397_v45 = vmul.f32 %v4432_v47, %v4432_v47  ;;  %v1398_v40 = vmul.f32 %v4435_v2, %v4435_v2  ;;  %v1399_v1 = vmul.f32 %v4438_v3, %v4438_v3 }
 0x26f   :  { %v1400_v12 = vmul.f32 %v4445_v31, %v4445_v31  ;;  %v1401_v48 = vmul.f32 %v4450_v38, %v4450_v38  ;;  %v4472_v26 = vsub.f32 %v4332_v34, %v4456_v9  ;;  %v4475_v25 = vsub.f32 %v4364_v46, %v1379_v18 }
 0x270   :  { %v1412_v50 = vsel %vm973_vm2, %v1396_v32, 0.0  ;;  %v1413_v39 = vsel %vm973_vm2, %v1397_v45, 0.0  ;;  %v1415_v30 = vsel %vm973_vm2, %v1398_v40, 0.0  ;;  %v1417_v8 = vsel %vm973_vm2, %v1399_v1, 0.0 }
 0x271   :  { %v1414_v35 = vadd.f32 %v1413_v39, %v1412_v50  ;;  %v1402_v17 = vmul.f32 %v4459_v15, %v4459_v15  ;;  %v1419_v16 = vsel %vm973_vm2, %v1400_v12, 0.0  ;;  %v4482_v55 = vsub.f32 %v4334_v61, %v4456_v9 }
 0x272   :  { %v4485_v5 = vsub.f32 %v4388_v44, %v1379_v18  ;;  %v1403_v34 = vmul.f32 %v4465_v60, %v4465_v60  ;;  %v1421_v23 = vsel %vm973_vm2, %v1401_v48, 0.0  ;;  %v4492_v57 = vsub.f32 %v4336_v62, %v4456_v9 }
 0x273   :  { %v1416_v4 = vadd.f32 %v1415_v30, %v1414_v35  ;;  %5982 = vst [vmem:[#allocation6_spill] sm:$0xff] %v4482_v55  ;;  %v4495_v20 = vsub.f32 %v4346_v7, %v1379_v18  ;;  %v4498_v33 = vsub.f32 %v4362_v11, %v1379_v18  ;;  %v1567_v24 = vmul.f32 %v4472_v26, %v4472_v26 }
 0x274   :  { %5983 = vst [vmem:[#allocation2_spill] sm:$0xff] %v4492_v57  ;;  %v1404_v56 = vmul.f32 %v4475_v25, %v4475_v25  ;;  %v1423_v29 = vsel %vm973_vm2, %v1402_v17, 0.0  ;;  %v4507_v14 = vsub.f32 %v4338_v10, %v4456_v9  ;;  %v1568_v62 = vmul.f32 %v4482_v55, %v4482_v55 }
 0x275   :  { %v1418_v0 = vadd.f32 %v1417_v8, %v1416_v4  ;;  %v4512_v36 = vsub.f32 %v4382_v41, %v1379_v18  ;;  %v4515_v53 = vsub.f32 %v4398_v54, %v1379_v18  ;;  %v4518_v13 = vsub.f32 %v4408_v63, %v1379_v18 }
 0x276   :  { %5984 = vst [vmem:[#allocation4_spill] sm:$0xff] %v4507_v14  ;;  %v1405_v6 = vmul.f32 %v4485_v5, %v4485_v5  ;;  %v1425_v49 = vsel %vm973_vm2, %v1403_v34, 0.0  ;;  %v4525_v10 = vsub.f32 %v4340_v58, %v4456_v9  ;;  %v1569_v21 = vmul.f32 %v4492_v57, %v4492_v57 }
 0x277   :  { %v1420_v28 = vadd.f32 %v1419_v16, %v1418_v0  ;;  %v4530_v52 = vsub.f32 %v4422_v22, %v1379_v18  ;;  %v1406_v51 = vmul.f32 %v4495_v20, %v4495_v20  ;;  %v1583_v45 = vsel %vm1512_vm10, %v1567_v24, 0.0 }
 0x278   :  { %v1427_v37 = vsel %vm973_vm2, %v1404_v56, 0.0  ;;  %v4538_v40 = vsub.f32 %v4342_v42, %v4456_v9  ;;  %v1570_v58 = vmul.f32 %v4507_v14, %v4507_v14  ;;  %v1584_v1 = vsel %vm1512_vm10, %v1568_v62, 0.0 }
 0x279   :  { %v1422_v61 = vadd.f32 %v1421_v23, %v1420_v28  ;;  %v1407_v18 = vmul.f32 %v4498_v33, %v4498_v33  ;;  %v1408_v50 = vmul.f32 %v4512_v36, %v4512_v36  ;;  %v1585_v35 = vadd.f32 %v1584_v1, %v1583_v45 }
 0x27a   :  { %5985 = vst [vmem:[#allocation7_spill] sm:$0xff] %v4538_v40  ;;  %v1429_v12 = vsel %vm973_vm2, %v1405_v6, 0.0  ;;  %v4550_v30 = vsub.f32 %v4344_v43, %v4456_v9  ;;  %v1571_v42 = vmul.f32 %v4525_v10, %v4525_v10  ;;  %v1586_v4 = vsel %vm1512_vm10, %v1569_v21, 0.0 }
 0x27b   :  { %v1424_v19 = vadd.f32 %v1423_v29, %v1422_v61  ;;  %v1409_v48 = vmul.f32 %v4515_v53, %v4515_v53  ;;  %v1410_v8 = vmul.f32 %v4518_v13, %v4518_v13  ;;  %v1587_v17 = vadd.f32 %v1586_v4, %v1585_v35 }
 0x27c   :  { %5986 = vst [vmem:[#allocation5_spill] sm:$0xff] %v4550_v30  ;;  %v1431_v16 = vsel %vm973_vm2, %v1406_v51, 0.0  ;;  %v4562_v28 = vsub.f32 %v4348_v59, %v4456_v9  ;;  %v1572_v43 = vmul.f32 %v4538_v40, %v4538_v40  ;;  %v1588_v34 = vsel %vm1512_vm10, %v1570_v58, 0.0 }
 0x27d   :  { %v1426_v32 = vadd.f32 %v1425_v49, %v1424_v19  ;;  %v1433_v61 = vsel %vm973_vm2, %v1407_v18, 0.0  ;;  %v1589_v24 = vadd.f32 %v1588_v34, %v1587_v17  ;;  %v4570_v56 = vsub.f32 %v4364_v46, %v4456_v9 }
 0x27e   :  { %5987 = vst [vmem:[#allocation3_spill] sm:$0xff] %v4562_v28  ;;  %v4574_v29 = vsub.f32 %v4388_v44, %v4456_v9  ;;  %v1573_v59 = vmul.f32 %v4550_v30, %v4550_v30  ;;  %v1590_v62 = vsel %vm1512_vm10, %v1571_v42, 0.0  ;;  %v1411_v19 = vmul.f32 %v4530_v52, %v4530_v52 }
 0x27f   :  { %v1428_v39 = vadd.f32 %v1427_v37, %v1426_v32  ;;  %5988 = vst [vmem:[#allocation8_spill] sm:$0xff] %v4570_v56  ;;  %v1435_v49 = vsel %vm973_vm2, %v1408_v50, 0.0  ;;  %v1591_v21 = vadd.f32 %v1590_v62, %v1589_v24  ;;  %v1437_v51 = vsel %vm973_vm2, %v1409_v48, 0.0 }
 0x280   :  { %5989 = vst [vmem:[#allocation9_spill] sm:$0xff] %v4574_v29  ;;  %v1439_v46 = vsel %vm973_vm2, %v1410_v8, 0.0  ;;  %v1574_v44 = vmul.f32 %v4562_v28, %v4562_v28  ;;  %v1592_v32 = vsel %vm1512_vm10, %v1572_v43, 0.0  ;;  %v4589_v37 = vsub.f32 %v4346_v7, %v4456_v9 }
 0x281   :  { %v1430_v0 = vadd.f32 %v1429_v12, %v1428_v39  ;;  %v4593_v58 = vsub.f32 %v4362_v11, %v4456_v9  ;;  %v1593_v1 = vadd.f32 %v1592_v32, %v1591_v21  ;;  %v1575_v18 = vmul.f32 %v4570_v56, %v4570_v56 }
 0x282   :  { %5990 = vst [vmem:[#allocation10_spill] sm:$0xff] %v4589_v37  ;;  %v1576_v50 = vmul.f32 %v4574_v29, %v4574_v29  ;;  %v1594_v39 = vsel %vm1512_vm10, %v1573_v59, 0.0  ;;  %v1596_v7 = vsel %vm1512_vm10, %v1574_v44, 0.0  ;;  %v3350_v11 = vmov 0  }
 0x283   :  { %v1432_v23 = vadd.f32 %v1431_v16, %v1430_v0  ;;  %5991 = vst [vmem:[#allocation11_spill] sm:$0xff] %v4593_v58  ;;  %v1595_v12 = vadd.f32 %v1594_v39, %v1593_v1  ;;  %v1698_v4 = vrot.slane %v3350_v11, 7  ;;  %v1441_v8 = vsel %vm973_vm2, %v1411_v19, 0.0 }
 0x284   :  { %v4612_v16 = vsub.f32 %v4382_v41, %v4456_v9  ;;  %v1577_v43 = vmul.f32 %v4589_v37, %v4589_v37  ;;  %v1598_v34 = vsel %vm1512_vm10, %v1575_v18, 0.0  ;;  %v4625_v62 = vsub.f32 %v4398_v54, %v4456_v9 }
 0x285   :  { %v1434_v6 = vadd.f32 %v1433_v61, %v1432_v23  ;;  %v1597_v0 = vadd.f32 %v1596_v7, %v1595_v12  ;;  %v1834_v23 = vsel %vm4601_vm13, 0, %v1698_v4  ;;  %v1578_v41 = vmul.f32 %v4593_v58, %v4593_v58 }
 0x286   :  { %5996 = vst [vmem:[#allocation12_spill] sm:$0xff] %v4612_v16  ;;  %v4621_v59 = vsel %vm4606_vm0, %v1834_v23, 0  ;;  %v1600_v19 = vsel %vm1512_vm10, %v1576_v50, 0.0  ;;  %v1579_v44 = vmul.f32 %v4612_v16, %v4612_v16  ;;  %v1602_v54 = vsel %vm1512_vm10, %v1577_v43, 0.0 }
 0x287   :  { %v1436_v45 = vadd.f32 %v1435_v49, %v1434_v6  ;;  %v1599_v24 = vadd.f32 %v1598_v34, %v1597_v0  ;;  %5997 = vst [vmem:[#allocation13_spill] sm:$0xff] %v4625_v62  ;;  %v1874_v6 = vshll.u32 %v4621_v59, 16  ;;  %v4641_v18 = vsub.f32 %v4422_v22, %v4456_v9 }
 0x288   :  { %v1580_v50 = vmul.f32 %v4625_v62, %v4625_v62  ;;  %v1604_v39 = vsel %vm1512_vm10, %v1578_v41, 0.0  ;;  %v1606_v11 = vsel %vm1512_vm10, %v1579_v44, 0.0 }
 0x289   :  { %v1438_v35 = vadd.f32 %v1437_v51, %v1436_v45  ;;  %v1601_v21 = vadd.f32 %v1600_v19, %v1599_v24  ;;  %v1872_v51 = vshrl.u32 %v4621_v59, 16  ;;  %v1876_v32 = vrot.slane %v1874_v6, 1  ;;  %5999 = vst [vmem:[#allocation15_spill] sm:$0xff] %v4641_v18 }
 0x28b   :  { %v1440_v48 = vadd.f32 %v1439_v46, %v1438_v35  ;;  %v4634_v46 = vsub.f32 %v4408_v63, %v4456_v9  ;;  %v1603_v1 = vadd.f32 %v1602_v54, %v1601_v21  ;;  %v4646_v35 = vor.u32 %v1876_v32, %v1872_v51 }
 0x28c   :  { %v1582_v9 = vmul.f32 %v4641_v18, %v4641_v18 }
 0x28d   :  { %v1442_v61 = vadd.f32 %v1441_v8, %v1440_v48  ;;  %5998 = vst [vmem:[#allocation14_spill] sm:$0xff] %v4634_v46  ;;  %v1605_v12 = vadd.f32 %v1604_v39, %v1603_v1  ;;  %v1581_v7 = vmul.f32 %v4634_v46, %v4634_v46  ;;  %1976 = vrot.lane.b32.xlu2 %v4646_v35, %s3343_s30  ;;  %v1608_v48 = vsel %vm1512_vm10, %v1580_v50, 0.0 }
 0x28e   :  { %v1612_v24 = vsel %vm1512_vm10, %v1582_v9, 0.0 }
 0x28f   :  { %v1443_v49 = vrot.slane %v1442_v61, 4  ;;  %v1607_v22 = vadd.f32 %v1606_v11, %v1605_v12  ;;  %v1610_v43 = vsel %vm1512_vm10, %v1581_v7, 0.0 }
 0x291   :  { %v1444_v45 = vadd.f32 %v1443_v49, %v1442_v61  ;;  %v1609_v0 = vadd.f32 %v1608_v48, %v1607_v22  ;;  %v5954_v61 = vrot.slane %v4621_v59, 1 }
 0x293   :  { %v1445_v63 = vrot.slane %v1444_v45, 2  ;;  %v1611_v23 = vadd.f32 %v1610_v43, %v1609_v0  ;;  %v4674_v43 = vld [vmem:[%s5950_s3 + $0x1] ss:$0 sm:$0xff] }
 0x295   :  { %v1446_v4 = vadd.f32 %v1445_v63, %v1444_v45  ;;  %v1613_v19 = vadd.f32 %v1612_v24, %v1611_v23  ;;  %2036 = vrot.lane.b32.xlu2 %v5954_v61, %s3346_s22  ;;  %v3331_v45 = vld [vmem:[%s5950_s3 + $0x5] ss:$0 sm:$0xff] }
 0x296   :  { %1660 = vrot.lane.b32.xlu1 %v3331_v45, %s3343_s30 }
 0x297   :  { %v1447_v8 = vrot.slane %v1446_v4, 1  ;;  %v1614_v49 = vrot.slane %v1613_v19, 4 }
 0x299   :  { %v1448_v34 = vadd.f32 %v1447_v8, %v1446_v4  ;;  %v1615_v21 = vadd.f32 %v1614_v49, %v1613_v19  ;;  %v18_v4 = vld [vmem:[%s5950_s3] sm:$0x1] }
 0x29b   :  { %v1449_v41 = vmul.f32 0.0078125, %v1448_v34  ;;  %v1616_v51 = vrot.slane %v1615_v21, 2 }
 0x29d   :  { %v1450_v6 = vadd.f32 1e-05, %v1449_v41  ;;  %v1617_v44 = vadd.f32 %v1616_v51, %v1615_v21 }
 0x29f   :  { %3333 = vrsqrt.f32 %v1450_v6  ;;  %v1618_v32 = vrot.slane %v1617_v44, 1  ;;  %vm1457_vm3 = vweird.f32 %v1450_v6 }
 0x2a1   :  { %v1619_v50 = vadd.f32 %v1618_v32, %v1617_v44 }
 0x2a3   :  { %v1620_v63 = vmul.f32 0.0078125, %v1619_v50 }
 0x2a5   :  { %v3334_v54 = vpop.eup %3333  ;;  %v1621_v7 = vadd.f32 1e-05, %v1620_v63 }
 0x2a6   :  { %v1452_v1 = vmul.f32 %v3334_v54, %v1450_v6  ;;  %vm1458_vm1 = vweird.f32 %v3334_v54 }
 0x2a7   :  { %3335 = vrsqrt.f32 %v1621_v7  ;;  %vm1459_vm5 = vmor %vm1457_vm3, %vm1458_vm1  ;;  %vm1628_vm9 = vweird.f32 %v1621_v7  ;;  %vm2491_vm1 = vcmask 523264   ;;  %vm2599_vm3 = vcmask 588800  }
 0x2a8   :  { %v1453_v39 = vmul.f32 %v3334_v54, %v1452_v1 }
 0x2aa   :  { %v1454_v12 = vmul.f32 0.5, %v1453_v39 }
 0x2ac   :  { %v1455_v11 = vsub.f32 1.5, %v1454_v12 }
 0x2ad   :  { %v3336_v8 = vpop.eup %3335 }
 0x2ae   :  { %v1456_v22 = vmul.f32 %v3334_v54, %v1455_v11  ;;  %v1623_v34 = vmul.f32 %v3336_v8, %v1621_v7  ;;  %vm1629_vm7 = vweird.f32 %v3336_v8 }
 0x2af   :  { %vm1630_vm10 = vmor %vm1628_vm9, %vm1629_vm7  ;;  %vm2936_vm7 = vcmask 1041409   ;;  %vm2939_vm9 = vcmask 1042434  }
 0x2b0   :  { %v1460_v9 = vsel %vm1459_vm5, %v3334_v54, %v1456_v22  ;;  %v1624_v6 = vmul.f32 %v3336_v8, %v1623_v34 }
 0x2b1   :  { %v1461_v48 = vmul.f32 %v1460_v9, %v18_v4 }
 0x2b3   :  { %v4669_v0 = vperm.slane %v1461_v48, 0 }
 0x2b5   :  { %v1474_v23 = vmul.f32 %v4669_v0, %v4498_v33  ;;  %v1476_v24 = vmul.f32 %v4669_v0, %v4515_v53  ;;  %v1477_v41 = vmul.f32 %v4669_v0, %v4518_v13  ;;  %v1478_v19 = vmul.f32 %v4669_v0, %v4530_v52 }
 0x2b6   :  { %v1472_v49 = vmul.f32 %v4669_v0, %v4485_v5  ;;  %v1464_v21 = vmul.f32 %v4669_v0, %v4432_v47  ;;  %v1625_v52 = vmul.f32 0.5, %v1624_v6  ;;  %v1463_v47 = vmul.f32 %v4669_v0, %v4429_v27 }
 0x2b7   :  { %v4689_v51 = vadd.f32 %v4674_v43, %v1474_v23  ;;  %v4692_v33 = vadd.f32 %v4674_v43, %v1476_v24  ;;  %v4695_v53 = vadd.f32 %v4674_v43, %v1477_v41  ;;  %v4698_v13 = vadd.f32 %v4674_v43, %v1478_v19 }
 0x2b8   :  { %v1489_v44 = vadd.f32 %v4674_v43, %v1472_v49  ;;  %v1481_v5 = vadd.f32 %v4674_v43, %v1464_v21  ;;  %v1626_v54 = vsub.f32 1.5, %v1625_v52  ;;  %v1480_v1 = vadd.f32 %v4674_v43, %v1463_v47 }
 0x2b9   :  { %v1473_v11 = vmul.f32 %v4669_v0, %v4495_v20  ;;  %v1465_v41 = vmul.f32 %v4669_v0, %v4435_v2  ;;  %v1471_v19 = vmul.f32 %v4669_v0, %v4475_v25 }
 0x2ba   :  { %v1505_v32 = vmax.f32 %v1489_v44, 0.0  ;;  %v1497_v45 = vmax.f32 %v1481_v5, 0.0  ;;  %v1627_v50 = vmul.f32 %v3336_v8, %v1626_v54  ;;  %v1496_v12 = vmax.f32 %v1480_v1, 0.0 }
 0x2bb   :  { %v1490_v23 = vadd.f32 %v4674_v43, %v1473_v11  ;;  %v1482_v21 = vadd.f32 %v4674_v43, %v1465_v41  ;;  %v1488_v52 = vadd.f32 %v4674_v43, %v1471_v19 }
 0x2bc   :  { %v1688_v39 = vpack.c.bf16 %v1505_v32, %v1505_v32  ;;  %v1680_v63 = vpack.c.bf16 %v1497_v45, %v1497_v45  ;;  %v1631_v4 = vsel %vm1630_vm10, %v3336_v8, %v1627_v50  ;;  %v1679_v34 = vpack.c.bf16 %v1496_v12, %v1496_v12 }
 0x2bd   :  { %1633 = vrot.lane.b32.xlu2 %v1631_v4, %s3351_s29  ;;  %v1506_v49 = vmax.f32 %v1490_v23, 0.0  ;;  %v1498_v1 = vmax.f32 %v1482_v21, 0.0  ;;  %v1504_v50 = vmax.f32 %v1488_v52, 0.0  ;;  %vm2942_vm10 = vcmask 1043459  }
 0x2be   :  { %v1766_v22 = vshrl.u32 %v1688_v39, 16  ;;  %v1710_v27 = vshrl.u32 %v1680_v63, 16  ;;  %v1769_v48 = vshll.u32 %v1688_v39, 16  ;;  %v1713_v7 = vshll.u32 %v1680_v63, 16 }
 0x2bf   :  { %v1703_v8 = vshrl.u32 %v1679_v34, 16  ;;  %v1706_v47 = vshll.u32 %v1679_v34, 16  ;;  %v1689_v25 = vpack.c.bf16 %v1506_v49, %v1506_v49  ;;  %v1681_v12 = vpack.c.bf16 %v1498_v1, %v1498_v1 }
 0x2c0   :  { %v1768_v9 = vrot.slane %v1766_v22, 7  ;;  %v1712_v24 = vrot.slane %v1710_v27, 7  ;;  %v1687_v11 = vpack.c.bf16 %v1504_v50, %v1504_v50  ;;  %v1468_v49 = vmul.f32 %v4669_v0, %v4450_v38 }
 0x2c1   :  { %v1705_v5 = vrot.slane %v1703_v8, 7  ;;  %v1773_v39 = vshrl.u32 %v1689_v25, 16  ;;  %v1776_v27 = vshll.u32 %v1689_v25, 16  ;;  %v1466_v25 = vmul.f32 %v4669_v0, %v4438_v3 }
 0x2c2   :  { %v1771_v20 = vor.u32 %v1769_v48, %v1768_v9  ;;  %v1715_v6 = vor.u32 %v1713_v7, %v1712_v24  ;;  %v1717_v9 = vshrl.u32 %v1681_v12, 16  ;;  %v1759_v48 = vshrl.u32 %v1687_v11, 16 }
 0x2c3   :  { %v1708_v45 = vor.u32 %v1706_v47, %v1705_v5  ;;  %v1775_v22 = vrot.slane %v1773_v39, 7  ;;  %v1720_v24 = vshll.u32 %v1681_v12, 16  ;;  %v1762_v41 = vshll.u32 %v1687_v11, 16 }
 0x2c4   :  { %v1844_v44 = vsel %vm4601_vm13, 0, %v1771_v20  ;;  %v1836_v2 = vsel %vm4601_vm13, 0, %v1715_v6  ;;  %v1719_v23 = vrot.slane %v1717_v9, 7  ;;  %v1761_v7 = vrot.slane %v1759_v48, 7 }
 0x2c5   :  { %v4719_v54 = vsel %vm4606_vm0, %v1844_v44, 0  ;;  %v4727_v32 = vsel %vm4606_vm0, %v1836_v2, 0  ;;  %v1835_v63 = vsel %vm4601_vm13, 0, %v1708_v45  ;;  %v1778_v34 = vor.u32 %v1776_v27, %v1775_v22 }
 0x2c6   :  { %2086 = vrot.lane.b32.xlu1 %v4719_v54, %s3347_s23  ;;  %2070 = vrot.lane.b32.xlu0 %v4727_v32, %s3347_s23  ;;  %v4735_v4 = vsel %vm4606_vm0, %v1835_v63, 0  ;;  %v1722_v8 = vor.u32 %v1720_v24, %v1719_v23  ;;  %v1764_v6 = vor.u32 %v1762_v41, %v1761_v7  ;;  %v1485_v44 = vadd.f32 %v4674_v43, %v1468_v49 }
 0x2c7   :  { %2068 = vrot.lane.b32.xlu2 %v4735_v4, %s3347_s23  ;;  %v1845_v19 = vsel %vm4601_vm13, 0, %v1778_v34  ;;  %v4767_v47 = vrot.slane %v4727_v32, 1  ;;  %v1483_v1 = vadd.f32 %v4674_v43, %v1466_v25  ;;  %v1469_v39 = vmul.f32 %v4669_v0, %v4459_v15 }
 0x2c8   :  { %v4743_v20 = vsel %vm4606_vm0, %v1845_v19, 0  ;;  %v1837_v21 = vsel %vm4601_vm13, 0, %v1722_v8  ;;  %v1843_v38 = vsel %vm4601_vm13, 0, %v1764_v6  ;;  %v1501_v2 = vmax.f32 %v1485_v44, 0.0 }
 0x2c9   :  { %v4753_v52 = vsel %vm4606_vm0, %v1837_v21, 0  ;;  %v4764_v5 = vsel %vm4606_vm0, %v1843_v38, 0  ;;  %v1467_v63 = vmul.f32 %v4669_v0, %v4445_v31  ;;  %v4783_v3 = vadd.f32 %v4674_v43, %v1469_v39 }
 0x2ca   :  { %v2029_v45 = vrot.slane %v4764_v5, 1  ;;  %v1684_v50 = vpack.c.bf16 %v1501_v2, %v1501_v2  ;;  %v1475_v12 = vmul.f32 %v4669_v0, %v4512_v36  ;;  %v4791_v27 = vrot.slane %v4719_v54, 1 }
 0x2cb   :  { %v1484_v22 = vadd.f32 %v4674_v43, %v1467_v63  ;;  %v4799_v48 = vrot.slane %v4753_v52, 1  ;;  %v2022_v7 = vrot.slane %v4735_v4, 1  ;;  %v1895_v41 = vshll.u32 %v4753_v52, 16 }
 0x2cc   :  { %v1738_v11 = vshrl.u32 %v1684_v50, 16  ;;  %v1492_v15 = vadd.f32 %v4674_v43, %v1475_v12  ;;  %v1741_v9 = vshll.u32 %v1684_v50, 16  ;;  %v1470_v19 = vmul.f32 %v4669_v0, %v4465_v60 }
 0x2cd   :  { %v1500_v36 = vmax.f32 %v1484_v22, 0.0  ;;  %v1897_v21 = vrot.slane %v1895_v41, 1  ;;  %v1893_v60 = vshrl.u32 %v4753_v52, 16  ;;  %v1499_v2 = vmax.f32 %v1483_v1, 0.0 }
 0x2ce   :  { %2198 = vrot.lane.b32.xlu1 %v4743_v20, %s3352_s5  ;;  %2182 = vrot.lane.b32.xlu0 %v4753_v52, %s3352_s5  ;;  %v1740_v31 = vrot.slane %v1738_v11, 7  ;;  %v1508_v34 = vmax.f32 %v1492_v15, 0.0  ;;  %v4813_v38 = vadd.f32 %v4674_v43, %v1470_v19  ;;  %v1507_v22 = vmax.f32 %v4689_v51, 0.0 }
 0x2cf   :  { %2180 = vrot.lane.b32.xlu2 %v4727_v32, %s3352_s5  ;;  %v1683_v24 = vpack.c.bf16 %v1500_v36, %v1500_v36  ;;  %v4821_v50 = vor.u32 %v1897_v21, %v1893_v60  ;;  %v1682_v12 = vpack.c.bf16 %v1499_v2, %v1499_v2  ;;  %v1937_v51 = vshll.u32 %v4719_v54, 16 }
 0x2d0   :  { %v1743_v23 = vor.u32 %v1741_v9, %v1740_v31  ;;  %v1691_v8 = vpack.c.bf16 %v1508_v34, %v1508_v34  ;;  %v1502_v34 = vmax.f32 %v4783_v3, 0.0  ;;  %v1886_v21 = vshrl.u32 %v4727_v32, 16 }
 0x2d1   :  { %v1731_v49 = vshrl.u32 %v1683_v24, 16  ;;  %v1734_v63 = vshll.u32 %v1683_v24, 16  ;;  %v1724_v9 = vshrl.u32 %v1682_v12, 16  ;;  %v1690_v24 = vpack.c.bf16 %v1507_v22, %v1507_v22 }
 0x2d2   :  { %v1840_v6 = vsel %vm4601_vm13, 0, %v1743_v23  ;;  %v1787_v0 = vshrl.u32 %v1691_v8, 16  ;;  %v1790_v1 = vshll.u32 %v1691_v8, 16  ;;  %v1727_v2 = vshll.u32 %v1682_v12, 16 }
 0x2d3   :  { %v4817_v44 = vsel %vm4606_vm0, %v1840_v6, 0  ;;  %v1733_v25 = vrot.slane %v1731_v49, 7  ;;  %v1726_v8 = vrot.slane %v1724_v9, 7  ;;  %v1685_v6 = vpack.c.bf16 %v1502_v34, %v1502_v34 }
 0x2d4   :  { %v1916_v39 = vshll.u32 %v4817_v44, 16  ;;  %v1789_v43 = vrot.slane %v1787_v0, 7  ;;  %v1914_v31 = vshrl.u32 %v4817_v44, 16  ;;  %v1510_v49 = vmax.f32 %v4695_v53, 0.0 }
 0x2d5   :  { %v1736_v11 = vor.u32 %v1734_v63, %v1733_v25  ;;  %v1780_v60 = vshrl.u32 %v1690_v24, 16  ;;  %v1939_v0 = vrot.slane %v1937_v51, 1  ;;  %v1935_v63 = vshrl.u32 %v4719_v54, 16 }
 0x2d6   :  { %2040 = vrot.lane.b32.xlu1 %v4767_v47, %s3346_s22  ;;  %2084 = vrot.lane.b32.xlu0 %v4764_v5, %s3347_s23  ;;  %v1918_v15 = vrot.slane %v1916_v39, 1  ;;  %v1792_v36 = vor.u32 %v1790_v1, %v1789_v43  ;;  %v1729_v43 = vor.u32 %v1727_v2, %v1726_v8  ;;  %v1693_v22 = vpack.c.bf16 %v1510_v49, %v1510_v49 }
 0x2d7   :  { %2052 = vrot.lane.b32.xlu2 %v2029_v45, %s3346_s22  ;;  %v1839_v23 = vsel %vm4601_vm13, 0, %v1736_v11  ;;  %v1745_v11 = vshrl.u32 %v1685_v6, 16  ;;  %v1782_v53 = vrot.slane %v1780_v60, 7  ;;  %v4863_v12 = vrot.slane %v4743_v20, 1 }
 0x2d8   :  { %v4844_v3 = vsel %vm4606_vm0, %v1839_v23, 0  ;;  %v1847_v19 = vsel %vm4601_vm13, 0, %v1792_v36  ;;  %v1783_v36 = vshll.u32 %v1690_v24, 16  ;;  %v1838_v9 = vsel %vm4601_vm13, 0, %v1729_v43 }
 0x2d9   :  { %v4855_v39 = vsel %vm4606_vm0, %v1847_v19, 0  ;;  %v1747_v34 = vrot.slane %v1745_v11, 7  ;;  %v1801_v23 = vshrl.u32 %v1693_v22, 16  ;;  %v1907_v51 = vshrl.u32 %v4844_v3, 16 }
 0x2da   :  { %v1958_v1 = vshll.u32 %v4855_v39, 16  ;;  %v1748_v49 = vshll.u32 %v1685_v6, 16  ;;  %v1930_v24 = vshll.u32 %v4764_v5, 16  ;;  %v4879_v60 = vsel %vm4606_vm0, %v1838_v9, 0 }
 0x2db   :  { %v1956_v2 = vshrl.u32 %v4855_v39, 16  ;;  %v1803_v43 = vrot.slane %v1801_v23, 7  ;;  %v1928_v23 = vshrl.u32 %v4764_v5, 16  ;;  %v5019_v62 = vrot.slane %v4844_v3, 1 }
 0x2dc   :  { %v1960_v19 = vrot.slane %v1958_v1, 1 }
 0x2de   :  { %2150 = vrot.lane.b32.xlu1 %v4767_v47, %s3353_s8  ;;  %2196 = vrot.lane.b32.xlu0 %v4719_v54, %s3352_s5 }
 0x2df   :  { %2166 = vrot.lane.b32.xlu2 %v4791_v27, %s3353_s8 }
 0x2e6   :  { %2242 = vrot.lane.b32.xlu1 %v4799_v48, %s3354_s27  ;;  %2038 = vrot.lane.b32.xlu0 %v2022_v7, %s3346_s22 }
 0x2e7   :  { %2256 = vrot.lane.b32.xlu2 %v4791_v27, %s3354_s27  ;;  %v4888_v11 = vpop.permute.xlu2 %1976 }
 0x2e8   :  { %v2271_v57 = vsel %vm973_vm2, %v4621_v59, %v4888_v11  ;;  %v3301_v11 = vld [vmem:[%s5951_s2 + $0x18] sm:$0xff] }
 0x2ee   :  { %2164 = vrot.lane.b32.xlu1 %v2029_v45, %s3353_s8  ;;  %2148 = vrot.lane.b32.xlu0 %v2022_v7, %s3353_s8  ;;  %v1888_v45 = vshll.u32 %v4727_v32, 16  ;;  %v4835_v7 = vor.u32 %v1918_v15, %v1914_v31  ;;  %v4860_v15 = vor.u32 %v1939_v0, %v1935_v63  ;;  %v1509_v0 = vmax.f32 %v4692_v33, 0.0 }
 0x2ef   :  { %1982 = vrot.lane.b32.xlu2 %v4821_v50, %s3343_s30  ;;  %v1750_v63 = vor.u32 %v1748_v49, %v1747_v34  ;;  %v1804_v33 = vshll.u32 %v1693_v22, 16  ;;  %v1900_v49 = vshrl.u32 %v4879_v60, 16 }
 0x2f0   :  { %v1890_v41 = vrot.slane %v1888_v45, 1  ;;  %v1881_v45 = vshll.u32 %v4735_v4, 16 }
 0x2f1   :  { %v1841_v34 = vsel %vm4601_vm13, 0, %v1750_v63 }
 0x2f2   :  { %v4850_v25 = vor.u32 %v1890_v41, %v1886_v21  ;;  %v1785_v41 = vor.u32 %v1783_v36, %v1782_v53  ;;  %v1883_v8 = vrot.slane %v1881_v45, 1  ;;  %v4890_v53 = vor.u32 %v1960_v19, %v1956_v2 }
 0x2f3   :  { %v1902_v45 = vshll.u32 %v4879_v60, 16  ;;  %v1692_v36 = vpack.c.bf16 %v1509_v0, %v1509_v0 }
 0x2f4   :  { %v1846_v6 = vsel %vm4601_vm13, 0, %v1785_v41 }
 0x2f5   :  { %v4898_v9 = vsel %vm4606_vm0, %v1846_v6, 0  ;;  %v1904_v41 = vrot.slane %v1902_v45, 1 }
 0x2f6   :  { %2042 = vrot.lane.b32.xlu1 %v4799_v48, %s3346_s22  ;;  %2240 = vrot.lane.b32.xlu0 %v4767_v47, %s3354_s27  ;;  %v1909_v47 = vshll.u32 %v4844_v3, 16  ;;  %6000 = vst [vmem:[#allocation16_spill] sm:$0xff] %v4898_v9  ;;  %v1951_v22 = vshll.u32 %v4898_v9, 16 }
 0x2f7   :  { %1988 = vrot.lane.b32.xlu2 %v4835_v7, %s3343_s30  ;;  %v4912_v2 = vor.u32 %v1904_v41, %v1900_v49 }
 0x2f8   :  { %v1911_v31 = vrot.slane %v1909_v47, 1  ;;  %v1879_v47 = vshrl.u32 %v4735_v4, 16  ;;  %v1953_v63 = vrot.slane %v1951_v22, 1 }
 0x2fa   :  { %v4874_v21 = vor.u32 %v1911_v31, %v1907_v51  ;;  %v1884_v1 = vor.u32 %v1883_v8, %v1879_v47  ;;  %v1932_v31 = vrot.slane %v1930_v24, 1  ;;  %v1806_v51 = vor.u32 %v1804_v33, %v1803_v43  ;;  %v4915_v43 = vpop.permute.xlu2 %2036 }
 0x2fb   :  { %v4906_v8 = vsel %vm4606_vm0, %v1841_v34, 0  ;;  %v1794_v24 = vshrl.u32 %v1692_v36, 16  ;;  %v1949_v33 = vshrl.u32 %v4898_v9, 16  ;;  %v1797_v34 = vshll.u32 %v1692_v36, 16 }
 0x2fc   :  { %v1933_v19 = vor.u32 %v1932_v31, %v1928_v23  ;;  %v1849_v0 = vsel %vm4601_vm13, 0, %v1806_v51  ;;  %v1923_v47 = vshll.u32 %v4906_v8, 16  ;;  %v1921_v41 = vshrl.u32 %v4906_v8, 16 }
 0x2fd   :  { %v4923_v6 = vsel %vm4606_vm0, %v1849_v0, 0  ;;  %v1796_v45 = vrot.slane %v1794_v24, 7  ;;  %v4926_v23 = vor.u32 %v1953_v63, %v1949_v33  ;;  %v1944_v0 = vshll.u32 %v4743_v20, 16 }
 0x2fe   :  { %1980 = vrot.lane.b32.xlu1 %v4850_v25, %s3343_s30  ;;  %2258 = vrot.lane.b32.xlu0 %v4863_v12, %s3354_s27  ;;  %v1925_v31 = vrot.slane %v1923_v47, 1  ;;  %v1972_v51 = vshll.u32 %v4923_v6, 16  ;;  %v1970_v24 = vshrl.u32 %v4923_v6, 16 }
 0x2ff   :  { %1994 = vrot.lane.b32.xlu2 %v4860_v15, %s3343_s30  ;;  %v1799_v22 = vor.u32 %v1797_v34, %v1796_v45  ;;  %v1946_v63 = vrot.slane %v1944_v0, 1 }
 0x300   :  { %v4932_v49 = vor.u32 %v1925_v31, %v1921_v41  ;;  %v1974_v61 = vrot.slane %v1972_v51, 1  ;;  %v1942_v31 = vshrl.u32 %v4743_v20, 16 }
 0x301   :  { %v1848_v36 = vsel %vm4601_vm13, 0, %v1799_v22 }
 0x302   :  { %v4944_v45 = vor.u32 %v1974_v61, %v1970_v24  ;;  %v4948_v33 = vsel %vm4606_vm0, %v1848_v36, 0  ;;  %v1947_v34 = vor.u32 %v1946_v63, %v1942_v31 }
 0x303   :  { %v1965_v51 = vshll.u32 %v4948_v33, 16  ;;  %v1963_v22 = vshrl.u32 %v4948_v33, 16 }
 0x305   :  { %v1967_v61 = vrot.slane %v1965_v51, 1  ;;  %v2025_v51 = vrot.slane %v4879_v60, 1 }
 0x306   :  { %1986 = vrot.lane.b32.xlu1 %v4874_v21, %s3343_s30  ;;  %1978 = vrot.lane.b32.xlu0 %v1884_v1, %s3343_s30 }
 0x307   :  { %2000 = vrot.lane.b32.xlu2 %v4890_v53, %s3343_s30  ;;  %v4960_v0 = vor.u32 %v1967_v61, %v1963_v22 }
 0x30e   :  { %1992 = vrot.lane.b32.xlu1 %v1933_v19, %s3343_s30  ;;  %1984 = vrot.lane.b32.xlu0 %v4912_v2, %s3343_s30 }
 0x30f   :  { %2116 = vrot.lane.b32.xlu2 %v4850_v25, %s3348_s6 }
 0x316   :  { %1998 = vrot.lane.b32.xlu1 %v4926_v23, %s3343_s30  ;;  %1990 = vrot.lane.b32.xlu0 %v4932_v49, %s3343_s30 }
 0x317   :  { %2212 = vrot.lane.b32.xlu2 %v4821_v50, %s3355_s9  ;;  %v4942_v47 = vpop.permute.xlu2 %1633 }
 0x31e   :  { %2004 = vrot.lane.b32.xlu1 %v4944_v45, %s3343_s30  ;;  %1996 = vrot.lane.b32.xlu0 %v1947_v34, %s3343_s30 }
 0x31f   :  { %2130 = vrot.lane.b32.xlu2 %v1933_v19, %s3348_s6  ;;  %v4968_v19 = vpop.permute.xlu1 %1660 }
 0x321   :  { %v4956_v41 = vpop.permute.xlu2 %2068 }
 0x326   :  { %2114 = vrot.lane.b32.xlu1 %v1884_v1, %s3348_s6  ;;  %2002 = vrot.lane.b32.xlu0 %v4960_v0, %s3343_s30 }
 0x327   :  { %2226 = vrot.lane.b32.xlu2 %v4860_v15, %s3355_s9 }
 0x329   :  { %v4966_v36 = vpop.permute.xlu2 %2180 }
 0x32e   :  { %2210 = vrot.lane.b32.xlu1 %v4850_v25, %s3355_s9  ;;  %2132 = vrot.lane.b32.xlu0 %v4860_v15, %s3348_s6 }
 0x32f   :  { %2074 = vrot.lane.b32.xlu2 %v4879_v60, %s3347_s23 }
 0x331   :  { %v4976_v1 = vpop.permute.xlu2 %2052 }
 0x336   :  { %2072 = vrot.lane.b32.xlu1 %v4753_v52, %s3347_s23  ;;  %2228 = vrot.lane.b32.xlu0 %v1947_v34, %s3355_s9 }
 0x337   :  { %2152 = vrot.lane.b32.xlu2 %v4799_v48, %s3353_s8 }
 0x338   :  { %v4980_v24 = vpop.permute.xlu1 %2086  ;;  %v4985_v63 = vpop.permute.xlu0 %2070 }
 0x339   :  { %v4987_v25 = vpop.permute.xlu2 %2166 }
 0x33e   :  { %2120 = vrot.lane.b32.xlu1 %v4912_v2, %s3348_s6  ;;  %2118 = vrot.lane.b32.xlu0 %v4821_v50, %s3348_s6 }
 0x33f   :  { %2186 = vrot.lane.b32.xlu2 %v4844_v3, %s3352_s5 }
 0x340   :  { %v4991_v15 = vpop.permute.xlu1 %2198  ;;  %v4997_v31 = vpop.permute.xlu0 %2182 }
 0x341   :  { %v4999_v48 = vpop.permute.xlu2 %2256 }
 0x346   :  { %2184 = vrot.lane.b32.xlu1 %v4879_v60, %s3352_s5  ;;  %2154 = vrot.lane.b32.xlu0 %v2025_v51, %s3353_s8 }
 0x347   :  { %2244 = vrot.lane.b32.xlu2 %v2025_v51, %s3354_s27 }
 0x348   :  { %v2041_v61 = vpop.permute.xlu1 %2040  ;;  %v2085_v22 = vpop.permute.xlu0 %2084 }
 0x349   :  { %v1983_v58 = vpop.permute.xlu2 %1982 }
 0x34a   :  { %v2277_v55 = vsel %vm973_vm2, %v4753_v52, %v1983_v58 }
 0x34e   :  { %2216 = vrot.lane.b32.xlu1 %v4874_v21, %s3355_s9  ;;  %2214 = vrot.lane.b32.xlu0 %v4912_v2, %s3355_s9  ;;  %v5031_v2 = vrot.slane %v4898_v9, 1 }
 0x34f   :  { %2056 = vrot.lane.b32.xlu2 %v4863_v12, %s3346_s22 }
 0x350   :  { %v5008_v50 = vpop.permute.xlu1 %2150  ;;  %v2197_v18 = vpop.permute.xlu0 %2196 }
 0x351   :  { %v5014_v40 = vpop.permute.xlu2 %1988 }
 0x352   :  { %6001 = vst [vmem:[#allocation17_spill] sm:$0xff] %v5014_v40 }
 0x356   :  { %2054 = vrot.lane.b32.xlu1 %v4791_v27, %s3346_s22  ;;  %2246 = vrot.lane.b32.xlu0 %v5019_v62, %s3354_s27 }
 0x357   :  { %2134 = vrot.lane.b32.xlu2 %v1947_v34, %s3348_s6 }
 0x358   :  { %v5021_v29 = vpop.permute.xlu1 %2242  ;;  %v2039_v28 = vpop.permute.xlu0 %2038 }
 0x359   :  { %v5026_v46 = vpop.permute.xlu2 %1994 }
 0x35a   :  { %v2289_v42 = vsel %vm973_vm2, %v4719_v54, %v5026_v46 }
 0x35e   :  { %2090 = vrot.lane.b32.xlu1 %v4898_v9, %s3347_s23  ;;  %2088 = vrot.lane.b32.xlu0 %v4743_v20, %s3347_s23 }
 0x35f   :  { %2170 = vrot.lane.b32.xlu2 %v5031_v2, %s3353_s8 }
 0x360   :  { %v2165_v27 = vpop.permute.xlu1 %2164  ;;  %v5039_v40 = vpop.permute.xlu0 %2148 }
 0x361   :  { %v5037_v34 = vpop.permute.xlu2 %2000 }
 0x362   :  { %6002 = vst [vmem:[#allocation18_spill] sm:$0xff] %v5037_v34 }
 0x366   :  { %2168 = vrot.lane.b32.xlu1 %v4863_v12, %s3353_s8  ;;  %2136 = vrot.lane.b32.xlu0 %v4926_v23, %s3348_s6 }
 0x367   :  { %2230 = vrot.lane.b32.xlu2 %v4926_v23, %s3355_s9 }
 0x368   :  { %v2043_v56 = vpop.permute.xlu1 %2042  ;;  %v5052_v34 = vpop.permute.xlu0 %2240 }
 0x369   :  { %v5050_v14 = vsel %vm1039_vm4, %v2277_v55, %v2043_v56  ;;  %v2117_v16 = vpop.permute.xlu2 %2116  ;;  %v2531_v56 = vld [vmem:[%s5951_s2 + $0x20] sm:$0xf] }
 0x36a   :  { %v2589_v23 = vunpack.c.l.b16 %v2531_v56 }
 0x36c   :  { %v2594_v37 = vpack.c.b16 %v2589_v23, %v2589_v23  ;;  %v5090_v23 = vrot.slane %v4855_v39, 1 }
 0x36e   :  { %2202 = vrot.lane.b32.xlu1 %v4855_v39, %s3352_s5  ;;  %2200 = vrot.lane.b32.xlu0 %v4898_v9, %s3352_s5 }
 0x36f   :  { %2046 = vrot.lane.b32.xlu2 %v5019_v62, %s3346_s22 }
 0x370   :  { %v1981_v12 = vpop.permute.xlu1 %1980  ;;  %v5060_v52 = vpop.permute.xlu0 %2258 }
 0x371   :  { %v2213_v58 = vpop.permute.xlu2 %2212  ;;  %v2275_v55 = vsel %vm973_vm2, %v4727_v32, %v1981_v12  ;;  %v2626_v32 = vsel %vm2624_vm11, %v2594_v37, 0  ;;  %vm2945_vm11 = vcmask 1044484  }
 0x372   :  { %v5072_v9 = vsel %vm1039_vm4, %v2275_v55, %v2041_v61  ;;  %2631 = vmatpush.bf16.msra.mxu1 %v2626_v32  ;;  %3305 = vmatpush.bf16.msra.mxu2 %v2626_v32 }
 0x376   :  { %2044 = vrot.lane.b32.xlu1 %v2025_v51, %s3346_s22  ;;  %2232 = vrot.lane.b32.xlu0 %v4890_v53, %s3355_s9  ;;  %v2301_v51 = vsel %vm1039_vm4, %v2271_v57, %v4915_v43 }
 0x377   :  { %2076 = vrot.lane.b32.xlu2 %v4844_v3, %s3347_s23  ;;  %v2347_v61 = vsel %vm1105_vm6, %v2301_v51, %v2085_v22  ;;  %2632 = vmatpush.bf16.msra.mxu1 %v3301_v11 }
 0x378   :  { %v5074_v30 = vpop.permute.xlu1 %1986  ;;  %v1979_v55 = vpop.permute.xlu0 %1978  ;;  %3306 = vmatpush.bf16.msra.mxu2 %v3301_v11 }
 0x379   :  { %v2131_v12 = vpop.permute.xlu2 %2130  ;;  %v2273_v37 = vsel %vm973_vm2, %v4735_v4, %v1979_v55  ;;  %v3300_v4 = vld [vmem:[%s5951_s2 + $0x10] sm:$0xff] }
 0x37a   :  { %v2379_v56 = vsel %vm1171_vm8, %v2347_v61, %v2131_v12  ;;  %v2303_v43 = vsel %vm1039_vm4, %v2273_v37, %v2039_v28  ;;  %v3298_v37 = vld [vmem:[%s5951_s2] sm:$0xff] }
 0x37b   :  { %v2412_v57 = vsel %vm2394_vm12, %v2379_v56, %v2165_v27  ;;  %v2333_v32 = vsel %vm1105_vm6, %v2303_v43, %v4985_v63  ;;  %2633 = vmatpush.bf16.msra.mxu1 %v3300_v4 }
 0x37c   :  { %v2445_v22 = vsel %vm2427_vm14, %v2412_v57, %v2197_v18  ;;  %v2365_v61 = vsel %vm1171_vm8, %v2333_v32, %v2117_v16  ;;  %v3299_v18 = vld [vmem:[%s5951_s2 + $0x8] sm:$0xff]  ;;  %3307 = vmatpush.bf16.msra.mxu2 %v3300_v4 }
 0x37d   :  { %v2398_v27 = vsel %vm2394_vm12, %v2365_v61, %v5008_v50 }
 0x37e   :  { %2262 = vrot.lane.b32.xlu1 %v5090_v23, %s3354_s27  ;;  %2260 = vrot.lane.b32.xlu0 %v5031_v2, %s3354_s27  ;;  %v2431_v50 = vsel %vm2427_vm14, %v2398_v27, %v4997_v31  ;;  %v2331_v27 = vsel %vm1105_vm6, %v2301_v51, %v4956_v41 }
 0x37f   :  { %2124 = vrot.lane.b32.xlu2 %v4835_v7, %s3348_s6  ;;  %v2463_v12 = vsel %vm2459_vm15, %v2431_v50, %v2213_v58  ;;  %2634 = vmatpush.bf16.msra.mxu1 %v3299_v18  ;;  %v22_v58 = vld [vmem:[%s5950_s3 + $0x4] sm:$0x1] }
 0x380   :  { %v1993_v28 = vpop.permute.xlu1 %1992  ;;  %v5112_v16 = vpop.permute.xlu0 %1984  ;;  %v2495_v56 = vsel %vm2491_vm1, %v2463_v12, %v5021_v29  ;;  %3308 = vmatpush.bf16.msra.mxu2 %v3299_v18  ;;  %v1636_v43 = vmul.f32 %v4942_v47, %v22_v58 }
 0x381   :  { %v2227_v63 = vpop.permute.xlu2 %2226  ;;  %v2287_v41 = vsel %vm973_vm2, %v4764_v5, %v1993_v28  ;;  %v2549_v12 = vunpack.c.l.b16 %v2495_v56 }
 0x382   :  { %v2477_v11 = vsel %vm2459_vm15, %v2445_v22, %v2227_v63  ;;  %v1637_v4 = vperm.slane %v1636_v43, 0  ;;  %v5168_v63 = vrot.slane %v4906_v8, 1  ;;  %v2317_v50 = vsel %vm1039_vm4, %v2287_v41, %v4976_v1 }
 0x383   :  { %v5120_v55 = vsel %vm2491_vm1, %v2477_v11, %v4999_v48  ;;  %2635 = vmatpush.bf16.msra.mxu1 %v3298_v37 }
 0x384   :  { %3309 = vmatpush.bf16.msra.mxu2 %v3298_v37 }
 0x386   :  { %2122 = vrot.lane.b32.xlu1 %v4874_v21, %s3348_s6  ;;  %2078 = vrot.lane.b32.xlu0 %v4817_v44, %s3347_s23  ;;  %v2027_v21 = vrot.slane %v4817_v44, 1 }
 0x387   :  { %2188 = vrot.lane.b32.xlu2 %v4817_v44, %s3352_s5 }
 0x388   :  { %v5129_v31 = vpop.permute.xlu1 %1998  ;;  %v5137_v29 = vpop.permute.xlu0 %1990 }
 0x389   :  { %v5135_v48 = vpop.permute.xlu2 %2074 }
 0x38e   :  { %2158 = vrot.lane.b32.xlu1 %v2027_v21, %s3353_s8  ;;  %2156 = vrot.lane.b32.xlu0 %v5019_v62, %s3353_s8 }
 0x38f   :  { %2220 = vrot.lane.b32.xlu2 %v4932_v49, %s3355_s9 }
 0x390   :  { %v5144_v57 = vpop.permute.xlu1 %2004  ;;  %v5153_v22 = vpop.permute.xlu0 %1996 }
 0x391   :  { %v5151_v32 = vpop.permute.xlu2 %2152 }
 0x396   :  { %2218 = vrot.lane.b32.xlu1 %v4835_v7, %s3355_s9  ;;  %1639 = vrot.lane.b32.xlu0 %v1637_v4, %s3343_s30 }
 0x397   :  { %2058 = vrot.lane.b32.xlu2 %v5031_v2, %s3346_s22 }
 0x398   :  { %v2115_v61 = vpop.permute.xlu1 %2114  ;;  %v5165_v18 = vpop.permute.xlu0 %2002 }
 0x399   :  { %v2363_v62 = vsel %vm1171_vm8, %v2331_v27, %v2115_v61  ;;  %v5163_v47 = vpop.permute.xlu2 %2186  ;;  %v2556_v27 = vunpack.c.l.b16 %v5120_v55 }
 0x39a   :  { %v2396_v7 = vsel %vm2394_vm12, %v2363_v62, %v5039_v40 }
 0x39b   :  { %v2429_v2 = vsel %vm2427_vm14, %v2396_v7, %v4966_v36  ;;  %v2349_v36 = vsel %vm1105_vm6, %v2317_v50, %v4980_v24 }
 0x39e   :  { %2250 = vrot.lane.b32.xlu1 %v5168_v63, %s3354_s27  ;;  %2190 = vrot.lane.b32.xlu0 %v4906_v8, %s3352_s5 }
 0x39f   :  { %2094 = vrot.lane.b32.xlu2 %v4948_v33, %s3347_s23 }
 0x3a0   :  { %v2211_v51 = vpop.permute.xlu1 %2210  ;;  %v2133_v11 = vpop.permute.xlu0 %2132 }
 0x3a1   :  { %v2461_v40 = vsel %vm2459_vm15, %v2429_v2, %v2211_v51  ;;  %v2245_v37 = vpop.permute.xlu2 %2244  ;;  %v2381_v1 = vsel %vm1171_vm8, %v2349_v36, %v2133_v11 }
 0x3a2   :  { %v2493_v5 = vsel %vm2491_vm1, %v2461_v40, %v5052_v34  ;;  %v2414_v43 = vsel %vm2394_vm12, %v2381_v1, %v4987_v25  ;;  %v2337_v1 = vsel %vm1105_vm6, %v5050_v14, %v5135_v48 }
 0x3a3   :  { %v2548_v28 = vunpack.c.l.b16 %v2493_v5  ;;  %v2447_v24 = vsel %vm2427_vm14, %v2414_v43, %v4991_v15 }
 0x3a5   :  { %v2564_v58 = vpack.c.b16 %v2549_v12, %v2548_v28 }
 0x3a6   :  { %2092 = vrot.lane.b32.xlu1 %v4855_v39, %s3347_s23  ;;  %2248 = vrot.lane.b32.xlu0 %v2027_v21, %s3354_s27 }
 0x3a7   :  { %3286 = vmatmul.msk.bf16.vlgmr.msra.gmra.mxu1 %vm2599_vm3, %v2564_v58  ;;  %2172 = vrot.lane.b32.xlu2 %v5090_v23, %s3353_s8 }
 0x3a8   :  { %v2073_v34 = vpop.permute.xlu1 %2072  ;;  %v2229_v56 = vpop.permute.xlu0 %2228 }
 0x3a9   :  { %v2479_v4 = vsel %vm2459_vm15, %v2447_v24, %v2229_v56  ;;  %v5204_v62 = vpop.permute.xlu2 %2056  ;;  %v2335_v28 = vsel %vm1105_vm6, %v5072_v9, %v2073_v34 }
 0x3aa   :  { %v2511_v61 = vsel %vm2491_vm1, %v2479_v4, %v5060_v52  ;;  %v1503_v52 = vmax.f32 %v4813_v38, 0.0  ;;  %v5227_v38 = vrot.slane %v4948_v33, 1 }
 0x3ab   :  { %v2557_v25 = vunpack.c.l.b16 %v2511_v61 }
 0x3ac   :  { %v1686_v51 = vpack.c.bf16 %v1503_v52, %v1503_v52 }
 0x3ad   :  { %v2568_v7 = vpack.c.b16 %v2557_v25, %v2556_v27 }
 0x3ae   :  { %2140 = vrot.lane.b32.xlu1 %v4960_v0, %s3348_s6  ;;  %2060 = vrot.lane.b32.xlu0 %v5090_v23, %s3346_s22  ;;  %v1752_v40 = vshrl.u32 %v1686_v51, 16  ;;  %v5224_v23 = vrot.slane %v4923_v6, 1  ;;  %v1755_v36 = vshll.u32 %v1686_v51, 16 }
 0x3af   :  { %2206 = vrot.lane.b32.xlu2 %v4923_v6, %s3352_s5  ;;  %3290 = vmatmul.msk.bf16.vlgmr.msra.gmra.mxu2 %vm2599_vm3, %v2568_v7 }
 0x3b0   :  { %v2121_v41 = vpop.permute.xlu1 %2120  ;;  %v2119_v15 = vpop.permute.xlu0 %2118 }
 0x3b1   :  { %v5216_v55 = vpop.permute.xlu2 %2134  ;;  %v2369_v43 = vsel %vm1171_vm8, %v2337_v1, %v2121_v41 }
 0x3b6   :  { %2204 = vrot.lane.b32.xlu1 %v4948_v33, %s3352_s5  ;;  %2138 = vrot.lane.b32.xlu0 %v4890_v53, %s3348_s6  ;;  %v1754_v53 = vrot.slane %v1752_v40, 7 }
 0x3b7   :  { %2048 = vrot.lane.b32.xlu2 %v2027_v21, %s3346_s22  ;;  %v2367_v21 = vsel %vm1171_vm8, %v2335_v28, %v2119_v15 }
 0x3b8   :  { %v2185_v2 = vpop.permute.xlu1 %2184  ;;  %v2155_v50 = vpop.permute.xlu0 %2154  ;;  %v2400_v9 = vsel %vm2394_vm12, %v2367_v21, %v5151_v32  ;;  %v1757_v58 = vor.u32 %v1755_v36, %v1754_v53 }
 0x3b9   :  { %v5236_v11 = vpop.permute.xlu2 %2170  ;;  %v2433_v34 = vsel %vm2427_vm14, %v2400_v9, %v2185_v2  ;;  %v2402_v24 = vsel %vm2394_vm12, %v2369_v43, %v2155_v50 }
 0x3ba   :  { %v1842_v14 = vsel %vm4601_vm13, 0, %v1757_v58  ;;  %v2435_v48 = vsel %vm2427_vm14, %v2402_v24, %v5163_v47 }
 0x3be   :  { %2236 = vrot.lane.b32.xlu1 %v4944_v45, %s3355_s9  ;;  %2174 = vrot.lane.b32.xlu0 %v5227_v38, %s3353_s8 }
 0x3bf   :  { %2266 = vrot.lane.b32.xlu2 %v5224_v23, %s3354_s27 }
 0x3c0   :  { %v2217_v5 = vpop.permute.xlu1 %2216  ;;  %v2215_v12 = vpop.permute.xlu0 %2214 }
 0x3c1   :  { %v2465_v56 = vsel %vm2459_vm15, %v2433_v34, %v2215_v12  ;;  %v2467_v61 = vsel %vm2459_vm15, %v2435_v48, %v2217_v5  ;;  %v5259_v25 = vpop.permute.xlu2 %2230  ;;  %v6003_v34 = vrot.slane %v4621_v59, 1  ;;  %v2291_v48 = vsel %vm973_vm2, %v4743_v20, %v5153_v22 }
 0x3c2   :  { %v2497_v32 = vsel %vm2491_vm1, %v2465_v56, %v2245_v37 }
 0x3c3   :  { %v2550_v41 = vunpack.c.l.b16 %v2497_v32 }
 0x3c6   :  { %2264 = vrot.lane.b32.xlu1 %v5227_v38, %s3354_s27  ;;  %2234 = vrot.lane.b32.xlu0 %v4960_v0, %s3355_s9  ;;  %v1511_v0 = vmax.f32 %v4698_v13, 0.0 }
 0x3c7   :  { %2126 = vrot.lane.b32.xlu2 %v4932_v49, %s3348_s6  ;;  %v1862_v49 = vsel %vm4606_vm0, %v1842_v14, 0 }
 0x3c8   :  { %v2055_v4 = vpop.permute.xlu1 %2054  ;;  %v2247_v27 = vpop.permute.xlu0 %2246  ;;  %v2146_v52 = vrot.slane %v1862_v49, 1  ;;  %v2103_v2 = vshll.u32 %v1862_v49, 16  ;;  %v1694_v51 = vpack.c.bf16 %v1511_v0, %v1511_v0  ;;  %v2101_v13 = vshrl.u32 %v1862_v49, 16 }
 0x3c9   :  { %v2499_v7 = vsel %vm2491_vm1, %v2467_v61, %v2247_v27  ;;  %v5270_v28 = vpop.permute.xlu2 %2046  ;;  %v2319_v17 = vsel %vm1039_vm4, %v2289_v42, %v2055_v4 }
 0x3ca   :  { %v2551_v15 = vunpack.c.l.b16 %v2499_v7  ;;  %v2105_v40 = vrot.slane %v2103_v2, 1  ;;  %v1808_v5 = vshrl.u32 %v1694_v51, 16  ;;  %v1811_v36 = vshll.u32 %v1694_v51, 16 }
 0x3cc   :  { %v2565_v47 = vpack.c.b16 %v2551_v15, %v2550_v41  ;;  %v2106_v53 = vor.u32 %v2105_v40, %v2101_v13  ;;  %v1810_v12 = vrot.slane %v1808_v5, 7 }
 0x3ce   :  { %2082 = vrot.lane.b32.xlu1 %v1862_v49, %s3347_s23  ;;  %2050 = vrot.lane.b32.xlu0 %v5168_v63, %s3346_s22  ;;  %v1813_v9 = vor.u32 %v1811_v36, %v1810_v12 }
 0x3cf   :  { %2162 = vrot.lane.b32.xlu2 %v2146_v52, %s3353_s8  ;;  %3287 = vmatmul.msk.bf16.gmra.mxu1 %vm2599_vm3, %v2565_v47 }
 0x3d0   :  { %v2091_v37 = vpop.permute.xlu1 %2090  ;;  %v2089_v50 = vpop.permute.xlu0 %2088 }
 0x3d1   :  { %v5279_v58 = vpop.permute.xlu2 %2076  ;;  %v2351_v20 = vsel %vm1105_vm6, %v2319_v17, %v2089_v50 }
 0x3d2   :  { %v2383_v54 = vsel %vm1171_vm8, %v2351_v20, %v5216_v55 }
 0x3d6   :  { %2160 = vrot.lane.b32.xlu1 %v5168_v63, %s3353_s8  ;;  %2080 = vrot.lane.b32.xlu0 %v4906_v8, %s3347_s23  ;;  %v1850_v63 = vsel %vm4601_vm13, 0, %v1813_v9 }
 0x3d7   :  { %2222 = vrot.lane.b32.xlu2 %v2106_v53, %s3355_s9  ;;  %v1870_v56 = vsel %vm4606_vm0, %v1850_v63, 0 }
 0x3d8   :  { %v2169_v21 = vpop.permute.xlu1 %2168  ;;  %v2137_v1 = vpop.permute.xlu0 %2136  ;;  %v2110_v14 = vshll.u32 %v1870_v56, 16  ;;  %v2108_v46 = vshrl.u32 %v1870_v56, 16 }
 0x3d9   :  { %v2125_v27 = vpop.permute.xlu2 %2124  ;;  %v2416_v4 = vsel %vm2394_vm12, %v2383_v54, %v2169_v21 }
 0x3da   :  { %v2112_v0 = vrot.slane %v2110_v14, 1 }
 0x3dc   :  { %v2113_v41 = vor.u32 %v2112_v0, %v2108_v46 }
 0x3de   :  { %2194 = vrot.lane.b32.xlu1 %v4621_v59, %s3352_s5  ;;  %2128 = vrot.lane.b32.xlu0 %v2106_v53, %s3348_s6  ;;  %v2321_v59 = vsel %vm1039_vm4, %v2291_v48, %v5204_v62  ;;  %v2147_v53 = vrot.slane %v1870_v56, 1  ;;  %v6005_v48 = vld [vmem:[#allocation10_spill] sm:$0xff] }
 0x3df   :  { %2254 = vrot.lane.b32.xlu2 %v6003_v34, %s3354_s27  ;;  %v2353_v61 = vsel %vm1105_vm6, %v2321_v59, %v2091_v37 }
 0x3e0   :  { %v2203_v43 = vpop.permute.xlu1 %2202  ;;  %v2201_v24 = vpop.permute.xlu0 %2200  ;;  %v2385_v22 = vsel %vm1171_vm8, %v2353_v61, %v2137_v1  ;;  %v6006_v61 = vld [vmem:[#allocation2_spill] sm:$0xff] }
 0x3e1   :  { %v2418_v62 = vsel %vm2394_vm12, %v2385_v22, %v5236_v11  ;;  %v2449_v15 = vsel %vm2427_vm14, %v2416_v4, %v2201_v24  ;;  %v2189_v51 = vpop.permute.xlu2 %2188 }
 0x3e2   :  { %v2481_v2 = vsel %vm2459_vm15, %v2449_v15, %v5259_v25 }
 0x3e6   :  { %2252 = vrot.lane.b32.xlu1 %v2146_v52, %s3354_s27  ;;  %2192 = vrot.lane.b32.xlu0 %v1862_v49, %s3352_s5  ;;  %v2451_v49 = vsel %vm2427_vm14, %v2418_v62, %v2203_v43  ;;  %v2281_v43 = vsel %vm973_vm2, %v4844_v3, %v5074_v30  ;;  %v6007_v62 = vld [vmem:[#allocation12_spill] sm:$0xff] }
 0x3e7   :  { %2096 = vrot.lane.b32.xlu2 %v4923_v6, %s3347_s23  ;;  %v2311_v63 = vsel %vm1039_vm4, %v2281_v43, %v5270_v28 }
 0x3e8   :  { %v2045_v32 = vpop.permute.xlu1 %2044  ;;  %v2233_v7 = vpop.permute.xlu0 %2232 }
 0x3e9   :  { %v2483_v52 = vsel %vm2459_vm15, %v2451_v49, %v2233_v7  ;;  %v2221_v25 = vpop.permute.xlu2 %2220  ;;  %v6008_v49 = vld [vmem:[#allocation4_spill] sm:$0xff] }
 0x3ee   :  { %2064 = vrot.lane.b32.xlu1 %v5224_v23, %s3346_s22  ;;  %2224 = vrot.lane.b32.xlu0 %v4646_v35, %s3355_s9 }
 0x3ef   :  { %2144 = vrot.lane.b32.xlu2 %v2113_v41, %s3348_s6 }
 0x3f0   :  { %v2263_v47 = vpop.permute.xlu1 %2262  ;;  %v2261_v37 = vpop.permute.xlu0 %2260 }
 0x3f1   :  { %v2515_v55 = vsel %vm2491_vm1, %v2483_v52, %v2263_v47  ;;  %v2513_v50 = vsel %vm2491_vm1, %v2481_v2, %v2261_v37 }
 0x3f2   :  { %v2559_v11 = vunpack.c.l.b16 %v2515_v55  ;;  %v2558_v40 = vunpack.c.l.b16 %v2513_v50  ;;  %v6009_v55 = vld [vmem:[#allocation8_spill] sm:$0xff] }
 0x3f4   :  { %v2569_v5 = vpack.c.b16 %v2559_v11, %v2558_v40 }
 0x3f6   :  { %2142 = vrot.lane.b32.xlu1 %v4944_v45, %s3348_s6  ;;  %2062 = vrot.lane.b32.xlu0 %v5227_v38, %s3346_s22  ;;  %v5331_v45 = vpop.permute.xlu2 %2058 }
 0x3f7   :  { %2208 = vrot.lane.b32.xlu2 %v1870_v56, %s3352_s5  ;;  %3291 = vmatmul.msk.bf16.gmra.mxu2 %vm2599_vm3, %v2569_v5 }
 0x3f8   :  { %v2123_v13 = vpop.permute.xlu1 %2122  ;;  %v2079_v35 = vpop.permute.xlu0 %2078 }
 0x3fe   :  { %2178 = vrot.lane.b32.xlu1 %v2147_v53, %s3353_s8  ;;  %2098 = vrot.lane.b32.xlu0 %v1870_v56, %s3347_s23  ;;  %v2095_v3 = vpop.permute.xlu2 %2094  ;;  %v6004_v56 = vld [vmem:[#allocation5_spill] sm:$0xff] }
 0x400   :  { %v2159_v21 = vpop.permute.xlu1 %2158  ;;  %v2157_v12 = vpop.permute.xlu0 %2156 }
 0x406   :  { %2268 = vrot.lane.b32.xlu1 %v2147_v53, %s3354_s27  ;;  %2176 = vrot.lane.b32.xlu0 %v5224_v23, %s3353_s8  ;;  %v2341_v23 = vsel %vm1105_vm6, %v2311_v63, %v2079_v35  ;;  %v2173_v2 = vpop.permute.xlu2 %2172 }
 0x407   :  { %v2373_v28 = vsel %vm1171_vm8, %v2341_v23, %v2125_v27 }
 0x408   :  { %v2219_v36 = vpop.permute.xlu1 %2218  ;;  %v5335_v38 = vpop.permute.xlu0 %1639  ;;  %v2406_v59 = vsel %vm2394_vm12, %v2373_v28, %v2159_v21  ;;  %v6014_v28 = vld [vmem:[#allocation13_spill] sm:$0xff] }
 0x409   :  { %v1642_v1 = vmul.f32 %v5335_v38, %v4472_v26  ;;  %v1646_v9 = vmul.f32 %v5335_v38, %v4525_v10  ;;  %v2279_v10 = vsel %vm973_vm2, %v4879_v60, %v5112_v16  ;;  %v1648_v14 = vmul.f32 %v5335_v38, %v6004_v56 }
 0x40a   :  { %v2309_v30 = vsel %vm1039_vm4, %v2279_v10, %v2045_v32  ;;  %v1652_v42 = vmul.f32 %v5335_v38, %v6005_v48  ;;  %v1644_v20 = vmul.f32 %v5335_v38, %v6006_v61  ;;  %v1654_v4 = vmul.f32 %v5335_v38, %v6007_v62  ;;  %v6013_v10 = vld [vmem:[#allocation9_spill] sm:$0xff]  ;;  %v6015_v48 = vld [vmem:[#allocation7_spill] sm:$0xff] }
 0x40b   :  { %v1663_v34 = vadd.f32 %v4968_v19, %v1642_v1  ;;  %v1667_v24 = vadd.f32 %v4968_v19, %v1646_v9  ;;  %v2339_v16 = vsel %vm1105_vm6, %v2309_v30, %v5279_v58  ;;  %v1669_v27 = vadd.f32 %v4968_v19, %v1648_v14  ;;  %v6012_v9 = vld [vmem:[#allocation14_spill] sm:$0xff] }
 0x40c   :  { %v2371_v32 = vsel %vm1171_vm8, %v2339_v16, %v2123_v13  ;;  %v1673_v22 = vadd.f32 %v4968_v19, %v1652_v42  ;;  %v1665_v46 = vadd.f32 %v4968_v19, %v1644_v20  ;;  %v1650_v11 = vmul.f32 %v5335_v38, %v6009_v55 }
 0x40d   :  { %2847 = vrot.lane.b32.xlu2 %v1663_v34, %s3351_s29  ;;  %v2404_v7 = vsel %vm2394_vm12, %v2371_v32, %v2157_v12  ;;  %v6011_v12 = vld [vmem:[#allocation3_spill] sm:$0xff]  ;;  %v1656_v43 = vmul.f32 %v5335_v38, %v6012_v9  ;;  %v1651_v30 = vmul.f32 %v5335_v38, %v6013_v10  ;;  %v1655_v56 = vmul.f32 %v5335_v38, %v6014_v28 }
 0x40e   :  { %2855 = vrot.lane.b32.xlu1 %v1667_v24, %s3351_s29  ;;  %2238 = vrot.lane.b32.xlu0 %v2113_v41, %s3355_s9  ;;  %v2437_v58 = vsel %vm2427_vm14, %v2404_v7, %v2189_v51  ;;  %v1645_v41 = vmul.f32 %v5335_v38, %v6008_v49  ;;  %v1675_v51 = vadd.f32 %v4968_v19, %v1654_v4  ;;  %v2207_v63 = vpop.permute.xlu2 %2206  ;;  %v6019_v4 = vld [vmem:[#allocation11_spill] sm:$0xff] }
 0x40f   :  { %v2469_v52 = vsel %vm2459_vm15, %v2437_v58, %v2219_v36  ;;  %v1671_v13 = vadd.f32 %v4968_v19, %v1650_v11  ;;  %v1649_v36 = vmul.f32 %v5335_v38, %v6011_v12  ;;  %v1677_v23 = vadd.f32 %v4968_v19, %v1656_v43  ;;  %v6020_v43 = vld [vmem:[#allocation17_spill] sm:$0xff] }
 0x410   :  { %v2251_v26 = vpop.permute.xlu1 %2250  ;;  %v2191_v17 = vpop.permute.xlu0 %2190  ;;  %v1666_v5 = vadd.f32 %v4968_v19, %v1645_v41  ;;  %v1647_v42 = vmul.f32 %v5335_v38, %v6015_v48  ;;  %v1672_v20 = vadd.f32 %v4968_v19, %v1651_v30  ;;  %v1653_v49 = vmul.f32 %v5335_v38, %v6019_v4 }
 0x411   :  { %v2439_v60 = vsel %vm2427_vm14, %v2406_v59, %v2191_v17  ;;  %v1670_v24 = vadd.f32 %v4968_v19, %v1649_v36  ;;  %v6016_v59 = vld [vmem:[#allocation18_spill] sm:$0xff] }
 0x412   :  { %v2471_v0 = vsel %vm2459_vm15, %v2439_v60, %v2221_v25  ;;  %v6010_v25 = vld [vmem:[#allocation6_spill] sm:$0xff]  ;;  %v2295_v17 = vsel %vm973_vm2, %v4855_v39, %v6016_v59  ;;  %v1676_v60 = vadd.f32 %v4968_v19, %v1655_v56  ;;  %v1668_v16 = vadd.f32 %v4968_v19, %v1647_v42  ;;  %v6017_v39 = vld [vmem:[#allocation16_spill] sm:$0xff] }
 0x413   :  { %v2503_v15 = vsel %vm2491_vm1, %v2471_v0, %v2251_v26  ;;  %v1643_v21 = vmul.f32 %v5335_v38, %v6010_v25  ;;  %v2293_v7 = vsel %vm973_vm2, %v6017_v39, %v5129_v31  ;;  %v6018_v0 = vld [vmem:[#allocation15_spill] sm:$0xff]  ;;  %v1674_v55 = vadd.f32 %v4968_v19, %v1653_v49 }
 0x414   :  { %v2553_v40 = vunpack.c.l.b16 %v2503_v15  ;;  %v2323_v58 = vsel %vm1039_vm4, %v2293_v7, %v5331_v45 }
 0x415   :  { %2859 = vrot.lane.b32.xlu2 %v1669_v27, %s3351_s29  ;;  %v1664_v34 = vadd.f32 %v4968_v19, %v1643_v21 }
 0x416   :  { %2867 = vrot.lane.b32.xlu1 %v1673_v22, %s3351_s29  ;;  %2851 = vrot.lane.b32.xlu0 %v1665_v46, %s3351_s29  ;;  %v2049_v32 = vpop.permute.xlu2 %2048  ;;  %v1657_v46 = vmul.f32 %v5335_v38, %v6018_v0 }
 0x418   :  { %v2093_v54 = vpop.permute.xlu1 %2092  ;;  %v2249_v47 = vpop.permute.xlu0 %2248 }
 0x419   :  { %v2501_v37 = vsel %vm2491_vm1, %v2469_v52, %v2249_v47  ;;  %v2355_v41 = vsel %vm1105_vm6, %v2323_v58, %v2093_v54  ;;  %v1678_v47 = vadd.f32 %v4968_v19, %v1657_v46  ;;  %v2299_v58 = vsel %vm973_vm2, %v4923_v6, %v5144_v57 }
 0x41a   :  { %v2552_v50 = vunpack.c.l.b16 %v2501_v37 }
 0x41c   :  { %v2566_v35 = vpack.c.b16 %v2553_v40, %v2552_v50 }
 0x41d   :  { %2871 = vrot.lane.b32.xlu2 %v1675_v51, %s3351_s29 }
 0x41e   :  { %2853 = vrot.lane.b32.xlu1 %v1666_v5, %s3351_s29  ;;  %2863 = vrot.lane.b32.xlu0 %v1671_v13, %s3351_s29  ;;  %v2267_v38 = vpop.permute.xlu2 %2266 }
 0x41f   :  { %3288 = vmatmul.msk.bf16.gmra.mxu1 %vm2599_vm3, %v2566_v35 }
 0x420   :  { %v2141_v53 = vpop.permute.xlu1 %2140  ;;  %v2061_v1 = vpop.permute.xlu0 %2060 }
 0x421   :  { %v2325_v61 = vsel %vm1039_vm4, %v2295_v17, %v2061_v1 }
 0x422   :  { %v2357_v27 = vsel %vm1105_vm6, %v2325_v61, %v2095_v3 }
 0x423   :  { %v2389_v62 = vsel %vm1171_vm8, %v2357_v27, %v2141_v53 }
 0x425   :  { %2849 = vrot.lane.b32.xlu2 %v1664_v34, %s3351_s29 }
 0x426   :  { %2861 = vrot.lane.b32.xlu1 %v1670_v24, %s3351_s29  ;;  %2875 = vrot.lane.b32.xlu0 %v1677_v23, %s3351_s29  ;;  %v2127_v25 = vpop.permute.xlu2 %2126  ;;  %v2285_v23 = vsel %vm973_vm2, %v4906_v8, %v5137_v29 }
 0x428   :  { %v2205_v26 = vpop.permute.xlu1 %2204  ;;  %v2139_v14 = vpop.permute.xlu0 %2138 }
 0x429   :  { %v2387_v52 = vsel %vm1171_vm8, %v2355_v41, %v2139_v14 }
 0x42a   :  { %v2420_v45 = vsel %vm2394_vm12, %v2387_v52, %v2173_v2 }
 0x42b   :  { %v2453_v54 = vsel %vm2427_vm14, %v2420_v45, %v2205_v26 }
 0x42d   :  { %2865 = vrot.lane.b32.xlu2 %v1672_v20, %s3351_s29 }
 0x42e   :  { %2873 = vrot.lane.b32.xlu1 %v1676_v60, %s3351_s29  ;;  %2857 = vrot.lane.b32.xlu0 %v1668_v16, %s3351_s29  ;;  %v2163_v36 = vpop.permute.xlu2 %2162 }
 0x430   :  { %v2237_v22 = vpop.permute.xlu1 %2236  ;;  %v2175_v3 = vpop.permute.xlu0 %2174 }
 0x431   :  { %v2422_v15 = vsel %vm2394_vm12, %v2389_v62, %v2175_v3 }
 0x432   :  { %v2455_v31 = vsel %vm2427_vm14, %v2422_v15, %v2207_v63  ;;  %v2283_v63 = vsel %vm973_vm2, %v4817_v44, %v6020_v43  ;;  %v2297_v15 = vsel %vm973_vm2, %v4948_v33, %v5165_v18 }
 0x433   :  { %v2487_v11 = vsel %vm2459_vm15, %v2455_v31, %v2237_v22  ;;  %v2313_v34 = vsel %vm1039_vm4, %v2283_v63, %v2049_v32 }
 0x434   :  { %v2519_v40 = vsel %vm2491_vm1, %v2487_v11, %v2267_v38 }
 0x435   :  { %2877 = vrot.lane.b32.xlu2 %v1678_v47, %s3351_s29  ;;  %v2561_v13 = vunpack.c.l.b16 %v2519_v40 }
 0x436   :  { %2869 = vrot.lane.b32.xlu0 %v1674_v55, %s3351_s29  ;;  %v2223_v26 = vpop.permute.xlu2 %2222 }
 0x438   :  { %v2265_v37 = vpop.permute.xlu1 %2264  ;;  %v2235_v50 = vpop.permute.xlu0 %2234 }
 0x439   :  { %v2485_v51 = vsel %vm2459_vm15, %v2453_v54, %v2235_v50 }
 0x43a   :  { %v2517_v5 = vsel %vm2491_vm1, %v2485_v51, %v2265_v37 }
 0x43b   :  { %v2560_v19 = vunpack.c.l.b16 %v2517_v5 }
 0x43d   :  { %v2570_v2 = vpack.c.b16 %v2561_v13, %v2560_v19 }
 0x43e   :  { %v2255_v8 = vpop.permute.xlu2 %2254 }
 0x43f   :  { %3292 = vmatmul.msk.bf16.gmra.mxu2 %vm2599_vm3, %v2570_v2  ;;  %v2637_v2 = vpop.f32.mrf.mxu1 }
 0x440   :  { %v2083_v35 = vpop.permute.xlu1 %2082  ;;  %v2051_v53 = vpop.permute.xlu0 %2050 }
 0x441   :  { %v2315_v10 = vsel %vm1039_vm4, %v2285_v23, %v2051_v53 }
 0x442   :  { %v2345_v14 = vsel %vm1105_vm6, %v2315_v10, %v2083_v35 }
 0x446   :  { %v2097_v0 = vpop.permute.xlu2 %2096 }
 0x447   :  { %v2639_v35 = vpop.f32.mrf.mxu1 }
 0x448   :  { %v2161_v21 = vpop.permute.xlu1 %2160  ;;  %v2081_v12 = vpop.permute.xlu0 %2080  ;;  %v2678_v63 = vsel %vm973_vm2, %v2639_v35, 0.0 }
 0x449   :  { %v2343_v24 = vsel %vm1105_vm6, %v2313_v34, %v2081_v12  ;;  %v2677_v34 = vsel %vm973_vm2, %v2637_v2, 0.0 }
 0x44a   :  { %v2375_v30 = vsel %vm1171_vm8, %v2343_v24, %v2127_v25  ;;  %v2679_v23 = vadd.f32 %v2678_v63, %v2677_v34 }
 0x44b   :  { %v2408_v48 = vsel %vm2394_vm12, %v2375_v30, %v2161_v21  ;;  %v5489_v21 = vpop.f32.mrf.mxu2 }
 0x44e   :  { %v2145_v49 = vpop.permute.xlu2 %2144 }
 0x44f   :  { %v2642_v53 = vpop.f32.mrf.mxu1 }
 0x450   :  { %v2195_v1 = vpop.permute.xlu1 %2194  ;;  %v2129_v9 = vpop.permute.xlu0 %2128  ;;  %v2680_v24 = vsel %vm973_vm2, %v2642_v53, 0.0 }
 0x451   :  { %v2377_v44 = vsel %vm1171_vm8, %v2345_v14, %v2129_v9  ;;  %v2681_v10 = vadd.f32 %v2680_v24, %v2679_v23 }
 0x452   :  { %v2410_v59 = vsel %vm2394_vm12, %v2377_v44, %v2163_v36 }
 0x453   :  { %v2443_v29 = vsel %vm2427_vm14, %v2410_v59, %v2195_v1  ;;  %v5491_v36 = vpop.f32.mrf.mxu2 }
 0x456   :  { %v2209_v38 = vpop.permute.xlu2 %2208 }
 0x457   :  { %v2644_v25 = vpop.f32.mrf.mxu1 }
 0x458   :  { %v2253_v28 = vpop.permute.xlu1 %2252  ;;  %v2193_v56 = vpop.permute.xlu0 %2192 }
 0x459   :  { %v2441_v42 = vsel %vm2427_vm14, %v2408_v48, %v2193_v56 }
 0x45a   :  { %v2473_v17 = vsel %vm2459_vm15, %v2441_v42, %v2223_v26  ;;  %v2682_v26 = vsel %vm973_vm2, %v2644_v25, 0.0 }
 0x45b   :  { %v2505_v20 = vsel %vm2491_vm1, %v2473_v17, %v2253_v28  ;;  %v2683_v28 = vadd.f32 %v2682_v26, %v2681_v10 }
 0x45c   :  { %v2554_v22 = vunpack.c.l.b16 %v2505_v20  ;;  %v2692_v20 = vsel %vm973_vm2, %v5489_v21, 0.0 }
 0x460   :  { %v2225_v61 = vpop.permute.xlu0 %2224  ;;  %v2065_v16 = vpop.permute.xlu1 %2064 }
 0x461   :  { %v2475_v60 = vsel %vm2459_vm15, %v2443_v29, %v2225_v61  ;;  %v2329_v62 = vsel %vm1039_vm4, %v2299_v58, %v2065_v16  ;;  %v2694_v16 = vsel %vm973_vm2, %v5491_v36, 0.0 }
 0x462   :  { %v2507_v32 = vsel %vm2491_vm1, %v2475_v60, %v2255_v8 }
 0x463   :  { %v2555_v27 = vunpack.c.l.b16 %v2507_v32 }
 0x465   :  { %v2567_v39 = vpack.c.b16 %v2555_v27, %v2554_v22 }
 0x467   :  { %3289 = vmatmul.msk.bf16.gmra.mxu1 %vm2599_vm3, %v2567_v39 }
 0x468   :  { %v2063_v7 = vpop.permute.xlu0 %2062  ;;  %v2143_v46 = vpop.permute.xlu1 %2142 }
 0x469   :  { %v2327_v52 = vsel %vm1039_vm4, %v2297_v15, %v2063_v7 }
 0x46a   :  { %v2359_v6 = vsel %vm1105_vm6, %v2327_v52, %v2097_v0 }
 0x46b   :  { %v2391_v45 = vsel %vm1171_vm8, %v2359_v6, %v2143_v46 }
 0x470   :  { %v2099_v3 = vpop.permute.xlu0 %2098  ;;  %v2179_v31 = vpop.permute.xlu1 %2178 }
 0x471   :  { %v2361_v4 = vsel %vm1105_vm6, %v2329_v62, %v2099_v3 }
 0x472   :  { %v2393_v41 = vsel %vm1171_vm8, %v2361_v4, %v2145_v49 }
 0x473   :  { %v2426_v47 = vsel %vm2394_vm12, %v2393_v41, %v2179_v31 }
 0x474   :  { %v2458_v57 = vsel %vm2427_vm14, %v2426_v47, %v2195_v1 }
 0x475   :  { %v2490_v37 = vsel %vm2459_vm15, %v2458_v57, %v2225_v61 }
 0x476   :  { %v2522_v18 = vsel %vm2491_vm1, %v2490_v37, %v2255_v8 }
 0x477   :  { %v2563_v19 = vunpack.c.l.b16 %v2522_v18 }
 0x478   :  { %v2177_v55 = vpop.permute.xlu0 %2176  ;;  %v2269_v50 = vpop.permute.xlu1 %2268 }
 0x479   :  { %v2424_v11 = vsel %vm2394_vm12, %v2391_v45, %v2177_v55 }
 0x47a   :  { %v2457_v54 = vsel %vm2427_vm14, %v2424_v11, %v2209_v38  ;;  %v5493_v9 = vpop.f32.mrf.mxu2 }
 0x47b   :  { %v2696_v22 = vsel %vm973_vm2, %v5493_v9, 0.0 }
 0x480   :  { %v2239_v33 = vpop.permute.xlu0 %2238 }
 0x481   :  { %v2489_v40 = vsel %vm2459_vm15, %v2457_v54, %v2239_v33 }
 0x482   :  { %v2521_v51 = vsel %vm2491_vm1, %v2489_v40, %v2269_v50  ;;  %v5500_v56 = vpop.f32.mrf.mxu2 }
 0x483   :  { %v2562_v5 = vunpack.c.l.b16 %v2521_v51  ;;  %v2698_v7 = vsel %vm973_vm2, %v5500_v56, 0.0 }
 0x485   :  { %v2571_v13 = vpack.c.b16 %v2563_v19, %v2562_v5 }
 0x487   :  { %3293 = vmatmul.msk.bf16.gmra.mxu2 %vm2599_vm3, %v2571_v13 }
 0x49c   :  { %v2647_v12 = vpop.f32.mrf.mxu1 }
 0x49d   :  { %v2684_v30 = vsel %vm973_vm2, %v2647_v12, 0.0 }
 0x49e   :  { %v2685_v48 = vadd.f32 %v2684_v30, %v2683_v28 }
 0x4a4   :  { %v2649_v1 = vpop.f32.mrf.mxu1 }
 0x4a5   :  { %v2686_v14 = vsel %vm973_vm2, %v2649_v1, 0.0 }
 0x4a6   :  { %v2687_v59 = vadd.f32 %v2686_v14, %v2685_v48 }
 0x4c2   :  { %v5505_v29 = vpop.f32.mrf.mxu2 }
 0x4c3   :  { %v2700_v58 = vsel %vm973_vm2, %v5505_v29, 0.0 }
 0x4ca   :  { %v5511_v27 = vpop.f32.mrf.mxu2 }
 0x4cb   :  { %v2702_v3 = vsel %vm973_vm2, %v5511_v27, 0.0 }
 0x4e4   :  { %v2652_v43 = vpop.f32.mrf.mxu1 }
 0x4e5   :  { %v2688_v42 = vsel %vm973_vm2, %v2652_v43, 0.0 }
 0x4e6   :  { %v2689_v8 = vadd.f32 %v2688_v42, %v2687_v59 }
 0x4ec   :  { %v2654_v44 = vpop.f32.mrf.mxu1 }
 0x4ed   :  { %v2690_v17 = vsel %vm973_vm2, %v2654_v44, 0.0 }
 0x4ee   :  { %v2691_v61 = vadd.f32 %v2690_v17, %v2689_v8 }
 0x4f0   :  { %v2693_v60 = vadd.f32 %v2692_v20, %v2691_v61 }
 0x4f2   :  { %v2695_v32 = vadd.f32 %v2694_v16, %v2693_v60 }
 0x4f4   :  { %v2697_v39 = vadd.f32 %v2696_v22, %v2695_v32 }
 0x4f6   :  { %v2699_v0 = vadd.f32 %v2698_v7, %v2697_v39 }
 0x4f8   :  { %v2701_v62 = vadd.f32 %v2700_v58, %v2699_v0 }
 0x4fa   :  { %v2703_v49 = vadd.f32 %v2702_v3, %v2701_v62 }
 0x50a   :  { %v2672_v46 = vpop.f32.mrf.mxu2 }
 0x50b   :  { %v2704_v4 = vsel %vm973_vm2, %v2672_v46, 0.0 }
 0x50c   :  { %v2705_v41 = vadd.f32 %v2704_v4, %v2703_v49 }
 0x512   :  { %v2674_v15 = vpop.f32.mrf.mxu2 }
 0x513   :  { %v2706_v52 = vsel %vm973_vm2, %v2674_v15, 0.0 }
 0x514   :  { %v2707_v31 = vadd.f32 %v2706_v52, %v2705_v41 }
 0x516   :  { %v2708_v47 = vrot.slane %v2707_v31, 4 }
 0x518   :  { %v2709_v55 = vadd.f32 %v2708_v47, %v2707_v31 }
 0x51a   :  { %v2710_v6 = vrot.slane %v2709_v55, 2 }
 0x51c   :  { %v2711_v57 = vadd.f32 %v2710_v6, %v2709_v55 }
 0x51e   :  { %v2712_v45 = vrot.slane %v2711_v57, 1 }
 0x520   :  { %v2713_v11 = vadd.f32 %v2712_v45, %v2711_v57 }
 0x522   :  { %v2714_v37 = vmul.f32 0.0078125, %v2713_v11 }
 0x524   :  { %v5523_v38 = vsub.f32 %v2637_v2, %v2714_v37  ;;  %v5525_v54 = vsub.f32 %v2639_v35, %v2714_v37  ;;  %v5527_v33 = vsub.f32 %v2642_v53, %v2714_v37  ;;  %v5529_v18 = vsub.f32 %v2644_v25, %v2714_v37 }
 0x525   :  { %v5535_v51 = vsub.f32 %v2647_v12, %v2714_v37  ;;  %v5539_v19 = vsub.f32 %v2649_v1, %v2714_v37  ;;  %v5545_v25 = vsub.f32 %v2652_v43, %v2714_v37  ;;  %v5550_v24 = vsub.f32 %v2654_v44, %v2714_v37 }
 0x526   :  { %v2731_v50 = vmul.f32 %v5523_v38, %v5523_v38  ;;  %v2732_v40 = vmul.f32 %v5525_v54, %v5525_v54  ;;  %v2733_v5 = vmul.f32 %v5527_v33, %v5527_v33  ;;  %v2734_v13 = vmul.f32 %v5529_v18, %v5529_v18 }
 0x527   :  { %v2735_v63 = vmul.f32 %v5535_v51, %v5535_v51  ;;  %v2736_v1 = vmul.f32 %v5539_v19, %v5539_v19  ;;  %v5556_v10 = vsub.f32 %v5489_v21, %v2714_v37  ;;  %v2737_v43 = vmul.f32 %v5545_v25, %v5545_v25 }
 0x528   :  { %v2747_v2 = vsel %vm973_vm2, %v2731_v50, 0.0  ;;  %v2748_v35 = vsel %vm973_vm2, %v2732_v40, 0.0  ;;  %v2750_v12 = vsel %vm973_vm2, %v2733_v5, 0.0  ;;  %v2752_v23 = vsel %vm973_vm2, %v2734_v13, 0.0 }
 0x529   :  { %v2749_v53 = vadd.f32 %v2748_v35, %v2747_v2  ;;  %v2754_v30 = vsel %vm973_vm2, %v2735_v63, 0.0  ;;  %v5562_v14 = vsub.f32 %v5491_v36, %v2714_v37  ;;  %v2738_v48 = vmul.f32 %v5550_v24, %v5550_v24  ;;  %v5611_v2 = vpop.permute.xlu1 %2855  ;;  %v5613_v35 = vpop.permute.xlu0 %2851 }
 0x52a   :  { %v2756_v44 = vsel %vm973_vm2, %v2736_v1, 0.0  ;;  %v5568_v59 = vsub.f32 %v5493_v9, %v2714_v37  ;;  %v2739_v21 = vmul.f32 %v5556_v10, %v5556_v10  ;;  %v2758_v17 = vsel %vm973_vm2, %v2737_v43, 0.0 }
 0x52b   :  { %v2751_v34 = vadd.f32 %v2750_v12, %v2749_v53  ;;  %v5574_v61 = vsub.f32 %v5500_v56, %v2714_v37  ;;  %v2740_v36 = vmul.f32 %v5562_v14, %v5562_v14  ;;  %v2760_v20 = vsel %vm973_vm2, %v2738_v48, 0.0 }
 0x52c   :  { %v5580_v16 = vsub.f32 %v5505_v29, %v2714_v37  ;;  %v2741_v9 = vmul.f32 %v5568_v59, %v5568_v59  ;;  %v2762_v32 = vsel %vm973_vm2, %v2739_v21, 0.0  ;;  %v5586_v39 = vsub.f32 %v5511_v27, %v2714_v37 }
 0x52d   :  { %v2753_v26 = vadd.f32 %v2752_v23, %v2751_v34  ;;  %v2742_v56 = vmul.f32 %v5574_v61, %v5574_v61  ;;  %v2764_v7 = vsel %vm973_vm2, %v2740_v36, 0.0  ;;  %v5591_v58 = vsub.f32 %v2672_v46, %v2714_v37  ;;  %v20_v36 = vld [vmem:[%s5950_s3 + $0x2] sm:$0x1] }
 0x52e   :  { %v2743_v29 = vmul.f32 %v5580_v16, %v5580_v16  ;;  %v2766_v62 = vsel %vm973_vm2, %v2741_v9, 0.0  ;;  %v5596_v4 = vsub.f32 %v2674_v15, %v2714_v37  ;;  %v2744_v27 = vmul.f32 %v5586_v39, %v5586_v39  ;;  %v5609_v37 = vpop.permute.xlu2 %2847 }
 0x52f   :  { %v2755_v28 = vadd.f32 %v2754_v30, %v2753_v26  ;;  %v2768_v49 = vsel %vm973_vm2, %v2742_v56, 0.0  ;;  %v2745_v52 = vmul.f32 %v5591_v58, %v5591_v58 }
 0x530   :  { %v2770_v46 = vsel %vm973_vm2, %v2743_v29, 0.0  ;;  %v2746_v47 = vmul.f32 %v5596_v4, %v5596_v4  ;;  %v2772_v55 = vsel %vm973_vm2, %v2744_v27, 0.0 }
 0x531   :  { %v2757_v42 = vadd.f32 %v2756_v44, %v2755_v28  ;;  %v2774_v15 = vsel %vm973_vm2, %v2745_v52, 0.0  ;;  %v5617_v23 = vpop.permute.xlu1 %2867  ;;  %v5619_v26 = vpop.permute.xlu0 %2863 }
 0x532   :  { %v2776_v45 = vsel %vm973_vm2, %v2746_v47, 0.0 }
 0x533   :  { %v2759_v8 = vadd.f32 %v2758_v17, %v2757_v42 }
 0x535   :  { %v2761_v60 = vadd.f32 %v2760_v20, %v2759_v8 }
 0x536   :  { %v5615_v63 = vpop.permute.xlu2 %2859 }
 0x537   :  { %v2763_v22 = vadd.f32 %v2762_v32, %v2761_v60 }
 0x539   :  { %v2765_v0 = vadd.f32 %v2764_v7, %v2763_v22  ;;  %v2854_v42 = vpop.permute.xlu1 %2853  ;;  %v5623_v21 = vpop.permute.xlu0 %2875 }
 0x53b   :  { %v2767_v3 = vadd.f32 %v2766_v62, %v2765_v0  ;;  %v3332_v62 = vld [vmem:[%s5950_s3 + $0x3] ss:$0 sm:$0xff]  ;;  %s3356_s3 = smov 72  }
 0x53d   :  { %v2769_v41 = vadd.f32 %v2768_v49, %v2767_v3 }
 0x53e   :  { %v5621_v43 = vpop.permute.xlu2 %2871 }
 0x53f   :  { %v2771_v31 = vadd.f32 %v2770_v46, %v2769_v41 }
 0x541   :  { %v2773_v6 = vadd.f32 %v2772_v55, %v2771_v31  ;;  %v2862_v22 = vpop.permute.xlu1 %2861  ;;  %v2858_v56 = vpop.permute.xlu0 %2857 }
 0x543   :  { %v2775_v57 = vadd.f32 %v2774_v15, %v2773_v6 }
 0x545   :  { %v2777_v11 = vadd.f32 %v2776_v45, %v2775_v57 }
 0x546   :  { %v2850_v17 = vpop.permute.xlu2 %2849 }
 0x547   :  { %v2778_v50 = vrot.slane %v2777_v11, 4 }
 0x549   :  { %v2779_v40 = vadd.f32 %v2778_v50, %v2777_v11 }
 0x54b   :  { %v2780_v5 = vrot.slane %v2779_v40, 2 }
 0x54d   :  { %v2781_v13 = vadd.f32 %v2780_v5, %v2779_v40 }
 0x54e   :  { %v2866_v3 = vpop.permute.xlu2 %2865 }
 0x54f   :  { %v2782_v53 = vrot.slane %v2781_v13, 1 }
 0x551   :  { %v2783_v12 = vadd.f32 %v2782_v53, %v2781_v13 }
 0x553   :  { %v2784_v34 = vmul.f32 0.0078125, %v2783_v12 }
 0x555   :  { %v2785_v1 = vadd.f32 1e-05, %v2784_v34 }
 0x557   :  { %3337 = vrsqrt.f32 %v2785_v1  ;;  %vm2792_vm0 = vweird.f32 %v2785_v1 }
 0x55d   :  { %v3338_v30 = vpop.eup %3337 }
 0x55e   :  { %v2787_v28 = vmul.f32 %v3338_v30, %v2785_v1  ;;  %vm2793_vm13 = vweird.f32 %v3338_v30  ;;  %v2874_v1 = vpop.permute.xlu1 %2873 }
 0x55f   :  { %vm2794_vm5 = vmor %vm2792_vm0, %vm2793_vm13  ;;  %vm2948_vm13 = vcmask 1045509   ;;  %vm2951_vm0 = vcmask 1046534  }
 0x560   :  { %v2788_v48 = vmul.f32 %v3338_v30, %v2787_v28 }
 0x562   :  { %v2789_v44 = vmul.f32 0.5, %v2788_v48 }
 0x564   :  { %v2790_v8 = vsub.f32 1.5, %v2789_v44 }
 0x566   :  { %v2791_v20 = vmul.f32 %v3338_v30, %v2790_v8 }
 0x568   :  { %v2795_v60 = vsel %vm2794_vm5, %v3338_v30, %v2791_v20  ;;  %v2870_v30 = vpop.permute.xlu0 %2869  ;;  %vm2954_vm5 = vcmask 1047559  }
 0x569   :  { %v2796_v9 = vmul.f32 %v2795_v60, %v20_v36 }
 0x56b   :  { %v2797_v32 = vperm.slane %v2796_v9, 0 }
 0x56d   :  { %v2798_v7 = vmul.f32 %v2797_v32, %v5523_v38  ;;  %v2799_v0 = vmul.f32 %v2797_v32, %v5525_v54  ;;  %v2800_v29 = vmul.f32 %v2797_v32, %v5527_v33  ;;  %v2801_v27 = vmul.f32 %v2797_v32, %v5529_v18 }
 0x56e   :  { %v2802_v49 = vmul.f32 %v2797_v32, %v5535_v51  ;;  %v2803_v41 = vmul.f32 %v2797_v32, %v5539_v19  ;;  %v2804_v52 = vmul.f32 %v2797_v32, %v5545_v25  ;;  %v2805_v46 = vmul.f32 %v2797_v32, %v5550_v24 }
 0x56f   :  { %v2806_v38 = vmul.f32 %v2797_v32, %v5556_v10  ;;  %v2807_v54 = vmul.f32 %v2797_v32, %v5562_v14  ;;  %v2808_v33 = vmul.f32 %v2797_v32, %v5568_v59  ;;  %v2809_v31 = vmul.f32 %v2797_v32, %v5574_v61 }
 0x570   :  { %v2810_v47 = vmul.f32 %v2797_v32, %v5580_v16  ;;  %v2811_v18 = vmul.f32 %v2797_v32, %v5586_v39  ;;  %v2812_v51 = vmul.f32 %v2797_v32, %v5591_v58  ;;  %v2813_v19 = vmul.f32 %v2797_v32, %v5596_v4 }
 0x571   :  { %v2815_v55 = vadd.f32 %v3332_v62, %v2798_v7  ;;  %v2816_v25 = vadd.f32 %v3332_v62, %v2799_v0  ;;  %v2817_v6 = vadd.f32 %v3332_v62, %v2800_v29  ;;  %v2818_v24 = vadd.f32 %v3332_v62, %v2801_v27 }
 0x572   :  { %v2819_v15 = vadd.f32 %v3332_v62, %v2802_v49  ;;  %v2820_v10 = vadd.f32 %v3332_v62, %v2803_v41  ;;  %v2821_v57 = vadd.f32 %v3332_v62, %v2804_v52  ;;  %v2822_v14 = vadd.f32 %v3332_v62, %v2805_v46 }
 0x573   :  { %v2823_v45 = vadd.f32 %v3332_v62, %v2806_v38  ;;  %v2824_v59 = vadd.f32 %v3332_v62, %v2807_v54  ;;  %v2825_v11 = vadd.f32 %v3332_v62, %v2808_v33  ;;  %v2826_v61 = vadd.f32 %v3332_v62, %v2809_v31 }
 0x574   :  { %v2827_v50 = vadd.f32 %v3332_v62, %v2810_v47  ;;  %v2828_v16 = vadd.f32 %v3332_v62, %v2811_v18  ;;  %v2829_v40 = vadd.f32 %v3332_v62, %v2812_v51  ;;  %v2830_v39 = vadd.f32 %v3332_v62, %v2813_v19 }
 0x575   :  { %v2895_v58 = vadd.f32 %v5609_v37, %v2815_v55  ;;  %v2896_v4 = vadd.f32 %v2850_v17, %v2816_v25  ;;  %v2897_v5 = vadd.f32 %v5613_v35, %v2817_v6  ;;  %v2898_v13 = vadd.f32 %v2854_v42, %v2818_v24  ;;  %v2878_v37 = vpop.permute.xlu2 %2877 }
 0x576   :  { %v2899_v53 = vadd.f32 %v5611_v2, %v2819_v15  ;;  %v2900_v12 = vadd.f32 %v2858_v56, %v2820_v10  ;;  %v2901_v34 = vadd.f32 %v5615_v63, %v2821_v57  ;;  %v2902_v28 = vadd.f32 %v2862_v22, %v2822_v14 }
 0x577   :  { %v2903_v48 = vadd.f32 %v5619_v26, %v2823_v45  ;;  %v2904_v44 = vadd.f32 %v2866_v3, %v2824_v59  ;;  %v2905_v8 = vadd.f32 %v5617_v23, %v2825_v11  ;;  %v2906_v17 = vadd.f32 %v2870_v30, %v2826_v61 }
 0x578   :  { %v2907_v35 = vadd.f32 %v5621_v43, %v2827_v50  ;;  %v2908_v42 = vadd.f32 %v2874_v1, %v2828_v16  ;;  %v2909_v2 = vadd.f32 %v5623_v21, %v2829_v40  ;;  %v2910_v36 = vadd.f32 %v2878_v37, %v2830_v39 }
 0x579   :  { %v5655_v63 = vmax.f32 %v2895_v58, 0.0  ;;  %v5657_v20 = vmax.f32 %v2896_v4, 0.0  ;;  %v5659_v60 = vmax.f32 %v2897_v5, 0.0  ;;  %v5661_v26 = vmax.f32 %v2898_v13, 0.0 }
 0x57a   :  { %v5663_v23 = vmax.f32 %v2899_v53, 0.0  ;;  %v5665_v9 = vmax.f32 %v2900_v12, 0.0  ;;  %v5667_v32 = vmax.f32 %v2901_v34, 0.0  ;;  %v5669_v43 = vmax.f32 %v2902_v28, 0.0 }
 0x57b   :  { %v5671_v21 = vmax.f32 %v2903_v48, 0.0  ;;  %v5673_v22 = vmax.f32 %v2904_v44, 0.0  ;;  %v5675_v56 = vmax.f32 %v2905_v8, 0.0  ;;  %v5677_v7 = vmax.f32 %v2906_v17, 0.0 }
 0x57c   :  { %v5679_v0 = vmax.f32 %v2907_v35, 0.0  ;;  %v5681_v29 = vmax.f32 %v2908_v42, 0.0  ;;  %v5683_v62 = vmax.f32 %v2909_v2, 0.0  ;;  %v5685_v3 = vmax.f32 %v2910_v36, 0.0 }
 0x57d   :  { %v2991_v27 = vrot.slane %v5655_v63, 3  ;;  %v2992_v49 = vrot.slane %v5659_v60, 2  ;;  %v2994_v41 = vrot.slane %v5663_v23, 1  ;;  %v2997_v52 = vrot.slane %v5671_v21, 7 }
 0x57e   :  { %v2999_v46 = vrot.slane %v5675_v56, 6  ;;  %v3001_v38 = vrot.slane %v5679_v0, 5  ;;  %v2974_v54 = vrot.slane %v5655_v63, 2  ;;  %v3003_v31 = vrot.slane %v5683_v62, 4 }
 0x57f   :  { %v2993_v33 = vsel %vm2936_vm7, %v2992_v49, %v2991_v27  ;;  %v2975_v47 = vrot.slane %v5659_v60, 1  ;;  %v2978_v18 = vrot.slane %v5667_v32, 7  ;;  %v2980_v19 = vrot.slane %v5671_v21, 6 }
 0x580   :  { %v2995_v51 = vsel %vm2939_vm9, %v2994_v41, %v2993_v33  ;;  %v2982_v55 = vrot.slane %v5675_v56, 5  ;;  %v2984_v25 = vrot.slane %v5679_v0, 4  ;;  %v2957_v15 = vrot.slane %v5655_v63, 1 }
 0x581   :  { %v2996_v6 = vsel %vm2942_vm10, %v5667_v32, %v2995_v51  ;;  %v2976_v24 = vsel %vm2936_vm7, %v2975_v47, %v2974_v54  ;;  %v2959_v10 = vrot.slane %v5663_v23, 7  ;;  %v2986_v45 = vrot.slane %v5683_v62, 3 }
 0x582   :  { %v2998_v57 = vsel %vm2945_vm11, %v2997_v52, %v2996_v6  ;;  %v2977_v14 = vsel %vm2939_vm9, %v5663_v23, %v2976_v24  ;;  %v2961_v59 = vrot.slane %v5667_v32, 6  ;;  %v2958_v50 = vsel %vm2936_vm7, %v5659_v60, %v2957_v15 }
 0x583   :  { %v3000_v11 = vsel %vm2948_vm13, %v2999_v46, %v2998_v57  ;;  %v2979_v61 = vsel %vm2942_vm10, %v2978_v18, %v2977_v14  ;;  %v2963_v16 = vrot.slane %v5671_v21, 5  ;;  %v2960_v58 = vsel %vm2939_vm9, %v2959_v10, %v2958_v50 }
 0x584   :  { %v3002_v40 = vsel %vm2951_vm0, %v3001_v38, %v3000_v11  ;;  %v2981_v39 = vsel %vm2945_vm11, %v2980_v19, %v2979_v61  ;;  %v2965_v4 = vrot.slane %v5675_v56, 4  ;;  %v2962_v53 = vsel %vm2942_vm10, %v2961_v59, %v2960_v58 }
 0x585   :  { %v3004_v5 = vsel %vm2954_vm5, %v3003_v31, %v3002_v40  ;;  %v2983_v13 = vsel %vm2948_vm13, %v2982_v55, %v2981_v39  ;;  %v2967_v12 = vrot.slane %v5679_v0, 3  ;;  %v2964_v1 = vsel %vm2945_vm11, %v2963_v16, %v2962_v53 }
 0x586   :  { %3005 = vrot.lane.b32.xlu2 %v3004_v5, %s3347_s23  ;;  %v2985_v34 = vsel %vm2951_vm0, %v2984_v25, %v2983_v13  ;;  %v3042_v30 = vrot.slane %v5655_v63, 6  ;;  %v3043_v28 = vrot.slane %v5659_v60, 5  ;;  %v2966_v44 = vsel %vm2948_vm13, %v2965_v4, %v2964_v1  ;;  %s3359_s23 = smov 88  }
 0x587   :  { %v2987_v48 = vsel %vm2954_vm5, %v2986_v45, %v2985_v34  ;;  %v2969_v8 = vrot.slane %v5683_v62, 2  ;;  %v3045_v37 = vrot.slane %v5663_v23, 4  ;;  %v2968_v17 = vsel %vm2951_vm0, %v2967_v12, %v2966_v44 }
 0x588   :  { %2988 = vrot.lane.b32.xlu1 %v2987_v48, %s3346_s22  ;;  %v3044_v35 = vsel %vm2936_vm7, %v3043_v28, %v3042_v30  ;;  %v3047_v42 = vrot.slane %v5667_v32, 3  ;;  %v3049_v2 = vrot.slane %v5671_v21, 2  ;;  %v3051_v49 = vrot.slane %v5675_v56, 1  ;;  %s3358_s22 = smov 96  }
 0x589   :  { %v2970_v36 = vsel %vm2954_vm5, %v2969_v8, %v2968_v17  ;;  %v3046_v27 = vsel %vm2939_vm9, %v3045_v37, %v3044_v35  ;;  %v3025_v41 = vrot.slane %v5655_v63, 5  ;;  %v3054_v46 = vrot.slane %v5683_v62, 7 }
 0x58a   :  { %2971 = vrot.lane.b32.xlu0 %v2970_v36, %s3343_s30  ;;  %v3048_v52 = vsel %vm2942_vm10, %v3047_v42, %v3046_v27  ;;  %v3026_v38 = vrot.slane %v5659_v60, 4  ;;  %v3028_v54 = vrot.slane %v5663_v23, 3  ;;  %v3030_v31 = vrot.slane %v5667_v32, 2  ;;  %s3357_s30 = smov 80  }
 0x58b   :  { %v3050_v33 = vsel %vm2945_vm11, %v3049_v2, %v3048_v52  ;;  %v3032_v47 = vrot.slane %v5671_v21, 1  ;;  %v3035_v18 = vrot.slane %v5679_v0, 7  ;;  %v3008_v55 = vrot.slane %v5655_v63, 4 }
 0x58c   :  { %v3052_v51 = vsel %vm2948_vm13, %v3051_v49, %v3050_v33  ;;  %v3027_v19 = vsel %vm2936_vm7, %v3026_v38, %v3025_v41  ;;  %v3009_v25 = vrot.slane %v5659_v60, 3  ;;  %v3037_v15 = vrot.slane %v5683_v62, 6 }
 0x58d   :  { %v3053_v6 = vsel %vm2951_vm0, %v5679_v0, %v3052_v51  ;;  %v3029_v24 = vsel %vm2939_vm9, %v3028_v54, %v3027_v19  ;;  %v3011_v10 = vrot.slane %v5663_v23, 2  ;;  %v3013_v59 = vrot.slane %v5667_v32, 1 }
 0x58e   :  { %v3055_v57 = vsel %vm2954_vm5, %v3054_v46, %v3053_v6  ;;  %v3031_v14 = vsel %vm2942_vm10, %v3030_v31, %v3029_v24  ;;  %v3010_v45 = vsel %vm2936_vm7, %v3009_v25, %v3008_v55  ;;  %v3016_v50 = vrot.slane %v5675_v56, 7 }
 0x58f   :  { %3056 = vrot.lane.b32.xlu2 %v3055_v57, %s3352_s5  ;;  %v3033_v11 = vsel %vm2945_vm11, %v3032_v47, %v3031_v14  ;;  %v3012_v61 = vsel %vm2939_vm9, %v3011_v10, %v3010_v45  ;;  %v3018_v16 = vrot.slane %v5679_v0, 6  ;;  %v3059_v58 = vrot.slane %v5655_v63, 7 }
 0x590   :  { %v3034_v40 = vsel %vm2948_vm13, %v5675_v56, %v3033_v11  ;;  %v3014_v39 = vsel %vm2942_vm10, %v3013_v59, %v3012_v61  ;;  %v3060_v4 = vrot.slane %v5659_v60, 6  ;;  %v3020_v53 = vrot.slane %v5683_v62, 5 }
 0x591   :  { %v3036_v5 = vsel %vm2951_vm0, %v3035_v18, %v3034_v40  ;;  %v3015_v13 = vsel %vm2945_vm11, %v5671_v21, %v3014_v39  ;;  %v3062_v12 = vrot.slane %v5663_v23, 5  ;;  %v3064_v28 = vrot.slane %v5667_v32, 4 }
 0x592   :  { %v3038_v34 = vsel %vm2954_vm5, %v3037_v15, %v3036_v5  ;;  %v3017_v1 = vsel %vm2948_vm13, %v3016_v50, %v3015_v13  ;;  %v3061_v30 = vsel %vm2936_vm7, %v3060_v4, %v3059_v58  ;;  %v3066_v8 = vrot.slane %v5671_v21, 3 }
 0x593   :  { %3039 = vrot.lane.b32.xlu1 %v3038_v34, %s3353_s8  ;;  %v3019_v48 = vsel %vm2951_vm0, %v3018_v16, %v3017_v1  ;;  %v3063_v44 = vsel %vm2939_vm9, %v3062_v12, %v3061_v30  ;;  %v3068_v37 = vrot.slane %v5675_v56, 2  ;;  %v3101_v42 = vrot.slane %v5657_v20, 1 }
 0x594   :  { %v3021_v17 = vsel %vm2954_vm5, %v3020_v53, %v3019_v48  ;;  %v3065_v35 = vsel %vm2942_vm10, %v3064_v28, %v3063_v44  ;;  %v3103_v2 = vrot.slane %v5665_v9, 7  ;;  %v3070_v27 = vrot.slane %v5679_v0, 1 }
 0x595   :  { %3022 = vrot.lane.b32.xlu0 %v3021_v17, %s3348_s6  ;;  %v3067_v36 = vsel %vm2945_vm11, %v3066_v8, %v3065_v35  ;;  %v3105_v49 = vrot.slane %v5669_v43, 6  ;;  %v3102_v52 = vsel %vm2936_vm7, %v5661_v26, %v3101_v42  ;;  %v3107_v46 = vrot.slane %v5673_v22, 5  ;;  %s3360_s6 = smov 104  }
 0x596   :  { %v3069_v41 = vsel %vm2948_vm13, %v3068_v37, %v3067_v36  ;;  %v3109_v38 = vrot.slane %v5677_v7, 4  ;;  %v3104_v33 = vsel %vm2939_vm9, %v3103_v2, %v3102_v52  ;;  %v3084_v31 = vrot.slane %v5661_v26, 7 }
 0x597   :  { %v3071_v54 = vsel %vm2951_vm0, %v3070_v27, %v3069_v41  ;;  %v3086_v47 = vrot.slane %v5665_v9, 6  ;;  %v3106_v51 = vsel %vm2942_vm10, %v3105_v49, %v3104_v33  ;;  %v3111_v19 = vrot.slane %v5681_v29, 3 }
 0x598   :  { %v3072_v18 = vsel %vm2954_vm5, %v5683_v62, %v3071_v54  ;;  %v3113_v55 = vrot.slane %v5685_v3, 2  ;;  %v3108_v25 = vsel %vm2945_vm11, %v3107_v46, %v3106_v51  ;;  %v3085_v6 = vsel %vm2936_vm7, %v3084_v31, %v5657_v20 }
 0x599   :  { %v3088_v24 = vrot.slane %v5669_v43, 5  ;;  %v3090_v15 = vrot.slane %v5673_v22, 4  ;;  %v3110_v10 = vsel %vm2948_vm13, %v3109_v38, %v3108_v25  ;;  %v3087_v57 = vsel %vm2939_vm9, %v3086_v47, %v3085_v6 }
 0x59a   :  { %v3092_v14 = vrot.slane %v5677_v7, 3  ;;  %v3118_v45 = vrot.slane %v5657_v20, 2  ;;  %v3112_v59 = vsel %vm2951_vm0, %v3111_v19, %v3110_v10  ;;  %v3094_v61 = vrot.slane %v5681_v29, 2 }
 0x59b   :  { %v3089_v11 = vsel %vm2942_vm10, %v3088_v24, %v3087_v57  ;;  %v3119_v50 = vrot.slane %v5661_v26, 1  ;;  %v3114_v16 = vsel %vm2954_vm5, %v3113_v55, %v3112_v59  ;;  %v3096_v39 = vrot.slane %v5685_v3, 1 }
 0x59c   :  { %v3091_v40 = vsel %vm2945_vm11, %v3090_v15, %v3089_v11  ;;  %v3122_v58 = vrot.slane %v5669_v43, 7  ;;  %3115 = vrot.lane.b32.xlu2 %v3114_v16, %s3356_s3  ;;  %v3124_v13 = vrot.slane %v5673_v22, 6  ;;  %v3126_v53 = vrot.slane %v5677_v7, 5 }
 0x59d   :  { %3073 = vrot.lane.b32.xlu0 %v3072_v18, %s3355_s9  ;;  %v3093_v4 = vsel %vm2948_vm13, %v3092_v14, %v3091_v40  ;;  %v3120_v5 = vsel %vm2936_vm7, %v3119_v50, %v3118_v45  ;;  %v3152_v1 = vrot.slane %v5657_v20, 4  ;;  %v3153_v30 = vrot.slane %v5661_v26, 3 }
 0x59e   :  { %v3095_v12 = vsel %vm2951_vm0, %v3094_v61, %v3093_v4  ;;  %v3121_v34 = vsel %vm2939_vm9, %v5665_v9, %v3120_v5  ;;  %v3128_v44 = vrot.slane %v5681_v29, 4  ;;  %v3155_v8 = vrot.slane %v5665_v9, 2 }
 0x59f   :  { %v3097_v28 = vsel %vm2954_vm5, %v3096_v39, %v3095_v12  ;;  %v3123_v48 = vsel %vm2942_vm10, %v3122_v58, %v3121_v34  ;;  %v3130_v17 = vrot.slane %v5685_v3, 3  ;;  %v3154_v35 = vsel %vm2936_vm7, %v3153_v30, %v3152_v1 }
 0x5a0   :  { %3098 = vrot.lane.b32.xlu1 %v3097_v28, %s3354_s27  ;;  %v3125_v37 = vsel %vm2945_vm11, %v3124_v13, %v3123_v48  ;;  %v3157_v42 = vrot.slane %v5669_v43, 1  ;;  %v3156_v36 = vsel %vm2939_vm9, %v3155_v8, %v3154_v35  ;;  %v3160_v27 = vrot.slane %v5677_v7, 7 }
 0x5a1   :  { %v3127_v2 = vsel %vm2948_vm13, %v3126_v53, %v3125_v37  ;;  %v3135_v49 = vrot.slane %v5657_v20, 3  ;;  %v3136_v46 = vrot.slane %v5661_v26, 2  ;;  %v3138_v38 = vrot.slane %v5665_v9, 1 }
 0x5a2   :  { %v3129_v41 = vsel %vm2951_vm0, %v3128_v44, %v3127_v2  ;;  %v3158_v52 = vsel %vm2942_vm10, %v3157_v42, %v3156_v36  ;;  %v3162_v31 = vrot.slane %v5681_v29, 6  ;;  %v3164_v47 = vrot.slane %v5685_v3, 5 }
 0x5a3   :  { %v3131_v54 = vsel %vm2954_vm5, %v3130_v17, %v3129_v41  ;;  %v3159_v33 = vsel %vm2945_vm11, %v5673_v22, %v3158_v52  ;;  %v3137_v51 = vsel %vm2936_vm7, %v3136_v46, %v3135_v49  ;;  %v3141_v19 = vrot.slane %v5673_v22, 7 }
 0x5a4   :  { %v3161_v18 = vsel %vm2948_vm13, %v3160_v27, %v3159_v33  ;;  %v3143_v55 = vrot.slane %v5677_v7, 6  ;;  %v3139_v6 = vsel %vm2939_vm9, %v3138_v38, %v3137_v51  ;;  %v3169_v24 = vrot.slane %v5657_v20, 5 }
 0x5a5   :  { %3132 = vrot.lane.b32.xlu0 %v3131_v54, %s3357_s30  ;;  %v3163_v25 = vsel %vm2951_vm0, %v3162_v31, %v3161_v18  ;;  %v3170_v15 = vrot.slane %v5661_v26, 4  ;;  %v3140_v57 = vsel %vm2942_vm10, %v5669_v43, %v3139_v6  ;;  %v3145_v14 = vrot.slane %v5681_v29, 5 }
 0x5a6   :  { %v3165_v10 = vsel %vm2954_vm5, %v3164_v47, %v3163_v25  ;;  %v3172_v45 = vrot.slane %v5665_v9, 3  ;;  %v3142_v59 = vsel %vm2945_vm11, %v3141_v19, %v3140_v57  ;;  %v3147_v11 = vrot.slane %v5685_v3, 4 }
 0x5a7   :  { %3166 = vrot.lane.b32.xlu2 %v3165_v10, %s3358_s22  ;;  %v3171_v61 = vsel %vm2936_vm7, %v3170_v15, %v3169_v24  ;;  %v3174_v50 = vrot.slane %v5669_v43, 2  ;;  %v3144_v16 = vsel %vm2948_vm13, %v3143_v55, %v3142_v59  ;;  %v3176_v39 = vrot.slane %v5673_v22, 1 }
 0x5a8   :  { %v3173_v40 = vsel %vm2939_vm9, %v3172_v45, %v3171_v61  ;;  %v3203_v58 = vrot.slane %v5657_v20, 7  ;;  %v3146_v4 = vsel %vm2951_vm0, %v3145_v14, %v3144_v16  ;;  %v3204_v13 = vrot.slane %v5661_v26, 6 }
 0x5a9   :  { %v3175_v5 = vsel %vm2942_vm10, %v3174_v50, %v3173_v40  ;;  %v3206_v53 = vrot.slane %v5665_v9, 5  ;;  %v3148_v12 = vsel %vm2954_vm5, %v3147_v11, %v3146_v4  ;;  %v3179_v1 = vrot.slane %v5681_v29, 7 }
 0x5aa   :  { %v3177_v34 = vsel %vm2945_vm11, %v3176_v39, %v3175_v5  ;;  %v3181_v30 = vrot.slane %v5685_v3, 6  ;;  %3149 = vrot.lane.b32.xlu1 %v3148_v12, %s3359_s23  ;;  %v3205_v48 = vsel %vm2936_vm7, %v3204_v13, %v3203_v58  ;;  %v3208_v44 = vrot.slane %v5669_v43, 4 }
 0x5ab   :  { %v3178_v28 = vsel %vm2948_vm13, %v5677_v7, %v3177_v34  ;;  %v3210_v8 = vrot.slane %v5673_v22, 3  ;;  %v3207_v17 = vsel %vm2939_vm9, %v3206_v53, %v3205_v48  ;;  %v3186_v35 = vrot.slane %v5657_v20, 6 }
 0x5ac   :  { %v3180_v37 = vsel %vm2951_vm0, %v3179_v1, %v3178_v28  ;;  %v3187_v42 = vrot.slane %v5661_v26, 5  ;;  %v3209_v36 = vsel %vm2942_vm10, %v3208_v44, %v3207_v17  ;;  %v3212_v27 = vrot.slane %v5677_v7, 2 }
 0x5ad   :  { %v3182_v2 = vsel %vm2954_vm5, %v3181_v30, %v3180_v37  ;;  %v3189_v49 = vrot.slane %v5665_v9, 4  ;;  %v3211_v41 = vsel %vm2945_vm11, %v3210_v8, %v3209_v36  ;;  %v3214_v52 = vrot.slane %v5681_v29, 1 }
 0x5ae   :  { %3183 = vrot.lane.b32.xlu0 %v3182_v2, %s3360_s6  ;;  %v3188_v46 = vsel %vm2936_vm7, %v3187_v42, %v3186_v35  ;;  %v3191_v20 = vrot.slane %v5669_v43, 3  ;;  %v3213_v26 = vsel %vm2948_vm13, %v3212_v27, %v3211_v41  ;;  %v3193_v54 = vrot.slane %v5673_v22, 2 }
 0x5af   :  { %v3190_v38 = vsel %vm2939_vm9, %v3189_v49, %v3188_v46  ;;  %v2935_v33 = vrot.slane %v5659_v60, 7  ;;  %v3215_v9 = vsel %vm2951_vm0, %v3214_v52, %v3213_v26  ;;  %v3195_v47 = vrot.slane %v5677_v7, 1 }
 0x5b0   :  { %v3192_v31 = vsel %vm2942_vm10, %v3191_v20, %v3190_v38  ;;  %v2938_v18 = vrot.slane %v5663_v23, 6  ;;  %v3216_v51 = vsel %vm2954_vm5, %v5685_v3, %v3215_v9  ;;  %v2941_v22 = vrot.slane %v5667_v32, 5 }
 0x5b1   :  { %v3194_v43 = vsel %vm2945_vm11, %v3193_v54, %v3192_v31  ;;  %v2937_v19 = vsel %vm2936_vm7, %v2935_v33, %v5655_v63  ;;  %3217 = vrot.lane.b32.xlu2 %v3216_v51, %s3351_s29  ;;  %v3198_v55 = vrot.slane %v5685_v3, 7  ;;  %v2944_v23 = vrot.slane %v5671_v21, 4 }
 0x5b2   :  { %v3196_v60 = vsel %vm2948_vm13, %v3195_v47, %v3194_v43  ;;  %v2940_v7 = vsel %vm2939_vm9, %v2938_v18, %v2937_v19  ;;  %v2947_v24 = vrot.slane %v5675_v56, 3  ;;  %v2950_v15 = vrot.slane %v5679_v0, 2 }
 0x5b3   :  { %v3197_v25 = vsel %vm2951_vm0, %v5681_v29, %v3196_v60  ;;  %v2943_v6 = vsel %vm2942_vm10, %v2941_v22, %v2940_v7  ;;  %v2953_v10 = vrot.slane %v5683_v62, 1 }
 0x5b4   :  { %v3199_v63 = vsel %vm2954_vm5, %v3198_v55, %v3197_v25  ;;  %v2946_v32 = vsel %vm2945_vm11, %v2944_v23, %v2943_v6 }
 0x5b5   :  { %3200 = vrot.lane.b32.xlu1 %v3199_v63, %s3361_s24  ;;  %v2949_v3 = vsel %vm2948_vm13, %v2947_v24, %v2946_v32 }
 0x5b6   :  { %v2952_v21 = vsel %vm2951_vm0, %v2950_v15, %v2949_v3 }
 0x5b7   :  { %v2955_v29 = vsel %vm2954_vm5, %v2953_v10, %v2952_v21 }
 0x5e0   :  { %v3006_v45 = vpop.permute.xlu2 %3005 }
 0x5e9   :  { %v3057_v61 = vpop.permute.xlu2 %3056 }
 0x5f6   :  { %v3116_v58 = vpop.permute.xlu2 %3115 }
 0x5fa   :  { %v2989_v14 = vpop.permute.xlu1 %2988 }
 0x5fc   :  { %v2972_v57 = vpop.permute.xlu0 %2971 }
 0x5fd   :  { %v3220_v59 = vsel %vm973_vm2, %v2955_v29, %v2972_v57  ;;  %vm3229_vm2 = vcmask 654336  }
 0x5fe   :  { %v3221_v0 = vsel %vm1039_vm4, %v3220_v59, %v2989_v14  ;;  %vm3231_vm4 = vcmask 719872  }
 0x5ff   :  { %v3222_v50 = vsel %vm1105_vm6, %v3221_v0, %v3006_v45  ;;  %vm3233_vm6 = vcmask 785408  }
 0x601   :  { %v3167_v1 = vpop.permute.xlu2 %3166 }
 0x605   :  { %v3040_v11 = vpop.permute.xlu1 %3039 }
 0x607   :  { %v3023_v56 = vpop.permute.xlu0 %3022 }
 0x608   :  { %v3223_v40 = vsel %vm1171_vm8, %v3222_v50, %v3023_v56  ;;  %vm3235_vm8 = vcmask 850944  }
 0x609   :  { %v3224_v62 = vsel %vm2394_vm12, %v3223_v40, %v3040_v11  ;;  %vm3237_vm12 = vcmask 916480  }
 0x60a   :  { %v3225_v4 = vsel %vm2427_vm14, %v3224_v62, %v3057_v61  ;;  %vm3239_vm14 = vcmask 982016  }
 0x60b   :  { %v3218_v17 = vpop.permute.xlu2 %3217 }
 0x60f   :  { %v3074_v16 = vpop.permute.xlu0 %3073 }
 0x610   :  { %v3226_v5 = vsel %vm2459_vm15, %v3225_v4, %v3074_v16 }
 0x612   :  { %v3099_v39 = vpop.permute.xlu1 %3098 }
 0x613   :  { %v3227_v53 = vsel %vm2491_vm1, %v3226_v5, %v3099_v39 }
 0x614   :  { %v3228_v34 = vsel %vm2599_vm3, %v3227_v53, %v3116_v58 }
 0x617   :  { %v3133_v13 = vpop.permute.xlu0 %3132 }
 0x618   :  { %v3230_v30 = vsel %vm3229_vm2, %v3228_v34, %v3133_v13 }
 0x61c   :  { %v3150_v12 = vpop.permute.xlu1 %3149 }
 0x61d   :  { %v3232_v28 = vsel %vm3231_vm4, %v3230_v30, %v3150_v12 }
 0x61e   :  { %v3234_v44 = vsel %vm3233_vm6, %v3232_v28, %v3167_v1 }
 0x620   :  { %v3184_v48 = vpop.permute.xlu0 %3183 }
 0x621   :  { %v3236_v8 = vsel %vm3235_vm8, %v3234_v44, %v3184_v48 }
 0x627   :  { %v3201_v37 = vpop.permute.xlu1 %3200 }
 0x628   :  { %v3238_v35 = vsel %vm3237_vm12, %v3236_v8, %v3201_v37 }
 0x629   :  { %v3240_v42 = vsel %vm3239_vm14, %v3238_v35, %v3218_v17 }
 0x62a   :  { %3241 = vst [vmem:[%s5952_s4] sm:$0xff] %v3240_v42 }

</bundles_post_ra>
